<compile_context>
chip_gen: v5e
topology: v5e:2x2
jax: 0.10.0
libtpu: 0.0.40
codegen_flags: <defaults>
</compile_context>

<pallas_src>
import functools

import jax
import jax.numpy as jnp
from jax.experimental import pallas as pl
from jax.experimental.pallas import tpu as pltpu


# ----------------------------------------------------------------------------
# Kernel 1: stride-1 SeparableConv2d (optional fused input ReLU)
# ----------------------------------------------------------------------------
def _sepconv_s1_kernel(x_ref, dw_ref, s1_ref, b1_ref, pw_ref, s2_ref, b2_ref,
                       o_ref, pad_ref, *, apply_relu):
    """[optional ReLU] -> depthwise 3x3 (stride 1, pad 1) -> folded BN1 ->
    pointwise 1x1 (bf16 MXU) -> folded BN2.  Halo built in VMEM scratch."""
    _, H, W, cin = x_ref.shape
    cout = pw_ref.shape[-1]

    x = x_ref[0].astype(jnp.float32)                       # (H, W, cin)
    if apply_relu:
        x = jnp.maximum(x, 0.0)

    # In-kernel zero halo (avoids a padded HBM copy of the activation tensor).
    pad_ref[...] = jnp.zeros_like(pad_ref)
    pad_ref[1:H + 1, 1:W + 1, :] = x
    xpad = pad_ref[...]                                    # (H+2, W+2, cin)

    w = dw_ref[...].astype(jnp.float32)                    # (9, cin)

    # Depthwise 3x3: init accumulator from the first tap (saves one VALU pass).
    acc = xpad[0:H, 0:W, :] * w[0]
    for kh in range(3):
        for kw in range(3):
            if kh == 0 and kw == 0:
                continue
            acc = acc + xpad[kh:kh + H, kw:kw + W, :] * w[kh * 3 + kw]

    acc = acc * s1_ref[...] + b1_ref[...]                  # folded BN1 (f32)

    # Pointwise 1x1 as a matmul; bf16 operands feed the MXU, f32 accumulation.
    y = jnp.dot(acc.reshape(H * W, cin).astype(jnp.bfloat16),
                pw_ref[...].astype(jnp.bfloat16),
                preferred_element_type=jnp.float32)
    y = y * s2_ref[...] + b2_ref[...]                      # folded BN2 (f32)
    o_ref[0] = y.reshape(H, W, cout)


def sepconv_s1(x, p, apply_relu):
    """SeparableConv2d stride 1, padding 1 (NHWC)."""
    N, H, W, cin = x.shape
    cout = p["pw"].shape[-1]
    kern = functools.partial(_sepconv_s1_kernel, apply_relu=apply_relu)
    return pl.pallas_call(
        kern,
        out_shape=jax.ShapeDtypeStruct((N, H, W, cout), jnp.float32),
        grid=(N,),
        in_specs=[
            pl.BlockSpec((1, H, W, cin), lambda n: (n, 0, 0, 0)),
            pl.BlockSpec((9, cin), lambda n: (0, 0)),
            pl.BlockSpec((1, cin), lambda n: (0, 0)),
            pl.BlockSpec((1, cin), lambda n: (0, 0)),
            pl.BlockSpec((cin, cout), lambda n: (0, 0)),
            pl.BlockSpec((1, cout), lambda n: (0, 0)),
            pl.BlockSpec((1, cout), lambda n: (0, 0)),
        ],
        out_specs=pl.BlockSpec((1, H, W, cout), lambda n: (n, 0, 0, 0)),
        scratch_shapes=[pltpu.VMEM((H + 2, W + 2, cin), jnp.float32)],
        compiler_params=pltpu.CompilerParams(
            dimension_semantics=("parallel",)),
    )(x, p["dw"], p["s1"], p["b1"], p["pw"], p["s2"], p["b2"])


# ----------------------------------------------------------------------------
# Kernel 2: fused stride-2 SeparableConv2d + 1x1/stride-2 shortcut + residual
# ----------------------------------------------------------------------------
def _sep2_shortcut_kernel(rm1_ref, r0_ref, rp1_ref, x_ref, dw_ref, s1_ref,
                          b1_ref, pw_ref, s2_ref, b2_ref, wsc_ref, bsc_ref,
                          o_ref, *, H):
    """One stride-2 output row per grid step.  Direct stride-2 depthwise
    (no full-res compute + slice), folded BNs, bf16 pointwise, and the fused
    shortcut conv + residual add."""
    W, cmid = rm1_ref.shape[2], rm1_ref.shape[3]
    Wo = o_ref.shape[2]
    io = pl.program_id(1)

    # Input rows 2*io-1, 2*io, 2*io+1 (index_map clamps; mask rows that fall
    # outside the image to reproduce padding=1).
    r_m1 = rm1_ref[0, 0].astype(jnp.float32)               # (W, cmid)
    r_0 = r0_ref[0, 0].astype(jnp.float32)
    r_p1 = rp1_ref[0, 0].astype(jnp.float32)
    r_m1 = r_m1 * (io > 0).astype(jnp.float32)
    r_p1 = r_p1 * (2 * io + 1 <= H - 1).astype(jnp.float32)

    w = dw_ref[...].astype(jnp.float32)                    # (9, cmid)
    # Per-kw column taps, summed over kh (VALU).
    t0 = r_m1 * w[0] + r_0 * w[3] + r_p1 * w[6]            # needs col 2*jo-1
    t1 = r_m1 * w[1] + r_0 * w[4] + r_p1 * w[7]            # needs col 2*jo
    t2 = r_m1 * w[2] + r_0 * w[5] + r_p1 * w[8]            # needs col 2*jo+1

    # Stride-2 column decimation (with zero padding at the W edges) expressed
    # as 0/1 selection matmuls -> uses MXU slack, no strided slices needed.
    wo_i = jax.lax.broadcasted_iota(jnp.int32, (Wo, W), 0)
    w_i = jax.lax.broadcasted_iota(jnp.int32, (Wo, W), 1)
    sel_m1 = (w_i == 2 * wo_i - 1).astype(jnp.float32)     # picks col 2*jo-1
    sel_0 = (w_i == 2 * wo_i).astype(jnp.float32)          # picks col 2*jo
    sel_p1 = (w_i == 2 * wo_i + 1).astype(jnp.float32)     # picks col 2*jo+1

    acc = (jnp.dot(sel_m1, t0, preferred_element_type=jnp.float32)
           + jnp.dot(sel_0, t1, preferred_element_type=jnp.float32)
           + jnp.dot(sel_p1, t2, preferred_element_type=jnp.float32))

    acc = acc * s1_ref[...] + b1_ref[...]                  # folded BN1
    y = jnp.dot(acc.astype(jnp.bfloat16), pw_ref[...].astype(jnp.bfloat16),
                preferred_element_type=jnp.float32)
    y = y * s2_ref[...] + b2_ref[...]                      # folded BN2

    # Fused shortcut: 1x1 conv, stride 2, padding 0, with bias.  Even rows are
    # handled by the index_map (row 2*io), even columns by sel_0.
    xs = jnp.dot(sel_0, x_ref[0, 0].astype(jnp.float32),
                 preferred_element_type=jnp.float32)       # (Wo, cin)
    sc = jnp.dot(xs.astype(jnp.bfloat16), wsc_ref[...].astype(jnp.bfloat16),
                 preferred_element_type=jnp.float32) + bsc_ref[...]

    o_ref[0, 0] = y + sc                                   # residual add


def sep2_shortcut_add(sep1, x, p, wsc, bsc):
    """Fused sep_conv2 (stride 2) + shortcut(x) + add (NHWC)."""
    N, H, W, cmid = sep1.shape
    cin = x.shape[-1]
    cout = p["pw"].shape[-1]
    Ho = (H - 1) // 2 + 1
    Wo = (W - 1) // 2 + 1
    kern = functools.partial(_sep2_shortcut_kernel, H=H)
    return pl.pallas_call(
        kern,
        out_shape=jax.ShapeDtypeStruct((N, Ho, Wo, cout), jnp.float32),
        grid=(N, Ho),
        in_specs=[
            # three halo rows of sep_conv1 (block size 1 along H => block index
            # is the row index; clamp at the image border, masked in-kernel)
            pl.BlockSpec((1, 1, W, cmid),
                         lambda n, io: (n, jnp.maximum(2 * io - 1, 0), 0, 0)),
            pl.BlockSpec((1, 1, W, cmid),
                         lambda n, io: (n, 2 * io, 0, 0)),
            pl.BlockSpec((1, 1, W, cmid),
                         lambda n, io: (n, jnp.minimum(2 * io + 1, H - 1), 0, 0)),
            # original input row 2*io for the stride-2 shortcut conv
            pl.BlockSpec((1, 1, W, cin), lambda n, io: (n, 2 * io, 0, 0)),
            # sep_conv2 params
            pl.BlockSpec((9, cmid), lambda n, io: (0, 0)),
            pl.BlockSpec((1, cmid), lambda n, io: (0, 0)),
            pl.BlockSpec((1, cmid), lambda n, io: (0, 0)),
            pl.BlockSpec((cmid, cout), lambda n, io: (0, 0)),
            pl.BlockSpec((1, cout), lambda n, io: (0, 0)),
            pl.BlockSpec((1, cout), lambda n, io: (0, 0)),
            # shortcut conv params
            pl.BlockSpec((cin, cout), lambda n, io: (0, 0)),
            pl.BlockSpec((1, cout), lambda n, io: (0, 0)),
        ],
        out_specs=pl.BlockSpec((1, 1, Wo, cout), lambda n, io: (n, io, 0, 0)),
        compiler_params=pltpu.CompilerParams(
            dimension_semantics=("parallel", "parallel")),
    )(sep1, sep1, sep1, x, p["dw"], p["s1"], p["b1"], p["pw"], p["s2"],
      p["b2"], wsc, bsc)


# ----------------------------------------------------------------------------
# Module forward
# ----------------------------------------------------------------------------
def xception_block(x_nchw, params):
    """forward: returns (shortcut + sep_conv2, sep_conv1), both NCHW."""
    x = jnp.transpose(x_nchw, (0, 2, 3, 1)).astype(jnp.float32)  # -> NHWC

    # sep_conv1 = ReLU -> SepConv(s=1) chain (single leading ReLU per the
    # reference module; fused into the first kernel).
    h = x
    for i, p in enumerate(params["sep1"]):
        h = sepconv_s1(h, p, apply_relu=(i == 0))
    sep_conv1 = h

    # sep_conv2 (stride 2) + shortcut (1x1 conv, stride 2) + residual add,
    # all in one kernel, computed directly at stride 2.
    out = sep2_shortcut_add(sep_conv1, x, params["sep2"],
                            params["shortcut_w"], params["shortcut_b"])

    return (jnp.transpose(out, (0, 3, 1, 2)),
            jnp.transpose(sep_conv1, (0, 3, 1, 2)))


# ----------------------------------------------------------------------------
# Deterministic parameter initialization
# ----------------------------------------------------------------------------
def _fold_bn(gamma, beta, mean, var, eps=1e-5):
    scale = gamma / jnp.sqrt(var + eps)
    bias = beta - mean * scale
    return scale[None, :], bias[None, :]


def init_sepconv_params(key, cin, cout):
    ks = jax.random.split(key, 10)
    dw = 0.2 * jax.random.normal(ks[0], (3, 3, cin), jnp.float32)
    pw = 0.2 * jax.random.normal(ks[1], (cin, cout), jnp.float32)
    g1 = 1.0 + 0.1 * jax.random.normal(ks[2], (cin,), jnp.float32)
    be1 = 0.1 * jax.random.normal(ks[3], (cin,), jnp.float32)
    m1 = 0.05 * jax.random.normal(ks[4], (cin,), jnp.float32)
    v1 = 1.0 + 0.1 * jnp.abs(jax.random.normal(ks[5], (cin,), jnp.float32))
    g2 = 1.0 + 0.1 * jax.random.normal(ks[6], (cout,), jnp.float32)
    be2 = 0.1 * jax.random.normal(ks[7], (cout,), jnp.float32)
    m2 = 0.05 * jax.random.normal(ks[8], (cout,), jnp.float32)
    v2 = 1.0 + 0.1 * jnp.abs(jax.random.normal(ks[9], (cout,), jnp.float32))
    s1, b1 = _fold_bn(g1, be1, m1, v1)
    s2, b2 = _fold_bn(g2, be2, m2, v2)
    return {"dw": dw.reshape(9, cin), "s1": s1, "b1": b1,
            "pw": pw, "s2": s2, "b2": b2}


if __name__ == "__main__":
    key = jax.random.PRNGKey(0)
    N, Cin, H, W = 2, 4, 16, 16
    # XceptionBlock implicitly requires out_channels[-2] == out_channels[-1]
    out_channels = [8, 8, 8]

    keys = jax.random.split(key, 3 + len(out_channels) + 1)
    k_x, k_sc_w, k_sc_b = keys[0], keys[1], keys[2]
    k_sep = keys[3:]

    x = jax.random.normal(k_x, (N, Cin, H, W), jnp.float32)

    chain = [Cin] + list(out_channels)
    sep1 = [init_sepconv_params(k_sep[i], chain[i], chain[i + 1])
            for i in range(len(out_channels))]
    sep2 = init_sepconv_params(k_sep[-1], out_channels[-2], out_channels[-1])

    params = {
        "shortcut_w": 0.2 * jax.random.normal(k_sc_w, (Cin, out_channels[-1]),
                                              jnp.float32),
        "shortcut_b": 0.1 * jax.random.normal(k_sc_b, (1, out_channels[-1]),
                                              jnp.float32),
        "sep1": sep1,
        "sep2": sep2,
    }

    out, sep_conv1 = jax.jit(xception_block)(x, params)
    jax.block_until_ready((out, sep_conv1))

    assert out.shape == (N, out_channels[-1], H // 2, W // 2), out.shape
    assert sep_conv1.shape == (N, out_channels[-1], H, W), sep_conv1.shape
    print("KERNEL_OK")
</pallas_src>

<mosaic_0001>
module attributes {stable_mosaic.version = 11 : i64} {
  func.func @_sepconv_s1_kernel(%arg0: i32, %arg1: memref<1x16x16x4xf32, #tpu.memory_space<vmem>>, %arg2: memref<9x4xf32, #tpu.memory_space<vmem>>, %arg3: memref<1x4xf32, #tpu.memory_space<vmem>>, %arg4: memref<1x4xf32, #tpu.memory_space<vmem>>, %arg5: memref<4x8xf32, #tpu.memory_space<vmem>>, %arg6: memref<1x8xf32, #tpu.memory_space<vmem>>, %arg7: memref<1x8xf32, #tpu.memory_space<vmem>>, %arg8: memref<1x16x16x8xf32, #tpu.memory_space<vmem>>, %arg9: memref<18x18x4xf32, #tpu.memory_space<vmem>>) attributes {dimension_semantics = [#tpu.dimension_semantics<parallel>], iteration_bounds = array<i64: 2>, scalar_prefetch = 0 : i64, scratch_operands = 1 : i64, tpu.core_type = #tpu.core_type<tc>, window_params = [{transform_indices = @transform_0, window_bounds = array<i64: 1, 16, 16, 4>}, {pipeline_mode = #tpu.pipeline_mode<synchronous>, transform_indices = @transform_1, window_bounds = array<i64: 9, 4>}, {pipeline_mode = #tpu.pipeline_mode<synchronous>, transform_indices = @transform_2, window_bounds = array<i64: 1, 4>}, {pipeline_mode = #tpu.pipeline_mode<synchronous>, transform_indices = @transform_3, window_bounds = array<i64: 1, 4>}, {pipeline_mode = #tpu.pipeline_mode<synchronous>, transform_indices = @transform_4, window_bounds = array<i64: 4, 8>}, {pipeline_mode = #tpu.pipeline_mode<synchronous>, transform_indices = @transform_5, window_bounds = array<i64: 1, 8>}, {pipeline_mode = #tpu.pipeline_mode<synchronous>, transform_indices = @transform_6, window_bounds = array<i64: 1, 8>}, {transform_indices = @transform_7, window_bounds = array<i64: 1, 16, 16, 8>}]} {
    %c0 = arith.constant 0 : index
    %c0_0 = arith.constant 0 : index
    %c0_1 = arith.constant 0 : index
    %c0_2 = arith.constant 0 : index
    %0 = vector.load %arg1[%c0, %c0_0, %c0_1, %c0_2] : memref<1x16x16x4xf32, #tpu.memory_space<vmem>>, vector<1x16x16x4xf32>
    %1 = vector.shape_cast %0 : vector<1x16x16x4xf32> to vector<16x16x4xf32>
    %cst = arith.constant 0.000000e+00 : f32
    %2 = vector.broadcast %cst : f32 to vector<16x16x4xf32>
    %3 = arith.maximumf %1, %2 : vector<16x16x4xf32>
    %cst_3 = arith.constant 0.000000e+00 : f32
    %4 = vector.broadcast %cst_3 : f32 to vector<18x18x4xf32>
    %c0_4 = arith.constant 0 : index
    %c0_5 = arith.constant 0 : index
    %c0_6 = arith.constant 0 : index
    %5 = vector.load %arg9[%c0_4, %c0_5, %c0_6] : memref<18x18x4xf32, #tpu.memory_space<vmem>>, vector<18x18x4xf32>
    tpu.vector_store %arg9[%c0_4, %c0_5, %c0_6], %4 {strides = array<i32>} : memref<18x18x4xf32, #tpu.memory_space<vmem>>, vector<18x18x4xf32>,
    %c1 = arith.constant 1 : index
    %c1_7 = arith.constant 1 : index
    %c0_8 = arith.constant 0 : index
    %6 = vector.load %arg9[%c1, %c1_7, %c0_8] : memref<18x18x4xf32, #tpu.memory_space<vmem>>, vector<16x16x4xf32>
    tpu.vector_store %arg9[%c1, %c1_7, %c0_8], %3 {strides = array<i32>} : memref<18x18x4xf32, #tpu.memory_space<vmem>>, vector<16x16x4xf32>,
    %c0_9 = arith.constant 0 : index
    %c0_10 = arith.constant 0 : index
    %c0_11 = arith.constant 0 : index
    %7 = vector.load %arg9[%c0_9, %c0_10, %c0_11] : memref<18x18x4xf32, #tpu.memory_space<vmem>>, vector<18x18x4xf32>
    %c0_12 = arith.constant 0 : index
    %c0_13 = arith.constant 0 : index
    %8 = vector.load %arg2[%c0_12, %c0_13] : memref<9x4xf32, #tpu.memory_space<vmem>>, vector<9x4xf32>
    %9 = vector.extract_strided_slice %7 {offsets = [0, 0, 0], sizes = [16, 16, 4], strides = [1, 1, 1]} : vector<18x18x4xf32> to vector<16x16x4xf32>
    %10 = vector.extract_strided_slice %8 {offsets = [0, 0], sizes = [1, 4], strides = [1, 1]} : vector<9x4xf32> to vector<1x4xf32>
    %11 = vector.shape_cast %10 : vector<1x4xf32> to vector<4xf32>
    %12 = vector.shape_cast %11 : vector<4xf32> to vector<1x1x4xf32>
    %13 = vector.broadcast %12 : vector<1x1x4xf32> to vector<16x16x4xf32>
    %14 = arith.mulf %9, %13 : vector<16x16x4xf32>
    %15 = vector.extract_strided_slice %7 {offsets = [0, 1, 0], sizes = [16, 16, 4], strides = [1, 1, 1]} : vector<18x18x4xf32> to vector<16x16x4xf32>
    %16 = vector.extract_strided_slice %8 {offsets = [1, 0], sizes = [1, 4], strides = [1, 1]} : vector<9x4xf32> to vector<1x4xf32>
    %17 = vector.shape_cast %16 : vector<1x4xf32> to vector<4xf32>
    %18 = vector.shape_cast %17 : vector<4xf32> to vector<1x1x4xf32>
    %19 = vector.broadcast %18 : vector<1x1x4xf32> to vector<16x16x4xf32>
    %20 = arith.mulf %15, %19 : vector<16x16x4xf32>
    %21 = arith.addf %14, %20 : vector<16x16x4xf32>
    %22 = vector.extract_strided_slice %7 {offsets = [0, 2, 0], sizes = [16, 16, 4], strides = [1, 1, 1]} : vector<18x18x4xf32> to vector<16x16x4xf32>
    %23 = vector.extract_strided_slice %8 {offsets = [2, 0], sizes = [1, 4], strides = [1, 1]} : vector<9x4xf32> to vector<1x4xf32>
    %24 = vector.shape_cast %23 : vector<1x4xf32> to vector<4xf32>
    %25 = vector.shape_cast %24 : vector<4xf32> to vector<1x1x4xf32>
    %26 = vector.broadcast %25 : vector<1x1x4xf32> to vector<16x16x4xf32>
    %27 = arith.mulf %22, %26 : vector<16x16x4xf32>
    %28 = arith.addf %21, %27 : vector<16x16x4xf32>
    %29 = vector.extract_strided_slice %7 {offsets = [1, 0, 0], sizes = [16, 16, 4], strides = [1, 1, 1]} : vector<18x18x4xf32> to vector<16x16x4xf32>
    %30 = vector.extract_strided_slice %8 {offsets = [3, 0], sizes = [1, 4], strides = [1, 1]} : vector<9x4xf32> to vector<1x4xf32>
    %31 = vector.shape_cast %30 : vector<1x4xf32> to vector<4xf32>
    %32 = vector.shape_cast %31 : vector<4xf32> to vector<1x1x4xf32>
    %33 = vector.broadcast %32 : vector<1x1x4xf32> to vector<16x16x4xf32>
    %34 = arith.mulf %29, %33 : vector<16x16x4xf32>
    %35 = arith.addf %28, %34 : vector<16x16x4xf32>
    %36 = vector.extract_strided_slice %7 {offsets = [1, 1, 0], sizes = [16, 16, 4], strides = [1, 1, 1]} : vector<18x18x4xf32> to vector<16x16x4xf32>
    %37 = vector.extract_strided_slice %8 {offsets = [4, 0], sizes = [1, 4], strides = [1, 1]} : vector<9x4xf32> to vector<1x4xf32>
    %38 = vector.shape_cast %37 : vector<1x4xf32> to vector<4xf32>
    %39 = vector.shape_cast %38 : vector<4xf32> to vector<1x1x4xf32>
    %40 = vector.broadcast %39 : vector<1x1x4xf32> to vector<16x16x4xf32>
    %41 = arith.mulf %36, %40 : vector<16x16x4xf32>
    %42 = arith.addf %35, %41 : vector<16x16x4xf32>
    %43 = vector.extract_strided_slice %7 {offsets = [1, 2, 0], sizes = [16, 16, 4], strides = [1, 1, 1]} : vector<18x18x4xf32> to vector<16x16x4xf32>
    %44 = vector.extract_strided_slice %8 {offsets = [5, 0], sizes = [1, 4], strides = [1, 1]} : vector<9x4xf32> to vector<1x4xf32>
    %45 = vector.shape_cast %44 : vector<1x4xf32> to vector<4xf32>
    %46 = vector.shape_cast %45 : vector<4xf32> to vector<1x1x4xf32>
    %47 = vector.broadcast %46 : vector<1x1x4xf32> to vector<16x16x4xf32>
    %48 = arith.mulf %43, %47 : vector<16x16x4xf32>
    %49 = arith.addf %42, %48 : vector<16x16x4xf32>
    %50 = vector.extract_strided_slice %7 {offsets = [2, 0, 0], sizes = [16, 16, 4], strides = [1, 1, 1]} : vector<18x18x4xf32> to vector<16x16x4xf32>
    %51 = vector.extract_strided_slice %8 {offsets = [6, 0], sizes = [1, 4], strides = [1, 1]} : vector<9x4xf32> to vector<1x4xf32>
    %52 = vector.shape_cast %51 : vector<1x4xf32> to vector<4xf32>
    %53 = vector.shape_cast %52 : vector<4xf32> to vector<1x1x4xf32>
    %54 = vector.broadcast %53 : vector<1x1x4xf32> to vector<16x16x4xf32>
    %55 = arith.mulf %50, %54 : vector<16x16x4xf32>
    %56 = arith.addf %49, %55 : vector<16x16x4xf32>
    %57 = vector.extract_strided_slice %7 {offsets = [2, 1, 0], sizes = [16, 16, 4], strides = [1, 1, 1]} : vector<18x18x4xf32> to vector<16x16x4xf32>
    %58 = vector.extract_strided_slice %8 {offsets = [7, 0], sizes = [1, 4], strides = [1, 1]} : vector<9x4xf32> to vector<1x4xf32>
    %59 = vector.shape_cast %58 : vector<1x4xf32> to vector<4xf32>
    %60 = vector.shape_cast %59 : vector<4xf32> to vector<1x1x4xf32>
    %61 = vector.broadcast %60 : vector<1x1x4xf32> to vector<16x16x4xf32>
    %62 = arith.mulf %57, %61 : vector<16x16x4xf32>
    %63 = arith.addf %56, %62 : vector<16x16x4xf32>
    %64 = vector.extract_strided_slice %7 {offsets = [2, 2, 0], sizes = [16, 16, 4], strides = [1, 1, 1]} : vector<18x18x4xf32> to vector<16x16x4xf32>
    %65 = vector.extract_strided_slice %8 {offsets = [8, 0], sizes = [1, 4], strides = [1, 1]} : vector<9x4xf32> to vector<1x4xf32>
    %66 = vector.shape_cast %65 : vector<1x4xf32> to vector<4xf32>
    %67 = vector.shape_cast %66 : vector<4xf32> to vector<1x1x4xf32>
    %68 = vector.broadcast %67 : vector<1x1x4xf32> to vector<16x16x4xf32>
    %69 = arith.mulf %64, %68 : vector<16x16x4xf32>
    %70 = arith.addf %63, %69 : vector<16x16x4xf32>
    %c0_14 = arith.constant 0 : index
    %c0_15 = arith.constant 0 : index
    %71 = vector.load %arg3[%c0_14, %c0_15] : memref<1x4xf32, #tpu.memory_space<vmem>>, vector<1x4xf32>
    %72 = vector.shape_cast %71 : vector<1x4xf32> to vector<1x1x4xf32>
    %73 = vector.broadcast %72 : vector<1x1x4xf32> to vector<16x16x4xf32>
    %74 = arith.mulf %70, %73 : vector<16x16x4xf32>
    %c0_16 = arith.constant 0 : index
    %c0_17 = arith.constant 0 : index
    %75 = vector.load %arg4[%c0_16, %c0_17] : memref<1x4xf32, #tpu.memory_space<vmem>>, vector<1x4xf32>
    %76 = vector.shape_cast %75 : vector<1x4xf32> to vector<1x1x4xf32>
    %77 = vector.broadcast %76 : vector<1x1x4xf32> to vector<16x16x4xf32>
    %78 = arith.addf %74, %77 : vector<16x16x4xf32>
    %79 = vector.shape_cast %78 : vector<16x16x4xf32> to vector<256x4xf32>
    %80 = arith.truncf %79 : vector<256x4xf32> to vector<256x4xbf16>
    %c0_18 = arith.constant 0 : index
    %c0_19 = arith.constant 0 : index
    %81 = vector.load %arg5[%c0_18, %c0_19] : memref<4x8xf32, #tpu.memory_space<vmem>>, vector<4x8xf32>
    %82 = arith.truncf %81 : vector<4x8xf32> to vector<4x8xbf16>
    %cst_20 = arith.constant dense<0.000000e+00> : vector<256x8xf32>
    %83 = tpu.matmul %80, %82, %cst_20 {dimension_numbers = #tpu.dot_dimension_numbers<[1], [0], [0], [1], [0, 0, 1, 1], [], []>} : vector<256x4xbf16>, vector<4x8xbf16>, vector<256x8xf32> -> vector<256x8xf32>
    %c0_21 = arith.constant 0 : index
    %c0_22 = arith.constant 0 : index
    %84 = vector.load %arg6[%c0_21, %c0_22] : memref<1x8xf32, #tpu.memory_space<vmem>>, vector<1x8xf32>
    %85 = vector.broadcast %84 : vector<1x8xf32> to vector<256x8xf32>
    %86 = arith.mulf %83, %85 : vector<256x8xf32>
    %c0_23 = arith.constant 0 : index
    %c0_24 = arith.constant 0 : index
    %87 = vector.load %arg7[%c0_23, %c0_24] : memref<1x8xf32, #tpu.memory_space<vmem>>, vector<1x8xf32>
    %88 = vector.broadcast %87 : vector<1x8xf32> to vector<256x8xf32>
    %89 = arith.addf %86, %88 : vector<256x8xf32>
    %90 = vector.shape_cast %89 : vector<256x8xf32> to vector<16x16x8xf32>
    %c0_25 = arith.constant 0 : index
    %c0_26 = arith.constant 0 : index
    %c0_27 = arith.constant 0 : index
    %c0_28 = arith.constant 0 : index
    %91 = vector.load %arg8[%c0_25, %c0_26, %c0_27, %c0_28] : memref<1x16x16x8xf32, #tpu.memory_space<vmem>>, vector<1x16x16x8xf32>
    %92 = vector.shape_cast %91 : vector<1x16x16x8xf32> to vector<16x16x8xf32>
    %93 = vector.shape_cast %90 : vector<16x16x8xf32> to vector<1x16x16x8xf32>
    tpu.vector_store %arg8[%c0_25, %c0_26, %c0_27, %c0_28], %93 {strides = array<i32>} : memref<1x16x16x8xf32, #tpu.memory_space<vmem>>, vector<1x16x16x8xf32>,
    return
  }
  func.func @transform_0(%arg0: i32) -> (i32, i32, i32, i32) {
    %c0_i32 = arith.constant 0 : i32
    %c0_i32_0 = arith.constant 0 : i32
    %c0_i32_1 = arith.constant 0 : i32
    %c0_i32_2 = arith.constant 0 : i32
    return %arg0, %c0_i32, %c0_i32_0, %c0_i32_1 : i32, i32, i32, i32
  }
  func.func @transform_1(%arg0: i32) -> (i32, i32) {
    %c0_i32 = arith.constant 0 : i32
    %c0_i32_0 = arith.constant 0 : i32
    %c0_i32_1 = arith.constant 0 : i32
    return %c0_i32, %c0_i32_0 : i32, i32
  }
  func.func @transform_2(%arg0: i32) -> (i32, i32) {
    %c0_i32 = arith.constant 0 : i32
    %c0_i32_0 = arith.constant 0 : i32
    %c0_i32_1 = arith.constant 0 : i32
    return %c0_i32, %c0_i32_0 : i32, i32
  }
  func.func @transform_3(%arg0: i32) -> (i32, i32) {
    %c0_i32 = arith.constant 0 : i32
    %c0_i32_0 = arith.constant 0 : i32
    %c0_i32_1 = arith.constant 0 : i32
    return %c0_i32, %c0_i32_0 : i32, i32
  }
  func.func @transform_4(%arg0: i32) -> (i32, i32) {
    %c0_i32 = arith.constant 0 : i32
    %c0_i32_0 = arith.constant 0 : i32
    %c0_i32_1 = arith.constant 0 : i32
    return %c0_i32, %c0_i32_0 : i32, i32
  }
  func.func @transform_5(%arg0: i32) -> (i32, i32) {
    %c0_i32 = arith.constant 0 : i32
    %c0_i32_0 = arith.constant 0 : i32
    %c0_i32_1 = arith.constant 0 : i32
    return %c0_i32, %c0_i32_0 : i32, i32
  }
  func.func @transform_6(%arg0: i32) -> (i32, i32) {
    %c0_i32 = arith.constant 0 : i32
    %c0_i32_0 = arith.constant 0 : i32
    %c0_i32_1 = arith.constant 0 : i32
    return %c0_i32, %c0_i32_0 : i32, i32
  }
  func.func @transform_7(%arg0: i32) -> (i32, i32, i32, i32) {
    %c0_i32 = arith.constant 0 : i32
    %c0_i32_0 = arith.constant 0 : i32
    %c0_i32_1 = arith.constant 0 : i32
    %c0_i32_2 = arith.constant 0 : i32
    return %arg0, %c0_i32, %c0_i32_0, %c0_i32_1 : i32, i32, i32, i32
  }
}

module attributes {stable_mosaic.version = 11 : i64} {
  func.func @_sep2_shortcut_kernel(%arg0: i32, %arg1: i32, %arg2: memref<1x1x16x8xf32, #tpu.memory_space<vmem>>, %arg3: memref<1x1x16x8xf32, #tpu.memory_space<vmem>>, %arg4: memref<1x1x16x8xf32, #tpu.memory_space<vmem>>, %arg5: memref<1x1x16x4xf32, #tpu.memory_space<vmem>>, %arg6: memref<9x8xf32, #tpu.memory_space<vmem>>, %arg7: memref<1x8xf32, #tpu.memory_space<vmem>>, %arg8: memref<1x8xf32, #tpu.memory_space<vmem>>, %arg9: memref<8x8xf32, #tpu.memory_space<vmem>>, %arg10: memref<1x8xf32, #tpu.memory_space<vmem>>, %arg11: memref<1x8xf32, #tpu.memory_space<vmem>>, %arg12: memref<4x8xf32, #tpu.memory_space<vmem>>, %arg13: memref<1x8xf32, #tpu.memory_space<vmem>>, %arg14: memref<1x1x8x8xf32, #tpu.memory_space<vmem>>) attributes {dimension_semantics = [#tpu.dimension_semantics<parallel>, #tpu.dimension_semantics<parallel>], iteration_bounds = array<i64: 2, 8>, scalar_prefetch = 0 : i64, scratch_operands = 0 : i64, tpu.core_type = #tpu.core_type<tc>, window_params = [{transform_indices = @transform_0, window_bounds = array<i64: 1, 1, 16, 8>}, {transform_indices = @transform_1, window_bounds = array<i64: 1, 1, 16, 8>}, {transform_indices = @transform_2, window_bounds = array<i64: 1, 1, 16, 8>}, {transform_indices = @transform_3, window_bounds = array<i64: 1, 1, 16, 4>}, {pipeline_mode = #tpu.pipeline_mode<synchronous>, transform_indices = @transform_4, window_bounds = array<i64: 9, 8>}, {pipeline_mode = #tpu.pipeline_mode<synchronous>, transform_indices = @transform_5, window_bounds = array<i64: 1, 8>}, {pipeline_mode = #tpu.pipeline_mode<synchronous>, transform_indices = @transform_6, window_bounds = array<i64: 1, 8>}, {pipeline_mode = #tpu.pipeline_mode<synchronous>, transform_indices = @transform_7, window_bounds = array<i64: 8, 8>}, {pipeline_mode = #tpu.pipeline_mode<synchronous>, transform_indices = @transform_8, window_bounds = array<i64: 1, 8>}, {pipeline_mode = #tpu.pipeline_mode<synchronous>, transform_indices = @transform_9, window_bounds = array<i64: 1, 8>}, {pipeline_mode = #tpu.pipeline_mode<synchronous>, transform_indices = @transform_10, window_bounds = array<i64: 4, 8>}, {pipeline_mode = #tpu.pipeline_mode<synchronous>, transform_indices = @transform_11, window_bounds = array<i64: 1, 8>}, {transform_indices = @transform_12, window_bounds = array<i64: 1, 1, 8, 8>}]} {
    %c0 = arith.constant 0 : index
    %c0_0 = arith.constant 0 : index
    %c0_1 = arith.constant 0 : index
    %c0_2 = arith.constant 0 : index
    %0 = vector.load %arg2[%c0, %c0_0, %c0_1, %c0_2] : memref<1x1x16x8xf32, #tpu.memory_space<vmem>>, vector<1x1x16x8xf32>
    %1 = vector.shape_cast %0 : vector<1x1x16x8xf32> to vector<16x8xf32>
    %c0_3 = arith.constant 0 : index
    %c0_4 = arith.constant 0 : index
    %c0_5 = arith.constant 0 : index
    %c0_6 = arith.constant 0 : index
    %2 = vector.load %arg3[%c0_3, %c0_4, %c0_5, %c0_6] : memref<1x1x16x8xf32, #tpu.memory_space<vmem>>, vector<1x1x16x8xf32>
    %3 = vector.shape_cast %2 : vector<1x1x16x8xf32> to vector<16x8xf32>
    %c0_7 = arith.constant 0 : index
    %c0_8 = arith.constant 0 : index
    %c0_9 = arith.constant 0 : index
    %c0_10 = arith.constant 0 : index
    %4 = vector.load %arg4[%c0_7, %c0_8, %c0_9, %c0_10] : memref<1x1x16x8xf32, #tpu.memory_space<vmem>>, vector<1x1x16x8xf32>
    %5 = vector.shape_cast %4 : vector<1x1x16x8xf32> to vector<16x8xf32>
    %c0_i32 = arith.constant 0 : i32
    %6 = arith.cmpi sgt, %arg1, %c0_i32 : i32
    %7 = arith.extui %6 : i1 to i32
    %8 = arith.sitofp %7 : i32 to f32
    %9 = vector.broadcast %8 : f32 to vector<16x8xf32>
    %10 = arith.mulf %1, %9 : vector<16x8xf32>
    %c2_i32 = arith.constant 2 : i32
    %11 = arith.muli %c2_i32, %arg1 : i32
    %c1_i32 = arith.constant 1 : i32
    %12 = arith.addi %11, %c1_i32 : i32
    %c15_i32 = arith.constant 15 : i32
    %13 = arith.cmpi sle, %12, %c15_i32 : i32
    %14 = arith.extui %13 : i1 to i32
    %15 = arith.sitofp %14 : i32 to f32
    %16 = vector.broadcast %15 : f32 to vector<16x8xf32>
    %17 = arith.mulf %5, %16 : vector<16x8xf32>
    %c0_11 = arith.constant 0 : index
    %c0_12 = arith.constant 0 : index
    %18 = vector.load %arg6[%c0_11, %c0_12] : memref<9x8xf32, #tpu.memory_space<vmem>>, vector<9x8xf32>
    %19 = vector.extract_strided_slice %18 {offsets = [0, 0], sizes = [1, 8], strides = [1, 1]} : vector<9x8xf32> to vector<1x8xf32>
    %20 = vector.shape_cast %19 : vector<1x8xf32> to vector<8xf32>
    %21 = vector.shape_cast %20 : vector<8xf32> to vector<1x8xf32>
    %22 = vector.broadcast %21 : vector<1x8xf32> to vector<16x8xf32>
    %23 = arith.mulf %10, %22 : vector<16x8xf32>
    %24 = vector.extract_strided_slice %18 {offsets = [3, 0], sizes = [1, 8], strides = [1, 1]} : vector<9x8xf32> to vector<1x8xf32>
    %25 = vector.shape_cast %24 : vector<1x8xf32> to vector<8xf32>
    %26 = vector.shape_cast %25 : vector<8xf32> to vector<1x8xf32>
    %27 = vector.broadcast %26 : vector<1x8xf32> to vector<16x8xf32>
    %28 = arith.mulf %3, %27 : vector<16x8xf32>
    %29 = arith.addf %23, %28 : vector<16x8xf32>
    %30 = vector.extract_strided_slice %18 {offsets = [6, 0], sizes = [1, 8], strides = [1, 1]} : vector<9x8xf32> to vector<1x8xf32>
    %31 = vector.shape_cast %30 : vector<1x8xf32> to vector<8xf32>
    %32 = vector.shape_cast %31 : vector<8xf32> to vector<1x8xf32>
    %33 = vector.broadcast %32 : vector<1x8xf32> to vector<16x8xf32>
    %34 = arith.mulf %17, %33 : vector<16x8xf32>
    %35 = arith.addf %29, %34 : vector<16x8xf32>
    %36 = vector.extract_strided_slice %18 {offsets = [1, 0], sizes = [1, 8], strides = [1, 1]} : vector<9x8xf32> to vector<1x8xf32>
    %37 = vector.shape_cast %36 : vector<1x8xf32> to vector<8xf32>
    %38 = vector.shape_cast %37 : vector<8xf32> to vector<1x8xf32>
    %39 = vector.broadcast %38 : vector<1x8xf32> to vector<16x8xf32>
    %40 = arith.mulf %10, %39 : vector<16x8xf32>
    %41 = vector.extract_strided_slice %18 {offsets = [4, 0], sizes = [1, 8], strides = [1, 1]} : vector<9x8xf32> to vector<1x8xf32>
    %42 = vector.shape_cast %41 : vector<1x8xf32> to vector<8xf32>
    %43 = vector.shape_cast %42 : vector<8xf32> to vector<1x8xf32>
    %44 = vector.broadcast %43 : vector<1x8xf32> to vector<16x8xf32>
    %45 = arith.mulf %3, %44 : vector<16x8xf32>
    %46 = arith.addf %40, %45 : vector<16x8xf32>
    %47 = vector.extract_strided_slice %18 {offsets = [7, 0], sizes = [1, 8], strides = [1, 1]} : vector<9x8xf32> to vector<1x8xf32>
    %48 = vector.shape_cast %47 : vector<1x8xf32> to vector<8xf32>
    %49 = vector.shape_cast %48 : vector<8xf32> to vector<1x8xf32>
    %50 = vector.broadcast %49 : vector<1x8xf32> to vector<16x8xf32>
    %51 = arith.mulf %17, %50 : vector<16x8xf32>
    %52 = arith.addf %46, %51 : vector<16x8xf32>
    %53 = vector.extract_strided_slice %18 {offsets = [2, 0], sizes = [1, 8], strides = [1, 1]} : vector<9x8xf32> to vector<1x8xf32>
    %54 = vector.shape_cast %53 : vector<1x8xf32> to vector<8xf32>
    %55 = vector.shape_cast %54 : vector<8xf32> to vector<1x8xf32>
    %56 = vector.broadcast %55 : vector<1x8xf32> to vector<16x8xf32>
    %57 = arith.mulf %10, %56 : vector<16x8xf32>
    %58 = vector.extract_strided_slice %18 {offsets = [5, 0], sizes = [1, 8], strides = [1, 1]} : vector<9x8xf32> to vector<1x8xf32>
    %59 = vector.shape_cast %58 : vector<1x8xf32> to vector<8xf32>
    %60 = vector.shape_cast %59 : vector<8xf32> to vector<1x8xf32>
    %61 = vector.broadcast %60 : vector<1x8xf32> to vector<16x8xf32>
    %62 = arith.mulf %3, %61 : vector<16x8xf32>
    %63 = arith.addf %57, %62 : vector<16x8xf32>
    %64 = vector.extract_strided_slice %18 {offsets = [8, 0], sizes = [1, 8], strides = [1, 1]} : vector<9x8xf32> to vector<1x8xf32>
    %65 = vector.shape_cast %64 : vector<1x8xf32> to vector<8xf32>
    %66 = vector.shape_cast %65 : vector<8xf32> to vector<1x8xf32>
    %67 = vector.broadcast %66 : vector<1x8xf32> to vector<16x8xf32>
    %68 = arith.mulf %17, %67 : vector<16x8xf32>
    %69 = arith.addf %63, %68 : vector<16x8xf32>
    %70 = tpu.iota {dimensions = array<i32: 0>} : vector<8x16xi32>
    %71 = tpu.iota {dimensions = array<i32: 1>} : vector<8x16xi32>
    %c2_i32_13 = arith.constant 2 : i32
    %72 = vector.broadcast %c2_i32_13 : i32 to vector<8x16xi32>
    %73 = arith.muli %72, %70 : vector<8x16xi32>
    %c1_i32_14 = arith.constant 1 : i32
    %74 = vector.broadcast %c1_i32_14 : i32 to vector<8x16xi32>
    %75 = arith.subi %73, %74 : vector<8x16xi32>
    %76 = arith.cmpi eq, %71, %75 : vector<8x16xi32>
    %77 = arith.extui %76 : vector<8x16xi1> to vector<8x16xi32>
    %78 = arith.sitofp %77 : vector<8x16xi32> to vector<8x16xf32>
    %c2_i32_15 = arith.constant 2 : i32
    %79 = vector.broadcast %c2_i32_15 : i32 to vector<8x16xi32>
    %80 = arith.muli %79, %70 : vector<8x16xi32>
    %81 = arith.cmpi eq, %71, %80 : vector<8x16xi32>
    %82 = arith.extui %81 : vector<8x16xi1> to vector<8x16xi32>
    %83 = arith.sitofp %82 : vector<8x16xi32> to vector<8x16xf32>
    %c2_i32_16 = arith.constant 2 : i32
    %84 = vector.broadcast %c2_i32_16 : i32 to vector<8x16xi32>
    %85 = arith.muli %84, %70 : vector<8x16xi32>
    %c1_i32_17 = arith.constant 1 : i32
    %86 = vector.broadcast %c1_i32_17 : i32 to vector<8x16xi32>
    %87 = arith.addi %85, %86 : vector<8x16xi32>
    %88 = arith.cmpi eq, %71, %87 : vector<8x16xi32>
    %89 = arith.extui %88 : vector<8x16xi1> to vector<8x16xi32>
    %90 = arith.sitofp %89 : vector<8x16xi32> to vector<8x16xf32>
    %cst = arith.constant dense<0.000000e+00> : vector<8x8xf32>
    %91 = tpu.matmul %78, %35, %cst {dimension_numbers = #tpu.dot_dimension_numbers<[1], [0], [0], [1], [0, 0, 1, 1], [], []>} : vector<8x16xf32>, vector<16x8xf32>, vector<8x8xf32> -> vector<8x8xf32>
    %cst_18 = arith.constant dense<0.000000e+00> : vector<8x8xf32>
    %92 = tpu.matmul %83, %52, %cst_18 {dimension_numbers = #tpu.dot_dimension_numbers<[1], [0], [0], [1], [0, 0, 1, 1], [], []>} : vector<8x16xf32>, vector<16x8xf32>, vector<8x8xf32> -> vector<8x8xf32>
    %93 = arith.addf %91, %92 : vector<8x8xf32>
    %cst_19 = arith.constant dense<0.000000e+00> : vector<8x8xf32>
    %94 = tpu.matmul %90, %69, %cst_19 {dimension_numbers = #tpu.dot_dimension_numbers<[1], [0], [0], [1], [0, 0, 1, 1], [], []>} : vector<8x16xf32>, vector<16x8xf32>, vector<8x8xf32> -> vector<8x8xf32>
    %95 = arith.addf %93, %94 : vector<8x8xf32>
    %c0_20 = arith.constant 0 : index
    %c0_21 = arith.constant 0 : index
    %96 = vector.load %arg7[%c0_20, %c0_21] : memref<1x8xf32, #tpu.memory_space<vmem>>, vector<1x8xf32>
    %97 = vector.broadcast %96 : vector<1x8xf32> to vector<8x8xf32>
    %98 = arith.mulf %95, %97 : vector<8x8xf32>
    %c0_22 = arith.constant 0 : index
    %c0_23 = arith.constant 0 : index
    %99 = vector.load %arg8[%c0_22, %c0_23] : memref<1x8xf32, #tpu.memory_space<vmem>>, vector<1x8xf32>
    %100 = vector.broadcast %99 : vector<1x8xf32> to vector<8x8xf32>
    %101 = arith.addf %98, %100 : vector<8x8xf32>
    %102 = arith.truncf %101 : vector<8x8xf32> to vector<8x8xbf16>
    %c0_24 = arith.constant 0 : index
    %c0_25 = arith.constant 0 : index
    %103 = vector.load %arg9[%c0_24, %c0_25] : memref<8x8xf32, #tpu.memory_space<vmem>>, vector<8x8xf32>
    %104 = arith.truncf %103 : vector<8x8xf32> to vector<8x8xbf16>
    %cst_26 = arith.constant dense<0.000000e+00> : vector<8x8xf32>
    %105 = tpu.matmul %102, %104, %cst_26 {dimension_numbers = #tpu.dot_dimension_numbers<[1], [0], [0], [1], [0, 0, 1, 1], [], []>} : vector<8x8xbf16>, vector<8x8xbf16>, vector<8x8xf32> -> vector<8x8xf32>
    %c0_27 = arith.constant 0 : index
    %c0_28 = arith.constant 0 : index
    %106 = vector.load %arg10[%c0_27, %c0_28] : memref<1x8xf32, #tpu.memory_space<vmem>>, vector<1x8xf32>
    %107 = vector.broadcast %106 : vector<1x8xf32> to vector<8x8xf32>
    %108 = arith.mulf %105, %107 : vector<8x8xf32>
    %c0_29 = arith.constant 0 : index
    %c0_30 = arith.constant 0 : index
    %109 = vector.load %arg11[%c0_29, %c0_30] : memref<1x8xf32, #tpu.memory_space<vmem>>, vector<1x8xf32>
    %110 = vector.broadcast %109 : vector<1x8xf32> to vector<8x8xf32>
    %111 = arith.addf %108, %110 : vector<8x8xf32>
    %c0_31 = arith.constant 0 : index
    %c0_32 = arith.constant 0 : index
    %c0_33 = arith.constant 0 : index
    %c0_34 = arith.constant 0 : index
    %112 = vector.load %arg5[%c0_31, %c0_32, %c0_33, %c0_34] : memref<1x1x16x4xf32, #tpu.memory_space<vmem>>, vector<1x1x16x4xf32>
    %113 = vector.shape_cast %112 : vector<1x1x16x4xf32> to vector<16x4xf32>
    %cst_35 = arith.constant dense<0.000000e+00> : vector<8x4xf32>
    %114 = tpu.matmul %83, %113, %cst_35 {dimension_numbers = #tpu.dot_dimension_numbers<[1], [0], [0], [1], [0, 0, 1, 1], [], []>} : vector<8x16xf32>, vector<16x4xf32>, vector<8x4xf32> -> vector<8x4xf32>
    %115 = arith.truncf %114 : vector<8x4xf32> to vector<8x4xbf16>
    %c0_36 = arith.constant 0 : index
    %c0_37 = arith.constant 0 : index
    %116 = vector.load %arg12[%c0_36, %c0_37] : memref<4x8xf32, #tpu.memory_space<vmem>>, vector<4x8xf32>
    %117 = arith.truncf %116 : vector<4x8xf32> to vector<4x8xbf16>
    %cst_38 = arith.constant dense<0.000000e+00> : vector<8x8xf32>
    %118 = tpu.matmul %115, %117, %cst_38 {dimension_numbers = #tpu.dot_dimension_numbers<[1], [0], [0], [1], [0, 0, 1, 1], [], []>} : vector<8x4xbf16>, vector<4x8xbf16>, vector<8x8xf32> -> vector<8x8xf32>
    %c0_39 = arith.constant 0 : index
    %c0_40 = arith.constant 0 : index
    %119 = vector.load %arg13[%c0_39, %c0_40] : memref<1x8xf32, #tpu.memory_space<vmem>>, vector<1x8xf32>
    %120 = vector.broadcast %119 : vector<1x8xf32> to vector<8x8xf32>
    %121 = arith.addf %118, %120 : vector<8x8xf32>
    %122 = arith.addf %111, %121 : vector<8x8xf32>
    %c0_41 = arith.constant 0 : index
    %c0_42 = arith.constant 0 : index
    %c0_43 = arith.constant 0 : index
    %c0_44 = arith.constant 0 : index
    %123 = vector.load %arg14[%c0_41, %c0_42, %c0_43, %c0_44] : memref<1x1x8x8xf32, #tpu.memory_space<vmem>>, vector<1x1x8x8xf32>
    %124 = vector.shape_cast %123 : vector<1x1x8x8xf32> to vector<8x8xf32>
    %125 = vector.shape_cast %122 : vector<8x8xf32> to vector<1x1x8x8xf32>
    tpu.vector_store %arg14[%c0_41, %c0_42, %c0_43, %c0_44], %125 {strides = array<i32>} : memref<1x1x8x8xf32, #tpu.memory_space<vmem>>, vector<1x1x8x8xf32>,
    return
  }
  func.func @transform_0(%arg0: i32, %arg1: i32) -> (i32, i32, i32, i32) {
    %c2_i32 = arith.constant 2 : i32
    %0 = arith.muli %c2_i32, %arg1 : i32
    %c1_i32 = arith.constant 1 : i32
    %1 = arith.subi %0, %c1_i32 : i32
    %c0_i32 = arith.constant 0 : i32
    %2 = arith.maxsi %1, %c0_i32 : i32
    %c0_i32_0 = arith.constant 0 : i32
    %c0_i32_1 = arith.constant 0 : i32
    %c0_i32_2 = arith.constant 0 : i32
    return %arg0, %2, %c0_i32_0, %c0_i32_1 : i32, i32, i32, i32
  }
  func.func @transform_1(%arg0: i32, %arg1: i32) -> (i32, i32, i32, i32) {
    %c2_i32 = arith.constant 2 : i32
    %0 = arith.muli %c2_i32, %arg1 : i32
    %c0_i32 = arith.constant 0 : i32
    %c0_i32_0 = arith.constant 0 : i32
    %c0_i32_1 = arith.constant 0 : i32
    return %arg0, %0, %c0_i32, %c0_i32_0 : i32, i32, i32, i32
  }
  func.func @transform_2(%arg0: i32, %arg1: i32) -> (i32, i32, i32, i32) {
    %c2_i32 = arith.constant 2 : i32
    %0 = arith.muli %c2_i32, %arg1 : i32
    %c1_i32 = arith.constant 1 : i32
    %1 = arith.addi %0, %c1_i32 : i32
    %c15_i32 = arith.constant 15 : i32
    %2 = arith.minsi %1, %c15_i32 : i32
    %c0_i32 = arith.constant 0 : i32
    %c0_i32_0 = arith.constant 0 : i32
    %c0_i32_1 = arith.constant 0 : i32
    return %arg0, %2, %c0_i32, %c0_i32_0 : i32, i32, i32, i32
  }
  func.func @transform_3(%arg0: i32, %arg1: i32) -> (i32, i32, i32, i32) {
    %c2_i32 = arith.constant 2 : i32
    %0 = arith.muli %c2_i32, %arg1 : i32
    %c0_i32 = arith.constant 0 : i32
    %c0_i32_0 = arith.constant 0 : i32
    %c0_i32_1 = arith.constant 0 : i32
    return %arg0, %0, %c0_i32, %c0_i32_0 : i32, i32, i32, i32
  }
  func.func @transform_4(%arg0: i32, %arg1: i32) -> (i32, i32) {
    %c0_i32 = arith.constant 0 : i32
    %c0_i32_0 = arith.constant 0 : i32
    %c0_i32_1 = arith.constant 0 : i32
    return %c0_i32, %c0_i32_0 : i32, i32
  }
  func.func @transform_5(%arg0: i32, %arg1: i32) -> (i32, i32) {
    %c0_i32 = arith.constant 0 : i32
    %c0_i32_0 = arith.constant 0 : i32
    %c0_i32_1 = arith.constant 0 : i32
    return %c0_i32, %c0_i32_0 : i32, i32
  }
  func.func @transform_6(%arg0: i32, %arg1: i32) -> (i32, i32) {
    %c0_i32 = arith.constant 0 : i32
    %c0_i32_0 = arith.constant 0 : i32
    %c0_i32_1 = arith.constant 0 : i32
    return %c0_i32, %c0_i32_0 : i32, i32
  }
  func.func @transform_7(%arg0: i32, %arg1: i32) -> (i32, i32) {
    %c0_i32 = arith.constant 0 : i32
    %c0_i32_0 = arith.constant 0 : i32
    %c0_i32_1 = arith.constant 0 : i32
    return %c0_i32, %c0_i32_0 : i32, i32
  }
  func.func @transform_8(%arg0: i32, %arg1: i32) -> (i32, i32) {
    %c0_i32 = arith.constant 0 : i32
    %c0_i32_0 = arith.constant 0 : i32
    %c0_i32_1 = arith.constant 0 : i32
    return %c0_i32, %c0_i32_0 : i32, i32
  }
  func.func @transform_9(%arg0: i32, %arg1: i32) -> (i32, i32) {
    %c0_i32 = arith.constant 0 : i32
    %c0_i32_0 = arith.constant 0 : i32
    %c0_i32_1 = arith.constant 0 : i32
    return %c0_i32, %c0_i32_0 : i32, i32
  }
  func.func @transform_10(%arg0: i32, %arg1: i32) -> (i32, i32) {
    %c0_i32 = arith.constant 0 : i32
    %c0_i32_0 = arith.constant 0 : i32
    %c0_i32_1 = arith.constant 0 : i32
    return %c0_i32, %c0_i32_0 : i32, i32
  }
  func.func @transform_11(%arg0: i32, %arg1: i32) -> (i32, i32) {
    %c0_i32 = arith.constant 0 : i32
    %c0_i32_0 = arith.constant 0 : i32
    %c0_i32_1 = arith.constant 0 : i32
    return %c0_i32, %c0_i32_0 : i32, i32
  }
  func.func @transform_12(%arg0: i32, %arg1: i32) -> (i32, i32, i32, i32) {
    %c0_i32 = arith.constant 0 : i32
    %c0_i32_0 = arith.constant 0 : i32
    %c0_i32_1 = arith.constant 0 : i32
    return %arg0, %arg1, %c0_i32, %c0_i32_0 : i32, i32, i32, i32
  }
}

module attributes {stable_mosaic.version = 11 : i64} {
  func.func @_sepconv_s1_kernel(%arg0: i32, %arg1: memref<1x16x16x8xf32, #tpu.memory_space<vmem>>, %arg2: memref<9x8xf32, #tpu.memory_space<vmem>>, %arg3: memref<1x8xf32, #tpu.memory_space<vmem>>, %arg4: memref<1x8xf32, #tpu.memory_space<vmem>>, %arg5: memref<8x8xf32, #tpu.memory_space<vmem>>, %arg6: memref<1x8xf32, #tpu.memory_space<vmem>>, %arg7: memref<1x8xf32, #tpu.memory_space<vmem>>, %arg8: memref<1x16x16x8xf32, #tpu.memory_space<vmem>>, %arg9: memref<18x18x8xf32, #tpu.memory_space<vmem>>) attributes {dimension_semantics = [#tpu.dimension_semantics<parallel>], iteration_bounds = array<i64: 2>, scalar_prefetch = 0 : i64, scratch_operands = 1 : i64, tpu.core_type = #tpu.core_type<tc>, window_params = [{transform_indices = @transform_0, window_bounds = array<i64: 1, 16, 16, 8>}, {pipeline_mode = #tpu.pipeline_mode<synchronous>, transform_indices = @transform_1, window_bounds = array<i64: 9, 8>}, {pipeline_mode = #tpu.pipeline_mode<synchronous>, transform_indices = @transform_2, window_bounds = array<i64: 1, 8>}, {pipeline_mode = #tpu.pipeline_mode<synchronous>, transform_indices = @transform_3, window_bounds = array<i64: 1, 8>}, {pipeline_mode = #tpu.pipeline_mode<synchronous>, transform_indices = @transform_4, window_bounds = array<i64: 8, 8>}, {pipeline_mode = #tpu.pipeline_mode<synchronous>, transform_indices = @transform_5, window_bounds = array<i64: 1, 8>}, {pipeline_mode = #tpu.pipeline_mode<synchronous>, transform_indices = @transform_6, window_bounds = array<i64: 1, 8>}, {transform_indices = @transform_7, window_bounds = array<i64: 1, 16, 16, 8>}]} {
    %c0 = arith.constant 0 : index
    %c0_0 = arith.constant 0 : index
    %c0_1 = arith.constant 0 : index
    %c0_2 = arith.constant 0 : index
    %0 = vector.load %arg1[%c0, %c0_0, %c0_1, %c0_2] : memref<1x16x16x8xf32, #tpu.memory_space<vmem>>, vector<1x16x16x8xf32>
    %1 = vector.shape_cast %0 : vector<1x16x16x8xf32> to vector<16x16x8xf32>
    %cst = arith.constant 0.000000e+00 : f32
    %2 = vector.broadcast %cst : f32 to vector<18x18x8xf32>
    %c0_3 = arith.constant 0 : index
    %c0_4 = arith.constant 0 : index
    %c0_5 = arith.constant 0 : index
    %3 = vector.load %arg9[%c0_3, %c0_4, %c0_5] : memref<18x18x8xf32, #tpu.memory_space<vmem>>, vector<18x18x8xf32>
    tpu.vector_store %arg9[%c0_3, %c0_4, %c0_5], %2 {strides = array<i32>} : memref<18x18x8xf32, #tpu.memory_space<vmem>>, vector<18x18x8xf32>,
    %c1 = arith.constant 1 : index
    %c1_6 = arith.constant 1 : index
    %c0_7 = arith.constant 0 : index
    %4 = vector.load %arg9[%c1, %c1_6, %c0_7] : memref<18x18x8xf32, #tpu.memory_space<vmem>>, vector<16x16x8xf32>
    tpu.vector_store %arg9[%c1, %c1_6, %c0_7], %1 {strides = array<i32>} : memref<18x18x8xf32, #tpu.memory_space<vmem>>, vector<16x16x8xf32>,
    %c0_8 = arith.constant 0 : index
    %c0_9 = arith.constant 0 : index
    %c0_10 = arith.constant 0 : index
    %5 = vector.load %arg9[%c0_8, %c0_9, %c0_10] : memref<18x18x8xf32, #tpu.memory_space<vmem>>, vector<18x18x8xf32>
    %c0_11 = arith.constant 0 : index
    %c0_12 = arith.constant 0 : index
    %6 = vector.load %arg2[%c0_11, %c0_12] : memref<9x8xf32, #tpu.memory_space<vmem>>, vector<9x8xf32>
    %7 = vector.extract_strided_slice %5 {offsets = [0, 0, 0], sizes = [16, 16, 8], strides = [1, 1, 1]} : vector<18x18x8xf32> to vector<16x16x8xf32>
    %8 = vector.extract_strided_slice %6 {offsets = [0, 0], sizes = [1, 8], strides = [1, 1]} : vector<9x8xf32> to vector<1x8xf32>
    %9 = vector.shape_cast %8 : vector<1x8xf32> to vector<8xf32>
    %10 = vector.shape_cast %9 : vector<8xf32> to vector<1x1x8xf32>
    %11 = vector.broadcast %10 : vector<1x1x8xf32> to vector<16x16x8xf32>
    %12 = arith.mulf %7, %11 : vector<16x16x8xf32>
    %13 = vector.extract_strided_slice %5 {offsets = [0, 1, 0], sizes = [16, 16, 8], strides = [1, 1, 1]} : vector<18x18x8xf32> to vector<16x16x8xf32>
    %14 = vector.extract_strided_slice %6 {offsets = [1, 0], sizes = [1, 8], strides = [1, 1]} : vector<9x8xf32> to vector<1x8xf32>
    %15 = vector.shape_cast %14 : vector<1x8xf32> to vector<8xf32>
    %16 = vector.shape_cast %15 : vector<8xf32> to vector<1x1x8xf32>
    %17 = vector.broadcast %16 : vector<1x1x8xf32> to vector<16x16x8xf32>
    %18 = arith.mulf %13, %17 : vector<16x16x8xf32>
    %19 = arith.addf %12, %18 : vector<16x16x8xf32>
    %20 = vector.extract_strided_slice %5 {offsets = [0, 2, 0], sizes = [16, 16, 8], strides = [1, 1, 1]} : vector<18x18x8xf32> to vector<16x16x8xf32>
    %21 = vector.extract_strided_slice %6 {offsets = [2, 0], sizes = [1, 8], strides = [1, 1]} : vector<9x8xf32> to vector<1x8xf32>
    %22 = vector.shape_cast %21 : vector<1x8xf32> to vector<8xf32>
    %23 = vector.shape_cast %22 : vector<8xf32> to vector<1x1x8xf32>
    %24 = vector.broadcast %23 : vector<1x1x8xf32> to vector<16x16x8xf32>
    %25 = arith.mulf %20, %24 : vector<16x16x8xf32>
    %26 = arith.addf %19, %25 : vector<16x16x8xf32>
    %27 = vector.extract_strided_slice %5 {offsets = [1, 0, 0], sizes = [16, 16, 8], strides = [1, 1, 1]} : vector<18x18x8xf32> to vector<16x16x8xf32>
    %28 = vector.extract_strided_slice %6 {offsets = [3, 0], sizes = [1, 8], strides = [1, 1]} : vector<9x8xf32> to vector<1x8xf32>
    %29 = vector.shape_cast %28 : vector<1x8xf32> to vector<8xf32>
    %30 = vector.shape_cast %29 : vector<8xf32> to vector<1x1x8xf32>
    %31 = vector.broadcast %30 : vector<1x1x8xf32> to vector<16x16x8xf32>
    %32 = arith.mulf %27, %31 : vector<16x16x8xf32>
    %33 = arith.addf %26, %32 : vector<16x16x8xf32>
    %34 = vector.extract_strided_slice %5 {offsets = [1, 1, 0], sizes = [16, 16, 8], strides = [1, 1, 1]} : vector<18x18x8xf32> to vector<16x16x8xf32>
    %35 = vector.extract_strided_slice %6 {offsets = [4, 0], sizes = [1, 8], strides = [1, 1]} : vector<9x8xf32> to vector<1x8xf32>
    %36 = vector.shape_cast %35 : vector<1x8xf32> to vector<8xf32>
    %37 = vector.shape_cast %36 : vector<8xf32> to vector<1x1x8xf32>
    %38 = vector.broadcast %37 : vector<1x1x8xf32> to vector<16x16x8xf32>
    %39 = arith.mulf %34, %38 : vector<16x16x8xf32>
    %40 = arith.addf %33, %39 : vector<16x16x8xf32>
    %41 = vector.extract_strided_slice %5 {offsets = [1, 2, 0], sizes = [16, 16, 8], strides = [1, 1, 1]} : vector<18x18x8xf32> to vector<16x16x8xf32>
    %42 = vector.extract_strided_slice %6 {offsets = [5, 0], sizes = [1, 8], strides = [1, 1]} : vector<9x8xf32> to vector<1x8xf32>
    %43 = vector.shape_cast %42 : vector<1x8xf32> to vector<8xf32>
    %44 = vector.shape_cast %43 : vector<8xf32> to vector<1x1x8xf32>
    %45 = vector.broadcast %44 : vector<1x1x8xf32> to vector<16x16x8xf32>
    %46 = arith.mulf %41, %45 : vector<16x16x8xf32>
    %47 = arith.addf %40, %46 : vector<16x16x8xf32>
    %48 = vector.extract_strided_slice %5 {offsets = [2, 0, 0], sizes = [16, 16, 8], strides = [1, 1, 1]} : vector<18x18x8xf32> to vector<16x16x8xf32>
    %49 = vector.extract_strided_slice %6 {offsets = [6, 0], sizes = [1, 8], strides = [1, 1]} : vector<9x8xf32> to vector<1x8xf32>
    %50 = vector.shape_cast %49 : vector<1x8xf32> to vector<8xf32>
    %51 = vector.shape_cast %50 : vector<8xf32> to vector<1x1x8xf32>
    %52 = vector.broadcast %51 : vector<1x1x8xf32> to vector<16x16x8xf32>
    %53 = arith.mulf %48, %52 : vector<16x16x8xf32>
    %54 = arith.addf %47, %53 : vector<16x16x8xf32>
    %55 = vector.extract_strided_slice %5 {offsets = [2, 1, 0], sizes = [16, 16, 8], strides = [1, 1, 1]} : vector<18x18x8xf32> to vector<16x16x8xf32>
    %56 = vector.extract_strided_slice %6 {offsets = [7, 0], sizes = [1, 8], strides = [1, 1]} : vector<9x8xf32> to vector<1x8xf32>
    %57 = vector.shape_cast %56 : vector<1x8xf32> to vector<8xf32>
    %58 = vector.shape_cast %57 : vector<8xf32> to vector<1x1x8xf32>
    %59 = vector.broadcast %58 : vector<1x1x8xf32> to vector<16x16x8xf32>
    %60 = arith.mulf %55, %59 : vector<16x16x8xf32>
    %61 = arith.addf %54, %60 : vector<16x16x8xf32>
    %62 = vector.extract_strided_slice %5 {offsets = [2, 2, 0], sizes = [16, 16, 8], strides = [1, 1, 1]} : vector<18x18x8xf32> to vector<16x16x8xf32>
    %63 = vector.extract_strided_slice %6 {offsets = [8, 0], sizes = [1, 8], strides = [1, 1]} : vector<9x8xf32> to vector<1x8xf32>
    %64 = vector.shape_cast %63 : vector<1x8xf32> to vector<8xf32>
    %65 = vector.shape_cast %64 : vector<8xf32> to vector<1x1x8xf32>
    %66 = vector.broadcast %65 : vector<1x1x8xf32> to vector<16x16x8xf32>
    %67 = arith.mulf %62, %66 : vector<16x16x8xf32>
    %68 = arith.addf %61, %67 : vector<16x16x8xf32>
    %c0_13 = arith.constant 0 : index
    %c0_14 = arith.constant 0 : index
    %69 = vector.load %arg3[%c0_13, %c0_14] : memref<1x8xf32, #tpu.memory_space<vmem>>, vector<1x8xf32>
    %70 = vector.shape_cast %69 : vector<1x8xf32> to vector<1x1x8xf32>
    %71 = vector.broadcast %70 : vector<1x1x8xf32> to vector<16x16x8xf32>
    %72 = arith.mulf %68, %71 : vector<16x16x8xf32>
    %c0_15 = arith.constant 0 : index
    %c0_16 = arith.constant 0 : index
    %73 = vector.load %arg4[%c0_15, %c0_16] : memref<1x8xf32, #tpu.memory_space<vmem>>, vector<1x8xf32>
    %74 = vector.shape_cast %73 : vector<1x8xf32> to vector<1x1x8xf32>
    %75 = vector.broadcast %74 : vector<1x1x8xf32> to vector<16x16x8xf32>
    %76 = arith.addf %72, %75 : vector<16x16x8xf32>
    %77 = vector.shape_cast %76 : vector<16x16x8xf32> to vector<256x8xf32>
    %78 = arith.truncf %77 : vector<256x8xf32> to vector<256x8xbf16>
    %c0_17 = arith.constant 0 : index
    %c0_18 = arith.constant 0 : index
    %79 = vector.load %arg5[%c0_17, %c0_18] : memref<8x8xf32, #tpu.memory_space<vmem>>, vector<8x8xf32>
    %80 = arith.truncf %79 : vector<8x8xf32> to vector<8x8xbf16>
    %cst_19 = arith.constant dense<0.000000e+00> : vector<256x8xf32>
    %81 = tpu.matmul %78, %80, %cst_19 {dimension_numbers = #tpu.dot_dimension_numbers<[1], [0], [0], [1], [0, 0, 1, 1], [], []>} : vector<256x8xbf16>, vector<8x8xbf16>, vector<256x8xf32> -> vector<256x8xf32>
    %c0_20 = arith.constant 0 : index
    %c0_21 = arith.constant 0 : index
    %82 = vector.load %arg6[%c0_20, %c0_21] : memref<1x8xf32, #tpu.memory_space<vmem>>, vector<1x8xf32>
    %83 = vector.broadcast %82 : vector<1x8xf32> to vector<256x8xf32>
    %84 = arith.mulf %81, %83 : vector<256x8xf32>
    %c0_22 = arith.constant 0 : index
    %c0_23 = arith.constant 0 : index
    %85 = vector.load %arg7[%c0_22, %c0_23] : memref<1x8xf32, #tpu.memory_space<vmem>>, vector<1x8xf32>
    %86 = vector.broadcast %85 : vector<1x8xf32> to vector<256x8xf32>
    %87 = arith.addf %84, %86 : vector<256x8xf32>
    %88 = vector.shape_cast %87 : vector<256x8xf32> to vector<16x16x8xf32>
    %c0_24 = arith.constant 0 : index
    %c0_25 = arith.constant 0 : index
    %c0_26 = arith.constant 0 : index
    %c0_27 = arith.constant 0 : index
    %89 = vector.load %arg8[%c0_24, %c0_25, %c0_26, %c0_27] : memref<1x16x16x8xf32, #tpu.memory_space<vmem>>, vector<1x16x16x8xf32>
    %90 = vector.shape_cast %89 : vector<1x16x16x8xf32> to vector<16x16x8xf32>
    %91 = vector.shape_cast %88 : vector<16x16x8xf32> to vector<1x16x16x8xf32>
    tpu.vector_store %arg8[%c0_24, %c0_25, %c0_26, %c0_27], %91 {strides = array<i32>} : memref<1x16x16x8xf32, #tpu.memory_space<vmem>>, vector<1x16x16x8xf32>,
    return
  }
  func.func @transform_0(%arg0: i32) -> (i32, i32, i32, i32) {
    %c0_i32 = arith.constant 0 : i32
    %c0_i32_0 = arith.constant 0 : i32
    %c0_i32_1 = arith.constant 0 : i32
    %c0_i32_2 = arith.constant 0 : i32
    return %arg0, %c0_i32, %c0_i32_0, %c0_i32_1 : i32, i32, i32, i32
  }
  func.func @transform_1(%arg0: i32) -> (i32, i32) {
    %c0_i32 = arith.constant 0 : i32
    %c0_i32_0 = arith.constant 0 : i32
    %c0_i32_1 = arith.constant 0 : i32
    return %c0_i32, %c0_i32_0 : i32, i32
  }
  func.func @transform_2(%arg0: i32) -> (i32, i32) {
    %c0_i32 = arith.constant 0 : i32
    %c0_i32_0 = arith.constant 0 : i32
    %c0_i32_1 = arith.constant 0 : i32
    return %c0_i32, %c0_i32_0 : i32, i32
  }
  func.func @transform_3(%arg0: i32) -> (i32, i32) {
    %c0_i32 = arith.constant 0 : i32
    %c0_i32_0 = arith.constant 0 : i32
    %c0_i32_1 = arith.constant 0 : i32
    return %c0_i32, %c0_i32_0 : i32, i32
  }
  func.func @transform_4(%arg0: i32) -> (i32, i32) {
    %c0_i32 = arith.constant 0 : i32
    %c0_i32_0 = arith.constant 0 : i32
    %c0_i32_1 = arith.constant 0 : i32
    return %c0_i32, %c0_i32_0 : i32, i32
  }
  func.func @transform_5(%arg0: i32) -> (i32, i32) {
    %c0_i32 = arith.constant 0 : i32
    %c0_i32_0 = arith.constant 0 : i32
    %c0_i32_1 = arith.constant 0 : i32
    return %c0_i32, %c0_i32_0 : i32, i32
  }
  func.func @transform_6(%arg0: i32) -> (i32, i32) {
    %c0_i32 = arith.constant 0 : i32
    %c0_i32_0 = arith.constant 0 : i32
    %c0_i32_1 = arith.constant 0 : i32
    return %c0_i32, %c0_i32_0 : i32, i32
  }
  func.func @transform_7(%arg0: i32) -> (i32, i32, i32, i32) {
    %c0_i32 = arith.constant 0 : i32
    %c0_i32_0 = arith.constant 0 : i32
    %c0_i32_1 = arith.constant 0 : i32
    %c0_i32_2 = arith.constant 0 : i32
    return %arg0, %c0_i32, %c0_i32_0, %c0_i32_1 : i32, i32, i32, i32
  }
}

</mosaic_0001>

<bundles_post_ra>
// kernel: xception_block.7
= control target key start
LH: loop header
LB: loop body
LE: loop exit
PB: predicated region body
PF: predicated region fallthrough
CT: control target
= control target key end

     0   :  { %s1227_s21 = smov 0   ;;  %s1229_s22 = smov 0   ;;  %s1344_s0 = inlined_call_operand.vmem [shape: f32[2,16,16,8], index: 0, kind: input, shape index: {}, may-alias: {0,1,2}]   ;;  %s1345_s1 = inlined_call_operand.vmem [shape: f32[2,16,16,8], index: 1, kind: input, shape index: {}, may-alias: {0,1,2}]   ;;  %s1346_s2 = inlined_call_operand.vmem [shape: f32[2,16,16,8], index: 2, kind: input, shape index: {}, may-alias: {0,1,2}]   ;;  %s1347_s3 = inlined_call_operand.vmem [shape: f32[2,16,16,4], index: 3, kind: input, shape index: {}]   ;;  %s1348_s4 = inlined_call_operand.vmem [shape: f32[9,8], index: 4, kind: input, shape index: {}]   ;;  %s1349_s5 = inlined_call_operand.vmem [shape: f32[1,8], index: 5, kind: input, shape index: {}]   ;;  %s1350_s6 = inlined_call_operand.vmem [shape: f32[1,8], index: 6, kind: input, shape index: {}]   ;;  %s1351_s7 = inlined_call_operand.vmem [shape: f32[8,8], index: 7, kind: input, shape index: {}]   ;;  %s1352_s8 = inlined_call_operand.vmem [shape: f32[1,8], index: 8, kind: input, shape index: {}]   ;;  %s1353_s9 = inlined_call_operand.vmem [shape: f32[1,8], index: 9, kind: input, shape index: {}]   ;;  %s1354_s10 = inlined_call_operand.vmem [shape: f32[4,8], index: 10, kind: input, shape index: {}]   ;;  %s1355_s11 = inlined_call_operand.vmem [shape: f32[1,8], index: 11, kind: input, shape index: {}]   ;;  %s1356_s12 = inlined_call_operand.vmem [shape: f32[2,8,8,8], index: 12, kind: output, shape index: {}]  }
   0x1   :  { %s1231_s23 = smov 0   ;;  %s1233_s24 = smov 0  }
   0x2   :  { %s1235_s25 = smov 0  }
   0x3 LB: > { %1360 = sst [smem:[#allocation2_spill]] %s1151_s23  ;;  %s31_s26 = sadd.s32 1, %s1151_s23  ;;  %s1159_s25 = sphi %s1235_s25, %s22_s25   ;;  %s1155_s24 = sphi %s1233_s24, %s1369_s24   ;;  %s1151_s23 = sphi %s1231_s23, %s1368_s23   ;;  %s1147_s22 = sphi %s1229_s22, %s1367_s22   ;;  %s1143_s21 = sphi %s1227_s21, %s1366_s21  }
   0x4   : > { %1361 = sst [smem:[#allocation3_spill]] %s1155_s24  ;;  %s34_s27 = sadd.s32 1, %s1155_s24 }
   0x5   : > { %1362 = sst [smem:[#allocation4_spill]] %s1159_s25  ;;  %p32_p0 = scmp.ge.s32.totalorder %s31_s26, 8 }
   0x6   : > { %p1031_p1 = scmp.ge.s32.totalorder %s1159_s25, 1  ;;  %p470_p2 = scmp.lt.s32.totalorder %s1159_s25, 17 }
   0x7   : > { %s1371_s26 = smov (%p32_p0, %s31_s26), 0  ;;  %s1373_s27 = smov (!%p32_p0, %s34_s27), %s1155_s24 }
   0x8   : > { %1363 = sst [smem:[#allocation5_spill]] %s1371_s26  ;;  %p471_p3 = pnand %p1031_p1, %p470_p2 }
   0x9   : > { %p36_p4 = scmp.ge.s32.totalorder %s1373_s27, 2  ;;  %s1032_s28 = sshll.u32 (!%p471_p3), %s1143_s21, 1 }
   0xa   : > { %474 = sbr.rel (%p471_p3) target bundleno = 332 (0x14c), region = 68  ;;  %p560_p5 = scmp.lt.s32.totalorder (!%p471_p3), %s1147_s22, 1 }
   0xb   : > { %s1375_s27 = smov (%p36_p4, %s1373_s27), 0  ;;  %s1033_s29 = sadd.s32 (!%p471_p3), 4294967295, %s1032_s28 }
   0xc   : > { %1364 = sst [smem:[#allocation6_spill]] %s1375_s27  ;;  %p576_p6 = scmp.lt.s32.totalorder (!%p471_p3), %s1032_s28, 15 }
   0xd   : > { %p558_p7 = scmp.gt.s32.totalorder (!%p471_p3), %s1033_s29, 0  ;;  %p1034_p8 = scmp.lt.s32.totalorder (!%p471_p3), %s1033_s29, 15 }
   0xe   : > { %s1263_s13 = sadd.s32 (!%p471_p3), 1, %s1032_s28  ;;  %p627_p10 = scmp.gt.s32.totalorder (!%p471_p3), %s1143_s21, 0 }
   0xf   : > { %s1377_s22 = smov (!%p560_p5, %s1147_s22), 1  ;;  %s1379_s29 = smov (!%p558_p7, %s1033_s29), 0  ;;  %v682_v0 = vlaneseq  ;;  %v641_v1 = vld [vmem:[%s1348_s4] sm:$0xff]  ;;  %v1115_v32 = vld [vmem:[%s1348_s4 + $0x8] ss:$0 sm:$0xff]  ;;  %v1161_v55 = vmov 0.0  }
  0x10   : > { %s1040_s30 = sshll.u32 %s1377_s22, 5  ;;  %s1381_s29 = smov (!%p1034_p8, %s1379_s29), 15  ;;  %v643_v5 = vperm.slane %v641_v1, 0  ;;  %v646_v6 = vperm.slane %v641_v1, 3  ;;  %v656_v9 = vperm.slane %v641_v1, 1  ;;  %v659_v10 = vperm.slane %v641_v1, 4 }
  0x11   : > { %s1383_s28 = smov (!%p576_p6, %s1032_s28), 15  ;;  %s1039_s14 = sshll.u32 %s1381_s29, 1  ;;  %v683_v4 = vshrl.u32 %v682_v0, 7  ;;  %v669_v14 = vperm.slane %v641_v1, 2  ;;  %v672_v15 = vperm.slane %v641_v1, 5  ;;  %v651_v29 = vperm.slane %v641_v1, 6 }
  0x12   : > { %p586_p9 = scmp.lt.s32.totalorder %s1263_s13, 15  ;;  %s566_s15 = sadd.s32 %s1040_s30, %s1039_s14  ;;  %v685_v30 = vand.u32 127, %v682_v0  ;;  %v664_v33 = vperm.slane %v641_v1, 7  ;;  %vm698_vm2 = vcmask 130048   ;;  %v836_v0 = vld [vmem:[%s1354_s10] sm:$0xf] }
  0x13   : > { %s1043_s16 = sshll.u32 %s1383_s28, 1  ;;  %s1041_s17 = sshll.u32 %s566_s15, 3  ;;  %v686_v16 = vmul.u32 2, %v683_v4  ;;  %v837_v1 = vpack.c.bf16 %v836_v0, %v836_v0  ;;  %vm846_vm4 = vcmask 1041408   ;;  %vm786_vm5 = vcmask 1043456  }
  0x14   : > { %s1266_s18 = sadd.s32 %s1043_s16, %s1040_s30  ;;  %s568_s27 = scalar_lea.vmem %s1344_s0, %s1041_s17  ;;  %vm842_vm6 = vcmask 31744   ;;  %vm782_vm7 = vcmask 64512  }
  0x15   : > { %s1045_s26 = sshll.u32 %s1266_s18, 3  ;;  %v622_v2 = vld [vmem:[%s568_s27 + $0x8] sm:$0xff]  ;;  %v621_v3 = vld [vmem:[%s568_s27] sm:$0xff]  ;;  %p635_p11 = scmp.le.s32.totalorder %s1263_s13, 15  ;;  %v1060_v31 = vadd.s32 4294967295, %v686_v16  ;;  %vm691_vm1 = vcmp.eq.s32.totalorder %v685_v30, %v686_v16  ;;  %v694_v59 = vadd.s32 1, %v686_v16 }
  0x16   : > { %s582_s25 = scalar_lea.vmem %s1345_s1, %s1045_s26  ;;  %s610_s15 = scalar_lea.vmem %s1347_s3, %s1045_s26  ;;  %v1062_v58 = vsel %vm691_vm1, 1.0, %v1161_v55 }
  0x17   : > { %s587_s29 = scalar_select %p586_p9, %s1263_s13, 15  ;;  %v624_v7 = vld [vmem:[%s582_s25 + $0x8] sm:$0xff]  ;;  %v623_v12 = vld [vmem:[%s582_s25] sm:$0xff]  ;;  %vm688_vm0 = vcmp.eq.s32.totalorder %v685_v30, %v1060_v31  ;;  %vm695_vm3 = vcmp.eq.s32.totalorder %v685_v30, %v694_v59 }
  0x18   : > { %s628_s28 = scalar_select %p627_p10, 1, 0  ;;  %v648_v18 = vmul.f32 %v646_v6, %v624_v7  ;;  %v647_v20 = vmul.f32 %v646_v6, %v623_v12  ;;  %v661_v22 = vmul.f32 %v659_v10, %v624_v7  ;;  %v674_v26 = vmul.f32 %v672_v15, %v624_v7  ;;  %v814_v60 = vld [vmem:[%s610_s15 + $0x8] sm:$0xff]  ;;  %v813_v62 = vld [vmem:[%s610_s15] sm:$0xff] }
  0x19   : > { %s1385_s29 = smov (!%p586_p9, %s587_s29), 15  ;;  %v660_v28 = vmul.f32 %v659_v10, %v623_v12  ;;  %v673_v37 = vmul.f32 %v672_v15, %v623_v12  ;;  %v1061_v56 = vsel %vm688_vm0, 1.0, %v1161_v55  ;;  %v1063_v63 = vsel %vm695_vm3, 1.0, %v1161_v55  ;;  %p614_p12 = scmp.lt.s32.totalorder %s1143_s21, 7 }
  0x1a   : > { %s629_s16 = scvt.s32.f32 %s628_s28  ;;  %s1050_s17 = sshll.u32 %s1385_s29, 1 }
  0x1b   : > { %s594_s23 = sadd.s32 %s1050_s17, %s1040_s30  ;;  %s1387_s21 = smov (!%p614_p12, %s1143_s21), 7 }
  0x1c   : > { %v630_v8 = vstv %s629_s16  ;;  %s1052_s24 = sshll.u32 %s594_s23, 3 }
  0x1d   : > { %v632_v11 = vmul.f32 %v630_v8, %v622_v2  ;;  %v631_v13 = vmul.f32 %v630_v8, %v621_v3  ;;  %s596_s27 = scalar_lea.vmem %s1346_s2, %s1052_s24  ;;  %v780_v2 = vld [vmem:[%s1351_s7] sm:$0xff]  ;;  %v848_v3 = vsel %vm846_vm4, %v837_v1, 0 }
  0x1e   : > { %s636_s29 = scalar_select %p635_p11, 1, 0  ;;  %v626_v23 = vld [vmem:[%s596_s27 + $0x8] sm:$0xff]  ;;  %v625_v24 = vld [vmem:[%s596_s27] sm:$0xff]  ;;  %v781_v4 = vpack.c.bf16 %v780_v2, %v780_v2  ;;  %857 = vmatpush.bf16.msra.mxu1 %v848_v3 }
  0x1f   : > { %v645_v17 = vmul.f32 %v643_v5, %v632_v11  ;;  %v644_v19 = vmul.f32 %v643_v5, %v631_v13  ;;  %v658_v21 = vmul.f32 %v656_v9, %v632_v11  ;;  %v671_v25 = vmul.f32 %v669_v14, %v632_v11  ;;  %v1116_v11 = vld [vmem:[%s1349_s5] ss:$0 sm:$0xff]  ;;  %s1057_s27 = sshll.u32 %s1377_s22, 3 }
  0x20   : > { %s637_s30 = scvt.s32.f32 %s636_s29  ;;  %v657_v27 = vmul.f32 %v656_v9, %v631_v13  ;;  %v670_v36 = vmul.f32 %v669_v14, %v631_v13  ;;  %v788_v5 = vsel %vm786_vm5, %v781_v4, 0  ;;  %v1117_v14 = vld [vmem:[%s1350_s6] ss:$0 sm:$0xff]  ;;  %s617_s25 = sadd.s32 %s1057_s27, %s1387_s21 }
  0x21   : > { %v650_v35 = vadd.f32 %v648_v18, %v645_v17  ;;  %v649_v40 = vadd.f32 %v647_v20, %v644_v19  ;;  %v663_v41 = vadd.f32 %v661_v22, %v658_v21  ;;  %v676_v42 = vadd.f32 %v674_v26, %v671_v25  ;;  %797 = vmatpush.bf16.msra.mxu3 %v788_v5  ;;  %v1119_v20 = vld [vmem:[%s1352_s8] ss:$0 sm:$0xff]  ;;  %s1058_s26 = sshll.u32 %s617_s25, 3 }
  0x22   : > { %v638_v34 = vstv %s637_s30  ;;  %v662_v43 = vadd.f32 %v660_v28, %v657_v27  ;;  %v675_v48 = vadd.f32 %v673_v37, %v670_v36  ;;  %v1118_v21 = vld [vmem:[%s1355_s11] ss:$0 sm:$0xff]  ;;  %s619_s16 = scalar_lea.vmem %s1356_s12, %s1058_s26 }
  0x23   : > { %v640_v38 = vmul.f32 %v638_v34, %v626_v23  ;;  %v639_v39 = vmul.f32 %v638_v34, %v625_v24  ;;  %v1120_v22 = vld [vmem:[%s1353_s9] ss:$0 sm:$0xff] }
  0x25   : > { %v653_v44 = vmul.f32 %v651_v29, %v640_v38  ;;  %v652_v45 = vmul.f32 %v651_v29, %v639_v39  ;;  %v679_v46 = vmul.f32 %v1115_v32, %v640_v38  ;;  %v666_v47 = vmul.f32 %v664_v33, %v640_v38 }
  0x26   : > { %v665_v49 = vmul.f32 %v664_v33, %v639_v39  ;;  %v678_v53 = vmul.f32 %v1115_v32, %v639_v39 }
  0x27   : > { %v655_v50 = vadd.f32 %v653_v44, %v650_v35  ;;  %v654_v51 = vadd.f32 %v652_v45, %v649_v40  ;;  %v668_v52 = vadd.f32 %v666_v47, %v663_v41  ;;  %v681_v57 = vadd.f32 %v679_v46, %v676_v42 }
  0x28   : > { %v667_v54 = vadd.f32 %v665_v49, %v662_v43  ;;  %v680_v61 = vadd.f32 %v678_v53, %v675_v48 }
  0x29   : > { %739 = vmatpush.msra.mxu2 %v655_v50  ;;  %716 = vmatpush.msra.mxu0 %v668_v52 }
  0x2b   : > { %740 = vmatpush.msra.mxu2 %v654_v51  ;;  %717 = vmatpush.msra.mxu0 %v667_v54 }
  0x2c   : > { %1065 = vmatmul.msk.f32.vlgmr.msra.gmra.mxu2 %vm698_vm2, %v1061_v56  ;;  %1064 = vmatmul.msk.f32.vlgmr.msra.gmra.mxu0 %vm698_vm2, %v1062_v58 }
  0x2d   : > { %762 = vmatpush.msrb.mxu2 %v681_v57  ;;  %829 = vmatpush.msrb.mxu0 %v814_v60 }
  0x2f   : > { %763 = vmatpush.msrb.mxu2 %v680_v61  ;;  %830 = vmatpush.msrb.mxu0 %v813_v62 }
  0x34   : > { %1066 = vmatmul.msk.f32.vlgmr.msrb.gmra.mxu2 %vm698_vm2, %v1063_v63  ;;  %1068 = vmatmul.msk.f32.vlgmr.msrb.gmra.mxu0 %vm698_vm2, %v1062_v58 }
  0xa9   : > { %v719_v6 = vpop.f32.mrf.mxu0 }
  0xaf   : > { %v742_v7 = vpop.f32.mrf.mxu2 }
  0xb0   : > { %v743_v10 = vadd.f32 %v742_v7, %v719_v6 }
  0xb1   : > { %v832_v8 = vpop.f32.mrf.mxu0 }
  0xb2   : > { %v835_v9 = vpack.c.bf16 %v832_v8, %v832_v8 }
  0xb4   : > { %1069 = vmatmul.msk.bf16.vlgmr.msra.gmra.mxu1 %vm842_vm6, %v835_v9 }
  0xb7   : > { %v765_v12 = vpop.f32.mrf.mxu2 }
  0xb8   : > { %v768_v13 = vadd.f32 %v765_v12, %v743_v10 }
  0xba   : > { %v773_v15 = vmul.f32 %v1116_v11, %v768_v13 }
  0xbc   : > { %v778_v16 = vadd.f32 %v1117_v14, %v773_v15 }
  0xbe   : > { %v779_v17 = vpack.c.bf16 %v778_v16, %v778_v16 }
  0xc0   : > { %1067 = vmatmul.msk.bf16.vlgmr.msra.gmra.mxu3 %vm782_vm7, %v779_v17 }
 0x131   : > { %v859_v18 = vpop.f32.mrf.mxu1 }
 0x132   : > { %v860_v25 = vadd.f32 %v1118_v21, %v859_v18 }
 0x139   : > { %v861_v19 = vpop.f32.mrf.mxu1 }
 0x143   : > { %v799_v23 = vpop.f32.mrf.mxu3 }
 0x144   : > { %v807_v24 = vmul.f32 %v1119_v20, %v799_v23 }
 0x146   : > { %v812_v26 = vadd.f32 %v1120_v22, %v807_v24 }
 0x148   : > { %v863_v27 = vadd.f32 %v860_v25, %v812_v26 }
 0x14a   : > { %864 = vst.msk [vmem:[%s619_s16] sm:$0xff] %vm782_vm7, %v863_v27 }
 0x14b   : > { %v801_v28 = vpop.f32.mrf.mxu3 }
 0x14c PF: > { %s1365_s21 = sld [smem:[#allocation4_spill]] }
 0x14d   : > { %s1367_s22 = sld [smem:[#allocation3_spill]] }
 0x14e   : > { %s1368_s23 = sld [smem:[#allocation5_spill]] }
 0x14f   : > { %s1369_s24 = sld [smem:[#allocation6_spill]] }
 0x152   : > { %s22_s25 = sadd.s32 1, %s1365_s21   ;;  %s1366_s21 = sld [smem:[#allocation2_spill]] }
 0x153   : > { %p19_p13 = scmp.ge.s32.totalorder %s22_s25, 18  }
 0x155   :  { %21 = sbr.rel (!%p19_p13) target bundleno = 3 (0x3), region = 107 }

// kernel: xception_block.4
= control target key start
LH: loop header
LB: loop body
LE: loop exit
PB: predicated region body
PF: predicated region fallthrough
CT: control target
= control target key end

     0   :  { %s2634_s24 = smov 0   ;;  %s4087_s0 = inlined_call_operand.vmem [shape: f32[2,16,16,4], index: 0, kind: input, shape index: {}]   ;;  %s4088_s1 = inlined_call_operand.vmem [shape: f32[9,4], index: 1, kind: input, shape index: {}]   ;;  %s4089_s2 = inlined_call_operand.vmem [shape: f32[1,4], index: 2, kind: input, shape index: {}]   ;;  %s4090_s3 = inlined_call_operand.vmem [shape: f32[1,4], index: 3, kind: input, shape index: {}]   ;;  %s4091_s4 = inlined_call_operand.vmem [shape: f32[4,8], index: 4, kind: input, shape index: {}]   ;;  %s4092_s5 = inlined_call_operand.vmem [shape: f32[1,8], index: 5, kind: input, shape index: {}]   ;;  %s4093_s6 = inlined_call_operand.vmem [shape: f32[1,8], index: 6, kind: input, shape index: {}]   ;;  %s4094_s7 = inlined_call_operand.vmem [shape: f32[2,16,16,8], index: 7, kind: output, shape index: {}]  }
   0x1 LB: > { %s2491_s25 = sadd.s32 4294967295, %s2591_s24   ;;  %p2495_p0 = scmp.ge.s32.totalorder %s2591_s24, 1  ;;  %s2591_s24 = sphi %s2634_s24, %s17_s24  }
   0x2   : > { %p237_p1 = scmp.lt.s32.totalorder %s2591_s24, 3 }
   0x4   : > { %p238_p2 = pnand %p2495_p0, %p237_p1 }
   0x5   : > { %p269_p3 = scmp.lt.s32.totalorder (!%p238_p2), %s2491_s25, 1 }
   0x6   : > { %241 = sbr.rel (%p238_p2) target bundleno = 515 (0x203), region = 48 }
   0xb   : > { %v2188_v0 = vld [vmem:[%s4091_s4] sm:$0xf]  ;;  %vm2238_vm0 = vcmask 1041408   ;;  %vm344_vm1 = vcmask 31744   ;;  %v2593_v2 = vmov 0.0   ;;  %vm347_vm2 = vcmask 25600  }
   0xc   : > { %v2189_v1 = vpack.c.bf16 %v2188_v0, %v2188_v0  ;;  %345 = vst.msk [vmem:[#allocation2] sm:$0xff] %vm344_vm1, %v2593_v2  ;;  %s4096_s25 = smov (!%p269_p3, %s2491_s25), 1  ;;  %v2654_v3 = vld [vmem:[%s4088_s1] sm:$0xff]  ;;  %vm619_vm3 = vcmask 1046528   ;;  %vm861_vm4 = vcmask 1045504   ;;  %vm2403_vm5 = vcmask 64512  }
   0xd   : > { %346 = vst.msk [vmem:[#allocation2 + $0x8] sm:$0xff] %vm344_vm1, %v2593_v2  ;;  %s2518_s30 = sshll.u32 %s4096_s25, 8  ;;  %v2671_v5 = vperm.slane %v2654_v3, 1  ;;  %v2674_v6 = vperm.slane %v2654_v3, 2  ;;  %v2682_v10 = vperm.slane %v2654_v3, 0  ;;  %v2704_v33 = vperm.slane %v2654_v3, 3 }
   0xe   : > { %v2240_v4 = vsel %vm2238_vm0, %v2189_v1, 0  ;;  %348 = vst.msk [vmem:[#allocation2 + $0x10] sm:$0x3] %vm347_vm2, %v2593_v2  ;;  %s2666_s10 = scalar_lea.vmem %s4087_s0, %s2518_s30  ;;  %v2709_v36 = vperm.slane %v2654_v3, 4  ;;  %v2712_v37 = vperm.slane %v2654_v3, 5  ;;  %v2725_v44 = vperm.slane %v2654_v3, 6  ;;  %s3941_s15 = scalar_lea.vmem %s4094_s7, %s2518_s30 }
   0xf   : > { %2249 = vmatpush.bf16.msra.mxu0 %v2240_v4  ;;  %2520 = vmatpush.bf16.msra.mxu1 %v2240_v4  ;;  %349 = vst.msk [vmem:[#allocation2 + $0x18] sm:$0xff] %vm344_vm1, %v2593_v2  ;;  %v280_v7 = vld [vmem:[%s2666_s10] sm:$0xff]  ;;  %v281_v8 = vld [vmem:[%s2666_s10 + $0x8] sm:$0xff]  ;;  %v282_v9 = vld [vmem:[%s2666_s10 + $0x10] sm:$0xff]  ;;  %v2728_v45 = vperm.slane %v2654_v3, 7 }
  0x10   : > { %2521 = vmatpush.bf16.msra.mxu2 %v2240_v4  ;;  %2522 = vmatpush.bf16.msra.mxu3 %v2240_v4  ;;  %350 = vst.msk [vmem:[#allocation2 + $0x20] sm:$0xff] %vm344_vm1, %v2593_v2  ;;  %v283_v11 = vld [vmem:[%s2666_s10 + $0x18] sm:$0xff]  ;;  %v312_v12 = vmax.f32 %v280_v7, 0.0  ;;  %v313_v13 = vmax.f32 %v281_v8, 0.0  ;;  %v314_v14 = vmax.f32 %v282_v9, 0.0 }
  0x11   : > { %351 = vst.msk [vmem:[#allocation2 + $0x28] sm:$0x3] %vm347_vm2, %v2593_v2  ;;  %v315_v16 = vmax.f32 %v283_v11, 0.0  ;;  %v2763_v62 = vld [vmem:[%s4088_s1 + $0x8] ss:$0 sm:$0xff] }
  0x12   : > { %352 = vst.msk [vmem:[#allocation2 + $0x30] sm:$0xff] %vm344_vm1, %v2593_v2 }
  0x13   : > { %353 = vst.msk [vmem:[#allocation2 + $0x38] sm:$0xff] %vm344_vm1, %v2593_v2  ;;  %v433_v15 = vld [vmem:[#allocation2] sm:$0xff] }
  0x14   : > { %354 = vst.msk [vmem:[#allocation2 + $0x40] sm:$0x3] %vm347_vm2, %v2593_v2  ;;  %v434_v17 = vld [vmem:[#allocation2 + $0x8] sm:$0xff]  ;;  %v523_v18 = vmul.f32 %v2671_v5, %v433_v15  ;;  %v765_v19 = vmul.f32 %v2674_v6, %v433_v15  ;;  %v490_v21 = vmul.f32 %v2682_v10, %v433_v15 }
  0x15   : > { %401 = vst.msk [vmem:[#allocation2 + $0x19] sm:$0xff] %vm344_vm1, %v312_v12  ;;  %v435_v20 = vld [vmem:[#allocation2 + $0x10] sm:$0x3]  ;;  %v524_v22 = vmul.f32 %v2671_v5, %v434_v17  ;;  %v766_v23 = vmul.f32 %v2674_v6, %v434_v17  ;;  %v491_v28 = vmul.f32 %v2682_v10, %v434_v17 }
  0x16   : > { %402 = vst.msk [vmem:[#allocation2 + $0x21] sm:$0xff] %vm344_vm1, %v313_v13  ;;  %v525_v24 = vmul.f32 %v2671_v5, %v435_v20  ;;  %v620_v25 = vrot.slane %v523_v18, 1  ;;  %v767_v26 = vmul.f32 %v2674_v6, %v435_v20  ;;  %v862_v27 = vrot.slane %v765_v19, 2 }
  0x17   : > { %403 = vst.msk [vmem:[#allocation2 + $0x31] sm:$0xff] %vm344_vm1, %v314_v14  ;;  %v621_v29 = vrot.slane %v524_v22, 1  ;;  %v863_v30 = vrot.slane %v766_v23, 2 }
  0x18   : > { %404 = vst.msk [vmem:[#allocation2 + $0x39] sm:$0xff] %vm344_vm1, %v315_v16  ;;  %v623_v31 = vrot.slane %v525_v24, 1  ;;  %v865_v32 = vrot.slane %v767_v26, 2 }
  0x19   : > { %v622_v34 = vsel %vm619_vm3, %v620_v25, %v621_v29  ;;  %v864_v35 = vsel %vm861_vm4, %v862_v27, %v863_v30  ;;  %355 = vst.msk [vmem:[#allocation2 + $0x48] sm:$0xff] %vm344_vm1, %v2593_v2 }
  0x1a   : > { %v624_v38 = vsel %vm619_vm3, %v621_v29, %v623_v31  ;;  %v732_v39 = vadd.f32 %v622_v34, %v490_v21  ;;  %v866_v40 = vsel %vm861_vm4, %v863_v30, %v865_v32  ;;  %356 = vst.msk [vmem:[#allocation2 + $0x50] sm:$0xff] %vm344_vm1, %v2593_v2 }
  0x1b   : > { %v733_v41 = vadd.f32 %v624_v38, %v491_v28  ;;  %357 = vst.msk [vmem:[#allocation2 + $0x58] sm:$0x3] %vm347_vm2, %v2593_v2 }
  0x1c   : > { %v2722_v42 = vld [vmem:[#allocation2 + $0x18] sm:$0xff]  ;;  %v974_v43 = vadd.f32 %v864_v35, %v732_v39  ;;  %358 = vst.msk [vmem:[#allocation2 + $0x60] sm:$0xff] %vm344_vm1, %v2593_v2 }
  0x1d   : > { %v2732_v46 = vld [vmem:[#allocation2 + $0x20] sm:$0xff]  ;;  %v2734_v47 = vld [vmem:[#allocation2 + $0x28] sm:$0x3]  ;;  %v975_v48 = vadd.f32 %v866_v40, %v733_v41  ;;  %v1007_v49 = vmul.f32 %v2704_v33, %v2722_v42  ;;  %v1072_v50 = vmul.f32 %v2709_v36, %v2722_v42  ;;  %v1313_v51 = vmul.f32 %v2712_v37, %v2722_v42  ;;  %359 = vst.msk [vmem:[#allocation2 + $0x68] sm:$0xff] %vm344_vm1, %v2593_v2 }
  0x1e   : > { %v2744_v52 = vld [vmem:[#allocation2 + $0x30] sm:$0xff]  ;;  %v1008_v53 = vmul.f32 %v2704_v33, %v2732_v46  ;;  %v1073_v54 = vmul.f32 %v2709_v36, %v2732_v46  ;;  %v1074_v55 = vmul.f32 %v2709_v36, %v2734_v47  ;;  %v1314_v56 = vmul.f32 %v2712_v37, %v2732_v46  ;;  %360 = vst.msk [vmem:[#allocation2 + $0x70] sm:$0x3] %vm347_vm2, %v2593_v2 }
  0x1f   : > { %v2756_v57 = vld [vmem:[#allocation2 + $0x38] sm:$0xff]  ;;  %v1039_v58 = vadd.f32 %v1007_v49, %v974_v43  ;;  %v1168_v59 = vrot.slane %v1072_v50, 1  ;;  %v1315_v60 = vmul.f32 %v2712_v37, %v2734_v47  ;;  %v1409_v61 = vrot.slane %v1313_v51, 2  ;;  %361 = vst.msk [vmem:[#allocation2 + $0x78] sm:$0xff] %vm344_vm1, %v2593_v2  ;;  %v2767_v63 = vld [vmem:[#allocation2 + $0x40] sm:$0x3] }
  0x20   : > { %v1040_v0 = vadd.f32 %v1008_v53, %v975_v48  ;;  %v1169_v1 = vrot.slane %v1073_v54, 1  ;;  %v1171_v3 = vrot.slane %v1074_v55, 1  ;;  %v1410_v4 = vrot.slane %v1314_v56, 2  ;;  %362 = vst.msk [vmem:[#allocation2 + $0x80] sm:$0xff] %vm344_vm1, %v2593_v2  ;;  %v2814_v43 = vld [vmem:[%s4089_s2] ss:$0 sm:$0xff] }
  0x21   : > { %v1412_v7 = vrot.slane %v1315_v60, 2  ;;  %v1554_v8 = vmul.f32 %v2725_v44, %v2744_v52  ;;  %v1555_v9 = vmul.f32 %v2725_v44, %v2756_v57  ;;  %v1619_v11 = vmul.f32 %v2728_v45, %v2744_v52  ;;  %363 = vst.msk [vmem:[#allocation2 + $0x88] sm:$0x3] %vm347_vm2, %v2593_v2  ;;  %v2823_v50 = vld [vmem:[%s4090_s3] ss:$0 sm:$0xff] }
  0x22   : > { %v1170_v12 = vsel %vm619_vm3, %v1168_v59, %v1169_v1  ;;  %v1172_v13 = vsel %vm619_vm3, %v1169_v1, %v1171_v3  ;;  %v1411_v14 = vsel %vm861_vm4, %v1409_v61, %v1410_v4  ;;  %v1620_v15 = vmul.f32 %v2728_v45, %v2756_v57  ;;  %364 = vst.msk [vmem:[#allocation2 + $0x90] sm:$0xff] %vm344_vm1, %v2593_v2  ;;  %v287_v59 = vld [vmem:[%s2666_s10 + $0x38] sm:$0xff]  ;;  %v288_v60 = vld [vmem:[%s2666_s10 + $0x40] sm:$0xff]  ;;  %v289_v61 = vld [vmem:[%s2666_s10 + $0x48] sm:$0xff] }
  0x23   : > { %v1280_v16 = vadd.f32 %v1170_v12, %v1039_v58  ;;  %v1281_v17 = vadd.f32 %v1172_v13, %v1040_v0  ;;  %v1413_v18 = vsel %vm861_vm4, %v1410_v4, %v1412_v7  ;;  %v1621_v19 = vmul.f32 %v2728_v45, %v2767_v63  ;;  %365 = vst.msk [vmem:[#allocation2 + $0x98] sm:$0xff] %vm344_vm1, %v2593_v2  ;;  %v286_v58 = vld [vmem:[%s2666_s10 + $0x30] sm:$0xff]  ;;  %v291_v4 = vld [vmem:[%s2666_s10 + $0x58] sm:$0xff] }
  0x24   : > { %v1715_v20 = vrot.slane %v1619_v11, 1  ;;  %v1716_v21 = vrot.slane %v1620_v15, 1  ;;  %v1860_v22 = vmul.f32 %v2763_v62, %v2744_v52  ;;  %v1861_v23 = vmul.f32 %v2763_v62, %v2756_v57  ;;  %366 = vst.msk [vmem:[#allocation2 + $0xa0] sm:$0x3] %vm347_vm2, %v2593_v2  ;;  %v290_v1 = vld [vmem:[%s2666_s10 + $0x50] sm:$0xff]  ;;  %v295_v12 = vld [vmem:[%s2666_s10 + $0x78] sm:$0xff] }
  0x25   : > { %v1521_v24 = vadd.f32 %v1411_v14, %v1280_v16  ;;  %v1522_v25 = vadd.f32 %v1413_v18, %v1281_v17  ;;  %v1718_v26 = vrot.slane %v1621_v19, 1  ;;  %v1862_v27 = vmul.f32 %v2763_v62, %v2767_v63  ;;  %367 = vst.msk [vmem:[#allocation2 + $0xa8] sm:$0xff] %vm344_vm1, %v2593_v2  ;;  %v296_v14 = vld [vmem:[%s2666_s10 + $0x80] sm:$0xff]  ;;  %v297_v15 = vld [vmem:[%s2666_s10 + $0x88] sm:$0xff]  ;;  %v299_v17 = vld [vmem:[%s2666_s10 + $0x98] sm:$0xff] }
  0x26   : > { %v1717_v28 = vsel %vm619_vm3, %v1715_v20, %v1716_v21  ;;  %v1956_v29 = vrot.slane %v1860_v22, 2  ;;  %v1957_v30 = vrot.slane %v1861_v23, 2  ;;  %368 = vst.msk [vmem:[#allocation2 + $0xb0] sm:$0xff] %vm344_vm1, %v2593_v2  ;;  %v318_v0 = vmax.f32 %v286_v58, 0.0  ;;  %v302_v19 = vld [vmem:[%s2666_s10 + $0xb0] sm:$0xff]  ;;  %v303_v20 = vld [vmem:[%s2666_s10 + $0xb8] sm:$0xff] }
  0x27   : > { %v1586_v31 = vadd.f32 %v1554_v8, %v1521_v24  ;;  %v1587_v32 = vadd.f32 %v1555_v9, %v1522_v25  ;;  %v1719_v34 = vsel %vm619_vm3, %v1716_v21, %v1718_v26  ;;  %v1959_v35 = vrot.slane %v1862_v27, 2  ;;  %369 = vst.msk [vmem:[#allocation2 + $0xb8] sm:$0x3] %vm347_vm2, %v2593_v2  ;;  %v294_v9 = vld [vmem:[%s2666_s10 + $0x70] sm:$0xff]  ;;  %v304_v22 = vld [vmem:[%s2666_s10 + $0xc0] sm:$0xff]  ;;  %v305_v23 = vld [vmem:[%s2666_s10 + $0xc8] sm:$0xff] }
  0x28   : > { %v1958_v38 = vsel %vm861_vm4, %v1956_v29, %v1957_v30  ;;  %370 = vst.msk [vmem:[#allocation2 + $0xc0] sm:$0xff] %vm344_vm1, %v2593_v2  ;;  %v319_v3 = vmax.f32 %v287_v59, 0.0  ;;  %v320_v7 = vmax.f32 %v288_v60, 0.0  ;;  %v321_v8 = vmax.f32 %v289_v61, 0.0  ;;  %v2906_v24 = vld [vmem:[%s2666_s10 + $0xd0] sm:$0xff]  ;;  %v2910_v26 = vld [vmem:[%s2666_s10 + $0xd8] sm:$0xff] }
  0x29   : > { %v1827_v39 = vadd.f32 %v1717_v28, %v1586_v31  ;;  %v1828_v40 = vadd.f32 %v1719_v34, %v1587_v32  ;;  %v1960_v41 = vsel %vm861_vm4, %v1957_v30, %v1959_v35  ;;  %371 = vst.msk [vmem:[#allocation2 + $0xc8] sm:$0xff] %vm344_vm1, %v2593_v2  ;;  %v322_v11 = vmax.f32 %v290_v1, 0.0 }
  0x2a   : > { %372 = vst.msk [vmem:[#allocation2 + $0xd0] sm:$0x3] %vm347_vm2, %v2593_v2  ;;  %v323_v13 = vmax.f32 %v291_v4, 0.0  ;;  %v326_v16 = vmax.f32 %v294_v9, 0.0  ;;  %v327_v18 = vmax.f32 %v295_v12, 0.0  ;;  %v328_v21 = vmax.f32 %v296_v14, 0.0 }
  0x2b   : > { %v2068_v48 = vadd.f32 %v1958_v38, %v1827_v39  ;;  %v2069_v49 = vadd.f32 %v1960_v41, %v1828_v40  ;;  %373 = vst.msk [vmem:[#allocation2 + $0xd8] sm:$0xff] %vm344_vm1, %v2593_v2  ;;  %v329_v25 = vmax.f32 %v297_v15, 0.0  ;;  %v331_v28 = vmax.f32 %v299_v17, 0.0 }
  0x2c   : > { %374 = vst.msk [vmem:[#allocation2 + $0xe0] sm:$0xff] %vm344_vm1, %v2593_v2  ;;  %v334_v29 = vmax.f32 %v302_v19, 0.0  ;;  %v335_v31 = vmax.f32 %v303_v20, 0.0  ;;  %v336_v32 = vmax.f32 %v304_v22, 0.0  ;;  %v337_v34 = vmax.f32 %v305_v23, 0.0 }
  0x2d   : > { %v2104_v51 = vmul.f32 %v2814_v43, %v2068_v48  ;;  %v2105_v53 = vmul.f32 %v2814_v43, %v2069_v49  ;;  %375 = vst.msk [vmem:[#allocation2 + $0xe8] sm:$0x3] %vm347_vm2, %v2593_v2  ;;  %v338_v35 = vmax.f32 %v2906_v24, 0.0  ;;  %v339_v49 = vmax.f32 %v2910_v26, 0.0 }
  0x2e   : > { %376 = vst.msk [vmem:[#allocation2 + $0xf0] sm:$0xff] %vm344_vm1, %v2593_v2 }
  0x2f   : > { %v2140_v54 = vadd.f32 %v2823_v50, %v2104_v51  ;;  %v2141_v55 = vadd.f32 %v2823_v50, %v2105_v53  ;;  %377 = vst.msk [vmem:[#allocation2 + $0xf8] sm:$0xff] %vm344_vm1, %v2593_v2 }
  0x30   : > { %378 = vst.msk [vmem:[#allocation2 + $0x100] sm:$0x3] %vm347_vm2, %v2593_v2 }
  0x31   : > { %v2172_v56 = vpack.c.bf16 %v2141_v55, %v2140_v54  ;;  %379 = vst.msk [vmem:[#allocation2 + $0x108] sm:$0xff] %vm344_vm1, %v2593_v2 }
  0x32   : > { %380 = vst.msk [vmem:[#allocation2 + $0x110] sm:$0xff] %vm344_vm1, %v2593_v2 }
  0x33   : > { %2500 = vmatmul.msk.bf16.vlgmr.msra.gmra.mxu0 %vm344_vm1, %v2172_v56  ;;  %381 = vst.msk [vmem:[#allocation2 + $0x118] sm:$0x3] %vm347_vm2, %v2593_v2 }
  0x34   : > { %382 = vst.msk [vmem:[#allocation2 + $0x120] sm:$0xff] %vm344_vm1, %v2593_v2 }
  0x35   : > { %383 = vst.msk [vmem:[#allocation2 + $0x128] sm:$0xff] %vm344_vm1, %v2593_v2 }
  0x36   : > { %384 = vst.msk [vmem:[#allocation2 + $0x130] sm:$0x3] %vm347_vm2, %v2593_v2 }
  0x37   : > { %385 = vst.msk [vmem:[#allocation2 + $0x138] sm:$0xff] %vm344_vm1, %v2593_v2 }
  0x38   : > { %386 = vst.msk [vmem:[#allocation2 + $0x140] sm:$0xff] %vm344_vm1, %v2593_v2 }
  0x39   : > { %387 = vst.msk [vmem:[#allocation2 + $0x148] sm:$0x3] %vm347_vm2, %v2593_v2 }
  0x3a   : > { %388 = vst.msk [vmem:[#allocation2 + $0x150] sm:$0xff] %vm344_vm1, %v2593_v2 }
  0x3b   : > { %389 = vst.msk [vmem:[#allocation2 + $0x158] sm:$0xff] %vm344_vm1, %v2593_v2 }
  0x3c   : > { %390 = vst.msk [vmem:[#allocation2 + $0x160] sm:$0x3] %vm347_vm2, %v2593_v2 }
  0x3d   : > { %391 = vst.msk [vmem:[#allocation2 + $0x168] sm:$0xff] %vm344_vm1, %v2593_v2 }
  0x3e   : > { %392 = vst.msk [vmem:[#allocation2 + $0x170] sm:$0xff] %vm344_vm1, %v2593_v2 }
  0x3f   : > { %393 = vst.msk [vmem:[#allocation2 + $0x178] sm:$0x3] %vm347_vm2, %v2593_v2 }
  0x40   : > { %394 = vst.msk [vmem:[#allocation2 + $0x180] sm:$0xff] %vm344_vm1, %v2593_v2 }
  0x41   : > { %395 = vst.msk [vmem:[#allocation2 + $0x188] sm:$0xff] %vm344_vm1, %v2593_v2 }
  0x42   : > { %396 = vst.msk [vmem:[#allocation2 + $0x190] sm:$0x3] %vm347_vm2, %v2593_v2 }
  0x43   : > { %397 = vst.msk [vmem:[#allocation2 + $0x198] sm:$0xff] %vm344_vm1, %v2593_v2 }
  0x44   : > { %398 = vst.msk [vmem:[#allocation2 + $0x1a0] sm:$0xff] %vm344_vm1, %v2593_v2 }
  0x45   : > { %399 = vst.msk [vmem:[#allocation2 + $0x1a8] sm:$0x3] %vm347_vm2, %v2593_v2  ;;  %v298_v2 = vld [vmem:[%s2666_s10 + $0x90] sm:$0xff] }
  0x46   : > { %407 = vst.msk [vmem:[#allocation2 + $0x61] sm:$0xff] %vm344_vm1, %v318_v0  ;;  %v330_v27 = vmax.f32 %v298_v2, 0.0 }
  0x47   : > { %408 = vst.msk [vmem:[#allocation2 + $0x69] sm:$0xff] %vm344_vm1, %v319_v3 }
  0x48   : > { %409 = vst.msk [vmem:[#allocation2 + $0x79] sm:$0xff] %vm344_vm1, %v320_v7 }
  0x49   : > { %410 = vst.msk [vmem:[#allocation2 + $0x81] sm:$0xff] %vm344_vm1, %v321_v8 }
  0x4a   : > { %411 = vst.msk [vmem:[#allocation2 + $0x91] sm:$0xff] %vm344_vm1, %v322_v11 }
  0x4b   : > { %412 = vst.msk [vmem:[#allocation2 + $0x99] sm:$0xff] %vm344_vm1, %v323_v13 }
  0x4c   : > { %415 = vst.msk [vmem:[#allocation2 + $0xc1] sm:$0xff] %vm344_vm1, %v326_v16 }
  0x4d   : > { %v445_v30 = vld [vmem:[#allocation2 + $0x60] sm:$0xff]  ;;  %416 = vst.msk [vmem:[#allocation2 + $0xc9] sm:$0xff] %vm344_vm1, %v327_v18 }
  0x4e   : > { %v446_v38 = vld [vmem:[#allocation2 + $0x68] sm:$0xff]  ;;  %v447_v39 = vld [vmem:[#allocation2 + $0x70] sm:$0x3]  ;;  %v498_v40 = vmul.f32 %v2682_v10, %v445_v30  ;;  %v535_v41 = vmul.f32 %v2671_v5, %v445_v30  ;;  %v777_v48 = vmul.f32 %v2674_v6, %v445_v30  ;;  %417 = vst.msk [vmem:[#allocation2 + $0xd9] sm:$0xff] %vm344_vm1, %v328_v21 }
  0x4f   : > { %v2920_v51 = vld [vmem:[#allocation2 + $0x78] sm:$0xff]  ;;  %v499_v53 = vmul.f32 %v2682_v10, %v446_v38  ;;  %v536_v54 = vmul.f32 %v2671_v5, %v446_v38  ;;  %v537_v55 = vmul.f32 %v2671_v5, %v447_v39  ;;  %v778_v56 = vmul.f32 %v2674_v6, %v446_v38  ;;  %418 = vst.msk [vmem:[#allocation2 + $0xe1] sm:$0xff] %vm344_vm1, %v329_v25 }
  0x50   : > { %v2927_v58 = vld [vmem:[#allocation2 + $0x80] sm:$0xff]  ;;  %v2929_v59 = vld [vmem:[#allocation2 + $0x88] sm:$0x3]  ;;  %v640_v60 = vrot.slane %v535_v41, 1  ;;  %v779_v61 = vmul.f32 %v2674_v6, %v447_v39  ;;  %v882_v0 = vrot.slane %v777_v48, 2  ;;  %v1015_v1 = vmul.f32 %v2704_v33, %v2920_v51  ;;  %419 = vst.msk [vmem:[#allocation2 + $0xf1] sm:$0xff] %vm344_vm1, %v330_v27 }
  0x51   : > { %v641_v3 = vrot.slane %v536_v54, 1  ;;  %v643_v4 = vrot.slane %v537_v55, 1  ;;  %v883_v7 = vrot.slane %v778_v56, 2  ;;  %v1016_v8 = vmul.f32 %v2704_v33, %v2927_v58  ;;  %420 = vst.msk [vmem:[#allocation2 + $0xf9] sm:$0xff] %vm344_vm1, %v331_v28  ;;  %v2945_v14 = vld [vmem:[#allocation2 + $0x90] sm:$0xff] }
  0x52   : > { %v885_v9 = vrot.slane %v779_v61, 2  ;;  %v1084_v11 = vmul.f32 %v2709_v36, %v2920_v51  ;;  %v1085_v12 = vmul.f32 %v2709_v36, %v2927_v58  ;;  %v1086_v13 = vmul.f32 %v2709_v36, %v2929_v59  ;;  %423 = vst.msk [vmem:[#allocation2 + $0x121] sm:$0xff] %vm344_vm1, %v334_v29  ;;  %v2955_v22 = vld [vmem:[#allocation2 + $0x98] sm:$0xff]  ;;  %v2962_v27 = vld [vmem:[#allocation2 + $0xa0] sm:$0x3] }
  0x53   : > { %v642_v15 = vsel %vm619_vm3, %v640_v60, %v641_v3  ;;  %v644_v2 = vsel %vm619_vm3, %v641_v3, %v643_v4  ;;  %v884_v16 = vsel %vm861_vm4, %v882_v0, %v883_v7  ;;  %v1325_v17 = vmul.f32 %v2712_v37, %v2920_v51  ;;  %424 = vst.msk [vmem:[#allocation2 + $0x129] sm:$0xff] %vm344_vm1, %v335_v31 }
  0x54   : > { %v740_v18 = vadd.f32 %v642_v15, %v498_v40  ;;  %v741_v19 = vadd.f32 %v644_v2, %v499_v53  ;;  %v886_v20 = vsel %vm861_vm4, %v883_v7, %v885_v9  ;;  %v1188_v21 = vrot.slane %v1084_v11, 1  ;;  %425 = vst.msk [vmem:[#allocation2 + $0x139] sm:$0xff] %vm344_vm1, %v336_v32  ;;  %v459_v15 = vld [vmem:[#allocation2 + $0xd0] sm:$0x3] }
  0x55   : > { %v1189_v23 = vrot.slane %v1085_v12, 1  ;;  %v1191_v24 = vrot.slane %v1086_v13, 1  ;;  %v1326_v25 = vmul.f32 %v2712_v37, %v2927_v58  ;;  %v1327_v26 = vmul.f32 %v2712_v37, %v2929_v59  ;;  %426 = vst.msk [vmem:[#allocation2 + $0x141] sm:$0xff] %vm344_vm1, %v337_v34  ;;  %v458_v13 = vld [vmem:[#allocation2 + $0xc8] sm:$0xff] }
  0x56   : > { %v982_v28 = vadd.f32 %v884_v16, %v740_v18  ;;  %v983_v29 = vadd.f32 %v886_v20, %v741_v19  ;;  %v1429_v30 = vrot.slane %v1325_v17, 2  ;;  %v1562_v31 = vmul.f32 %v2725_v44, %v2945_v14  ;;  %427 = vst.msk [vmem:[#allocation2 + $0x151] sm:$0xff] %vm344_vm1, %v338_v35 }
  0x57   : > { %v1190_v32 = vsel %vm619_vm3, %v1188_v21, %v1189_v23  ;;  %v1192_v38 = vsel %vm619_vm3, %v1189_v23, %v1191_v24  ;;  %v1430_v39 = vrot.slane %v1326_v25, 2  ;;  %v1432_v40 = vrot.slane %v1327_v26, 2  ;;  %428 = vst.msk [vmem:[#allocation2 + $0x159] sm:$0xff] %vm344_vm1, %v339_v49 }
  0x58   : > { %v1047_v41 = vadd.f32 %v1015_v1, %v982_v28  ;;  %v1048_v34 = vadd.f32 %v1016_v8, %v983_v29  ;;  %v1563_v48 = vmul.f32 %v2725_v44, %v2955_v22  ;;  %v1631_v53 = vmul.f32 %v2728_v45, %v2945_v14  ;;  %v457_v8 = vld [vmem:[#allocation2 + $0xc0] sm:$0xff]  ;;  %v2993_v28 = vld [vmem:[#allocation2 + $0xd8] sm:$0xff] }
  0x59   : > { %v1431_v54 = vsel %vm861_vm4, %v1429_v30, %v1430_v39  ;;  %v1433_v35 = vsel %vm861_vm4, %v1430_v39, %v1432_v40  ;;  %v1632_v55 = vmul.f32 %v2728_v45, %v2955_v22  ;;  %v1633_v56 = vmul.f32 %v2728_v45, %v2962_v27 }
  0x5a   : > { %v1288_v60 = vadd.f32 %v1190_v32, %v1047_v41  ;;  %v1289_v49 = vadd.f32 %v1192_v38, %v1048_v34  ;;  %v1735_v61 = vrot.slane %v1631_v53, 1  ;;  %v1872_v0 = vmul.f32 %v2763_v62, %v2945_v14 }
  0x5b   : > { %v1736_v1 = vrot.slane %v1632_v55, 1  ;;  %v1738_v3 = vrot.slane %v1633_v56, 1  ;;  %v1873_v4 = vmul.f32 %v2763_v62, %v2955_v22  ;;  %v1874_v7 = vmul.f32 %v2763_v62, %v2962_v27 }
  0x5c   : > { %v1529_v9 = vadd.f32 %v1431_v54, %v1288_v60  ;;  %v1530_v11 = vadd.f32 %v1433_v35, %v1289_v49  ;;  %v1976_v12 = vrot.slane %v1872_v0, 2  ;;  %v506_v2 = vmul.f32 %v2682_v10, %v457_v8  ;;  %v3000_v35 = vld [vmem:[#allocation2 + $0xe0] sm:$0xff] }
  0x5d   : > { %v1737_v16 = vsel %vm619_vm3, %v1735_v61, %v1736_v1  ;;  %v1739_v17 = vsel %vm619_vm3, %v1736_v1, %v1738_v3  ;;  %v1977_v18 = vrot.slane %v1873_v4, 2  ;;  %v1979_v19 = vrot.slane %v1874_v7, 2  ;;  %v3008_v4 = vld [vmem:[#allocation2 + $0xe8] sm:$0x3] }
  0x5e   : > { %v1594_v20 = vadd.f32 %v1562_v31, %v1529_v9  ;;  %v1595_v21 = vadd.f32 %v1563_v48, %v1530_v11  ;;  %v507_v23 = vmul.f32 %v2682_v10, %v458_v13  ;;  %v547_v24 = vmul.f32 %v2671_v5, %v457_v8 }
  0x5f   : > { %v1978_v25 = vsel %vm861_vm4, %v1976_v12, %v1977_v18  ;;  %v1980_v26 = vsel %vm861_vm4, %v1977_v18, %v1979_v19  ;;  %v548_v29 = vmul.f32 %v2671_v5, %v458_v13  ;;  %v549_v30 = vmul.f32 %v2671_v5, %v459_v15  ;;  %v3018_v19 = vld [vmem:[#allocation2 + $0xf0] sm:$0xff] }
  0x60   : > { %v1835_v32 = vadd.f32 %v1737_v16, %v1594_v20  ;;  %v1836_v38 = vadd.f32 %v1739_v17, %v1595_v21  ;;  %v660_v39 = vrot.slane %v547_v24, 1  ;;  %v789_v31 = vmul.f32 %v2674_v6, %v457_v8 }
  0x61   : > { %v661_v40 = vrot.slane %v548_v29, 1  ;;  %v663_v41 = vrot.slane %v549_v30, 1  ;;  %v790_v34 = vmul.f32 %v2674_v6, %v458_v13  ;;  %v791_v48 = vmul.f32 %v2674_v6, %v459_v15 }
  0x62   : > { %v2076_v53 = vadd.f32 %v1978_v25, %v1835_v32  ;;  %v2077_v54 = vadd.f32 %v1980_v26, %v1836_v38  ;;  %v902_v55 = vrot.slane %v789_v31, 2  ;;  %v1023_v56 = vmul.f32 %v2704_v33, %v2993_v28  ;;  %v3030_v32 = vld [vmem:[#allocation2 + $0x100] sm:$0x3] }
  0x63   : > { %v662_v60 = vsel %vm619_vm3, %v660_v39, %v661_v40  ;;  %v664_v49 = vsel %vm619_vm3, %v661_v40, %v663_v41  ;;  %v903_v61 = vrot.slane %v790_v34, 2  ;;  %v905_v0 = vrot.slane %v791_v48, 2 }
  0x64   : > { %v2112_v1 = vmul.f32 %v2814_v43, %v2076_v53  ;;  %v2113_v3 = vmul.f32 %v2814_v43, %v2077_v54  ;;  %v748_v7 = vadd.f32 %v662_v60, %v506_v2  ;;  %v749_v8 = vadd.f32 %v664_v49, %v507_v23  ;;  %v3020_v2 = vld [vmem:[#allocation2 + $0xf8] sm:$0xff] }
  0x65   : > { %v904_v9 = vsel %vm861_vm4, %v902_v55, %v903_v61  ;;  %v906_v11 = vsel %vm861_vm4, %v903_v61, %v905_v0  ;;  %v1024_v12 = vmul.f32 %v2704_v33, %v3000_v35  ;;  %v1096_v13 = vmul.f32 %v2709_v36, %v2993_v28 }
  0x66   : > { %v2148_v15 = vadd.f32 %v2823_v50, %v2112_v1  ;;  %v2149_v16 = vadd.f32 %v2823_v50, %v2113_v3  ;;  %v990_v17 = vadd.f32 %v904_v9, %v748_v7  ;;  %v991_v18 = vadd.f32 %v906_v11, %v749_v8 }
  0x67   : > { %v1097_v20 = vmul.f32 %v2709_v36, %v3000_v35  ;;  %v1098_v21 = vmul.f32 %v2709_v36, %v3008_v4  ;;  %v1208_v23 = vrot.slane %v1096_v13, 1  ;;  %v1337_v24 = vmul.f32 %v2712_v37, %v2993_v28 }
  0x68   : > { %v2176_v25 = vpack.c.bf16 %v2149_v16, %v2148_v15  ;;  %v1055_v26 = vadd.f32 %v1023_v56, %v990_v17  ;;  %v1056_v29 = vadd.f32 %v1024_v12, %v991_v18  ;;  %v1338_v30 = vmul.f32 %v2712_v37, %v3000_v35  ;;  %v469_v16 = vld [vmem:[#allocation2 + $0x120] sm:$0xff]  ;;  %v470_v17 = vld [vmem:[#allocation2 + $0x128] sm:$0xff] }
  0x69   : > { %v1209_v38 = vrot.slane %v1097_v20, 1  ;;  %v1211_v39 = vrot.slane %v1098_v21, 1  ;;  %v1339_v31 = vmul.f32 %v2712_v37, %v3008_v4  ;;  %v1449_v40 = vrot.slane %v1337_v24, 2 }
  0x6a   : > { %2504 = vmatmul.msk.bf16.vlgmr.msra.gmra.mxu1 %vm344_vm1, %v2176_v25  ;;  %v1450_v41 = vrot.slane %v1338_v30, 2  ;;  %v1570_v34 = vmul.f32 %v2725_v44, %v3018_v19  ;;  %v1571_v48 = vmul.f32 %v2725_v44, %v3020_v2  ;;  %v1643_v53 = vmul.f32 %v2728_v45, %v3018_v19 }
  0x6b   : > { %v1210_v54 = vsel %vm619_vm3, %v1208_v23, %v1209_v38  ;;  %v1212_v55 = vsel %vm619_vm3, %v1209_v38, %v1211_v39  ;;  %v1452_v56 = vrot.slane %v1339_v31, 2  ;;  %v1644_v60 = vmul.f32 %v2728_v45, %v3020_v2  ;;  %v471_v23 = vld [vmem:[#allocation2 + $0x130] sm:$0x3] }
  0x6c   : > { %v1296_v49 = vadd.f32 %v1210_v54, %v1055_v26  ;;  %v1297_v61 = vadd.f32 %v1212_v55, %v1056_v29  ;;  %v1451_v0 = vsel %vm861_vm4, %v1449_v40, %v1450_v41  ;;  %v1645_v1 = vmul.f32 %v2728_v45, %v3030_v32  ;;  %v3062_v55 = vld [vmem:[#allocation2 + $0x138] sm:$0xff] }
  0x6d   : > { %v1453_v3 = vsel %vm861_vm4, %v1450_v41, %v1452_v56  ;;  %v1755_v7 = vrot.slane %v1643_v53, 1  ;;  %v1756_v8 = vrot.slane %v1644_v60, 1  ;;  %v1884_v9 = vmul.f32 %v2763_v62, %v3018_v19 }
  0x6e   : > { %v1537_v11 = vadd.f32 %v1451_v0, %v1296_v49  ;;  %v1538_v12 = vadd.f32 %v1453_v3, %v1297_v61  ;;  %v1758_v13 = vrot.slane %v1645_v1, 1  ;;  %v1885_v15 = vmul.f32 %v2763_v62, %v3020_v2  ;;  %v3067_v1 = vld [vmem:[#allocation2 + $0x140] sm:$0xff] }
  0x6f   : > { %v1757_v18 = vsel %vm619_vm3, %v1755_v7, %v1756_v8  ;;  %v1886_v20 = vmul.f32 %v2763_v62, %v3030_v32  ;;  %v1996_v21 = vrot.slane %v1884_v9, 2  ;;  %v514_v24 = vmul.f32 %v2682_v10, %v469_v16 }
  0x70   : > { %v1602_v25 = vadd.f32 %v1570_v34, %v1537_v11  ;;  %v1603_v26 = vadd.f32 %v1571_v48, %v1538_v12  ;;  %v1759_v29 = vsel %vm619_vm3, %v1756_v8, %v1758_v13  ;;  %v1997_v30 = vrot.slane %v1885_v15, 2 }
  0x71   : > { %v1999_v38 = vrot.slane %v1886_v20, 2  ;;  %v515_v39 = vmul.f32 %v2682_v10, %v470_v17  ;;  %v559_v31 = vmul.f32 %v2671_v5, %v469_v16  ;;  %v560_v40 = vmul.f32 %v2671_v5, %v470_v17 }
  0x72   : > { %v1843_v41 = vadd.f32 %v1757_v18, %v1602_v25  ;;  %v1844_v53 = vadd.f32 %v1759_v29, %v1603_v26  ;;  %v1998_v54 = vsel %vm861_vm4, %v1996_v21, %v1997_v30  ;;  %v561_v56 = vmul.f32 %v2671_v5, %v471_v23 }
  0x73   : > { %v2000_v34 = vsel %vm861_vm4, %v1997_v30, %v1999_v38  ;;  %v680_v48 = vrot.slane %v559_v31, 1  ;;  %v681_v60 = vrot.slane %v560_v40, 1  ;;  %v801_v49 = vmul.f32 %v2674_v6, %v469_v16  ;;  %v3076_v16 = vld [vmem:[#allocation2 + $0x148] sm:$0x3]  ;;  %v3087_v31 = vld [vmem:[#allocation2 + $0x150] sm:$0xff] }
  0x74   : > { %v2084_v61 = vadd.f32 %v1998_v54, %v1843_v41  ;;  %v2085_v0 = vadd.f32 %v2000_v34, %v1844_v53  ;;  %v683_v3 = vrot.slane %v561_v56, 1  ;;  %v802_v7 = vmul.f32 %v2674_v6, %v470_v17 }
  0x75   : > { %v682_v8 = vsel %vm619_vm3, %v680_v48, %v681_v60  ;;  %v803_v9 = vmul.f32 %v2674_v6, %v471_v23  ;;  %v922_v11 = vrot.slane %v801_v49, 2  ;;  %v1031_v12 = vmul.f32 %v2704_v33, %v3062_v55  ;;  %v3095_v48 = vld [vmem:[#allocation2 + $0x158] sm:$0xff] }
  0x76   : > { %v2120_v13 = vmul.f32 %v2814_v43, %v2084_v61  ;;  %v2121_v15 = vmul.f32 %v2814_v43, %v2085_v0  ;;  %v684_v18 = vsel %vm619_vm3, %v681_v60, %v683_v3  ;;  %v756_v20 = vadd.f32 %v682_v8, %v514_v24  ;;  %v3102_v3 = vld [vmem:[#allocation2 + $0x160] sm:$0x3] }
  0x77   : > { %v757_v21 = vadd.f32 %v684_v18, %v515_v39  ;;  %v923_v25 = vrot.slane %v802_v7, 2  ;;  %v925_v17 = vrot.slane %v803_v9, 2  ;;  %v1032_v26 = vmul.f32 %v2704_v33, %v3067_v1 }
  0x78   : > { %v2156_v23 = vadd.f32 %v2823_v50, %v2120_v13  ;;  %v2157_v29 = vadd.f32 %v2823_v50, %v2121_v15  ;;  %v1108_v30 = vmul.f32 %v2709_v36, %v3062_v55  ;;  %v1109_v38 = vmul.f32 %v2709_v36, %v3067_v1 }
  0x79   : > { %v924_v24 = vsel %vm861_vm4, %v922_v11, %v923_v25  ;;  %v926_v39 = vsel %vm861_vm4, %v923_v25, %v925_v17  ;;  %v1110_v40 = vmul.f32 %v2709_v36, %v3076_v16  ;;  %v1349_v41 = vmul.f32 %v2712_v37, %v3062_v55 }
  0x7a   : > { %v2180_v53 = vpack.c.bf16 %v2157_v29, %v2156_v23  ;;  %v998_v54 = vadd.f32 %v924_v24, %v756_v20  ;;  %v999_v56 = vadd.f32 %v926_v39, %v757_v21  ;;  %v1228_v34 = vrot.slane %v1108_v30, 1 }
  0x7b   : > { %v1229_v60 = vrot.slane %v1109_v38, 1  ;;  %v1231_v49 = vrot.slane %v1110_v40, 1  ;;  %v1350_v61 = vmul.f32 %v2712_v37, %v3067_v1  ;;  %v1351_v0 = vmul.f32 %v2712_v37, %v3076_v16  ;;  %v284_v38 = vld [vmem:[%s2666_s10 + $0x20] sm:$0xff] }
  0x7c   : > { %2508 = vmatmul.msk.bf16.vlgmr.msra.gmra.mxu2 %vm344_vm1, %v2180_v53  ;;  %v1063_v7 = vadd.f32 %v1031_v12, %v998_v54  ;;  %v1064_v8 = vadd.f32 %v1032_v26, %v999_v56  ;;  %v1469_v9 = vrot.slane %v1349_v41, 2  ;;  %v1578_v11 = vmul.f32 %v2725_v44, %v3087_v31 }
  0x7d   : > { %v1230_v13 = vsel %vm619_vm3, %v1228_v34, %v1229_v60  ;;  %v1232_v15 = vsel %vm619_vm3, %v1229_v60, %v1231_v49  ;;  %v1470_v18 = vrot.slane %v1350_v61, 2  ;;  %v1472_v20 = vrot.slane %v1351_v0, 2  ;;  %v285_v60 = vld [vmem:[%s2666_s10 + $0x28] sm:$0xff] }
  0x7e   : > { %v1304_v21 = vadd.f32 %v1230_v13, %v1063_v7  ;;  %v1305_v25 = vadd.f32 %v1232_v15, %v1064_v8  ;;  %v1579_v17 = vmul.f32 %v2725_v44, %v3095_v48  ;;  %v1655_v12 = vmul.f32 %v2728_v45, %v3087_v31 }
  0x7f   : > { %v1471_v26 = vsel %vm861_vm4, %v1469_v9, %v1470_v18  ;;  %v1473_v23 = vsel %vm861_vm4, %v1470_v18, %v1472_v20  ;;  %v1656_v29 = vmul.f32 %v2728_v45, %v3095_v48  ;;  %v1657_v30 = vmul.f32 %v2728_v45, %v3102_v3 }
  0x80   : > { %v1545_v24 = vadd.f32 %v1471_v26, %v1304_v21  ;;  %v1546_v39 = vadd.f32 %v1473_v23, %v1305_v25  ;;  %v1775_v40 = vrot.slane %v1655_v12, 1  ;;  %v1896_v41 = vmul.f32 %v2763_v62, %v3087_v31 }
  0x81   : > { %v1776_v53 = vrot.slane %v1656_v29, 1  ;;  %v1778_v54 = vrot.slane %v1657_v30, 1  ;;  %v1897_v56 = vmul.f32 %v2763_v62, %v3095_v48  ;;  %v1898_v34 = vmul.f32 %v2763_v62, %v3102_v3 }
  0x82   : > { %v1610_v49 = vadd.f32 %v1578_v11, %v1545_v24  ;;  %v1611_v61 = vadd.f32 %v1579_v17, %v1546_v39  ;;  %v2016_v0 = vrot.slane %v1896_v41, 2  ;;  %v316_v7 = vmax.f32 %v284_v38, 0.0 }
  0x83   : > { %v1777_v8 = vsel %vm619_vm3, %v1775_v40, %v1776_v53  ;;  %v1779_v9 = vsel %vm619_vm3, %v1776_v53, %v1778_v54  ;;  %v2017_v13 = vrot.slane %v1897_v56, 2  ;;  %v2019_v15 = vrot.slane %v1898_v34, 2 }
  0x84   : > { %v1851_v18 = vadd.f32 %v1777_v8, %v1610_v49  ;;  %v1852_v20 = vadd.f32 %v1779_v9, %v1611_v61  ;;  %v317_v21 = vmax.f32 %v285_v60, 0.0  ;;  %405 = vst.msk [vmem:[#allocation2 + $0x49] sm:$0xff] %vm344_vm1, %v316_v7  ;;  %v492_v25 = vmul.f32 %v2682_v10, %v2722_v42 }
  0x85   : > { %v2018_v12 = vsel %vm861_vm4, %v2016_v0, %v2017_v13  ;;  %v2020_v11 = vsel %vm861_vm4, %v2017_v13, %v2019_v15  ;;  %v493_v17 = vmul.f32 %v2682_v10, %v2732_v46  ;;  %v526_v26 = vmul.f32 %v2671_v5, %v2722_v42 }
  0x86   : > { %v2092_v23 = vadd.f32 %v2018_v12, %v1851_v18  ;;  %v2093_v29 = vadd.f32 %v2020_v11, %v1852_v20  ;;  %406 = vst.msk [vmem:[#allocation2 + $0x51] sm:$0xff] %vm344_vm1, %v317_v21  ;;  %v527_v30 = vmul.f32 %v2671_v5, %v2732_v46  ;;  %v528_v38 = vmul.f32 %v2671_v5, %v2734_v47 }
  0x87   : > { %v625_v24 = vrot.slane %v526_v26, 1  ;;  %v768_v39 = vmul.f32 %v2674_v6, %v2722_v42  ;;  %v769_v40 = vmul.f32 %v2674_v6, %v2732_v46  ;;  %v770_v41 = vmul.f32 %v2674_v6, %v2734_v47 }
  0x88   : > { %v2128_v53 = vmul.f32 %v2814_v43, %v2092_v23  ;;  %v2129_v54 = vmul.f32 %v2814_v43, %v2093_v29  ;;  %v626_v56 = vrot.slane %v527_v30, 1  ;;  %v628_v34 = vrot.slane %v528_v38, 1 }
  0x89   : > { %v867_v60 = vrot.slane %v768_v39, 2  ;;  %v868_v49 = vrot.slane %v769_v40, 2  ;;  %v870_v61 = vrot.slane %v770_v41, 2  ;;  %v1009_v0 = vmul.f32 %v2704_v33, %v2744_v52 }
  0x8a   : > { %v2164_v42 = vadd.f32 %v2823_v50, %v2128_v53  ;;  %v2165_v7 = vadd.f32 %v2823_v50, %v2129_v54  ;;  %v627_v46 = vsel %vm619_vm3, %v625_v24, %v626_v56  ;;  %v629_v47 = vsel %vm619_vm3, %v626_v56, %v628_v34 }
  0x8b   : > { %v734_v8 = vadd.f32 %v627_v46, %v492_v25  ;;  %v735_v9 = vadd.f32 %v629_v47, %v493_v17  ;;  %v869_v13 = vsel %vm861_vm4, %v867_v60, %v868_v49  ;;  %v871_v15 = vsel %vm861_vm4, %v868_v49, %v870_v61  ;;  %v3164_v11 = vld [vmem:[#allocation2 + $0x48] sm:$0xff] }
  0x8c   : > { %v2184_v18 = vpack.c.bf16 %v2165_v7, %v2164_v42  ;;  %v1010_v20 = vmul.f32 %v2704_v33, %v2756_v57  ;;  %v1075_v21 = vmul.f32 %v2709_v36, %v2744_v52  ;;  %v1076_v12 = vmul.f32 %v2709_v36, %v2756_v57 }
  0x8d   : > { %v976_v26 = vadd.f32 %v869_v13, %v734_v8  ;;  %v977_v23 = vadd.f32 %v871_v15, %v735_v9  ;;  %v1077_v25 = vmul.f32 %v2709_v36, %v2767_v63  ;;  %v1316_v17 = vmul.f32 %v2712_v37, %v2744_v52  ;;  %v3171_v29 = vld [vmem:[#allocation2 + $0x50] sm:$0xff]  ;;  %v3177_v56 = vld [vmem:[#allocation2 + $0x58] sm:$0x3]  ;;  %v292_v8 = vld [vmem:[%s2666_s10 + $0x60] sm:$0xff] }
  0x8e   : > { %2512 = vmatmul.msk.bf16.vlgmr.msra.gmra.mxu3 %vm344_vm1, %v2184_v18  ;;  %v1173_v30 = vrot.slane %v1075_v21, 1  ;;  %v1174_v38 = vrot.slane %v1076_v12, 1  ;;  %v1317_v24 = vmul.f32 %v2712_v37, %v2756_v57  ;;  %v1318_v39 = vmul.f32 %v2712_v37, %v2767_v63 }
  0x8f   : > { %v1041_v40 = vadd.f32 %v1009_v0, %v976_v26  ;;  %v1042_v41 = vadd.f32 %v1010_v20, %v977_v23  ;;  %v1176_v53 = vrot.slane %v1077_v25, 1  ;;  %v1414_v54 = vrot.slane %v1316_v17, 2  ;;  %v293_v23 = vld [vmem:[%s2666_s10 + $0x68] sm:$0xff] }
  0x90   : > { %v1175_v52 = vsel %vm619_vm3, %v1173_v30, %v1174_v38  ;;  %v1415_v34 = vrot.slane %v1317_v24, 2  ;;  %v1417_v60 = vrot.slane %v1318_v39, 2  ;;  %v1556_v49 = vmul.f32 %v2725_v44, %v3164_v11 }
  0x91   : > { %v1177_v61 = vsel %vm619_vm3, %v1174_v38, %v1176_v53  ;;  %v1282_v57 = vadd.f32 %v1175_v52, %v1041_v40  ;;  %v1557_v63 = vmul.f32 %v2725_v44, %v3171_v29  ;;  %v1622_v0 = vmul.f32 %v2728_v45, %v3164_v11 }
  0x92   : > { %v1283_v42 = vadd.f32 %v1177_v61, %v1042_v41  ;;  %v1416_v7 = vsel %vm861_vm4, %v1414_v54, %v1415_v34  ;;  %v1418_v46 = vsel %vm861_vm4, %v1415_v34, %v1417_v60  ;;  %v1623_v47 = vmul.f32 %v2728_v45, %v3171_v29 }
  0x93   : > { %v1523_v9 = vadd.f32 %v1416_v7, %v1282_v57  ;;  %v1624_v13 = vmul.f32 %v2728_v45, %v3177_v56  ;;  %v1720_v15 = vrot.slane %v1622_v0, 1  ;;  %v1863_v18 = vmul.f32 %v2763_v62, %v3164_v11 }
  0x94   : > { %v1524_v20 = vadd.f32 %v1418_v46, %v1283_v42  ;;  %v1721_v21 = vrot.slane %v1623_v47, 1  ;;  %v1864_v12 = vmul.f32 %v2763_v62, %v3171_v29  ;;  %v1865_v26 = vmul.f32 %v2763_v62, %v3177_v56 }
  0x95   : > { %v1588_v25 = vadd.f32 %v1556_v49, %v1523_v9  ;;  %v1723_v17 = vrot.slane %v1624_v13, 1  ;;  %v1961_v30 = vrot.slane %v1863_v18, 2  ;;  %v324_v38 = vmax.f32 %v292_v8, 0.0 }
  0x96   : > { %v1589_v24 = vadd.f32 %v1557_v63, %v1524_v20  ;;  %v1722_v39 = vsel %vm619_vm3, %v1720_v15, %v1721_v21  ;;  %v1962_v40 = vrot.slane %v1864_v12, 2  ;;  %v1964_v41 = vrot.slane %v1865_v26, 2 }
  0x97   : > { %v1724_v53 = vsel %vm619_vm3, %v1721_v21, %v1723_v17  ;;  %v1829_v54 = vadd.f32 %v1722_v39, %v1588_v25  ;;  %v325_v52 = vmax.f32 %v293_v23, 0.0  ;;  %413 = vst.msk [vmem:[#allocation2 + $0xa9] sm:$0xff] %vm344_vm1, %v324_v38  ;;  %v500_v34 = vmul.f32 %v2682_v10, %v2920_v51 }
  0x98   : > { %v1830_v62 = vadd.f32 %v1724_v53, %v1589_v24  ;;  %v1963_v60 = vsel %vm861_vm4, %v1961_v30, %v1962_v40  ;;  %v1965_v49 = vsel %vm861_vm4, %v1962_v40, %v1964_v41  ;;  %v501_v61 = vmul.f32 %v2682_v10, %v2927_v58 }
  0x99   : > { %v2070_v57 = vadd.f32 %v1963_v60, %v1829_v54  ;;  %414 = vst.msk [vmem:[#allocation2 + $0xb1] sm:$0xff] %vm344_vm1, %v325_v52  ;;  %v538_v63 = vmul.f32 %v2671_v5, %v2920_v51  ;;  %v539_v0 = vmul.f32 %v2671_v5, %v2927_v58  ;;  %v540_v42 = vmul.f32 %v2671_v5, %v2929_v59 }
  0x9a   : > { %v2071_v7 = vadd.f32 %v1965_v49, %v1830_v62  ;;  %v780_v46 = vmul.f32 %v2674_v6, %v2920_v51  ;;  %v781_v47 = vmul.f32 %v2674_v6, %v2927_v58  ;;  %v782_v8 = vmul.f32 %v2674_v6, %v2929_v59 }
  0x9b   : > { %v2106_v9 = vmul.f32 %v2814_v43, %v2070_v57  ;;  %v645_v13 = vrot.slane %v538_v63, 1  ;;  %v646_v15 = vrot.slane %v539_v0, 1  ;;  %v648_v18 = vrot.slane %v540_v42, 1 }
  0x9c   : > { %v2107_v20 = vmul.f32 %v2814_v43, %v2071_v7  ;;  %v887_v21 = vrot.slane %v780_v46, 2  ;;  %v888_v12 = vrot.slane %v781_v47, 2  ;;  %v890_v26 = vrot.slane %v782_v8, 2 }
  0x9d   : > { %v2142_v23 = vadd.f32 %v2823_v50, %v2106_v9  ;;  %v647_v51 = vsel %vm619_vm3, %v645_v13, %v646_v15  ;;  %v649_v25 = vsel %vm619_vm3, %v646_v15, %v648_v18  ;;  %v1017_v58 = vmul.f32 %v2704_v33, %v2945_v14 }
  0x9e   : > { %v2143_v59 = vadd.f32 %v2823_v50, %v2107_v20  ;;  %v742_v17 = vadd.f32 %v647_v51, %v500_v34  ;;  %v743_v30 = vadd.f32 %v649_v25, %v501_v61  ;;  %v889_v38 = vsel %vm861_vm4, %v887_v21, %v888_v12  ;;  %v3239_v53 = vld [vmem:[#allocation2 + $0xa8] sm:$0xff] }
  0x9f   : > { %v891_v43 = vsel %vm861_vm4, %v888_v12, %v890_v26  ;;  %v1018_v24 = vmul.f32 %v2704_v33, %v2955_v22  ;;  %v1087_v39 = vmul.f32 %v2709_v36, %v2945_v14  ;;  %v1088_v40 = vmul.f32 %v2709_v36, %v2955_v22  ;;  %v3271_v51 = vld [vmem:[%s4088_s1 + $0x8] ss:$0 sm:$0xff] }
  0xa0   : > { %v2173_v41 = vpack.c.bf16 %v2143_v59, %v2142_v23  ;;  %v984_v54 = vadd.f32 %v889_v38, %v742_v17  ;;  %v985_v50 = vadd.f32 %v891_v43, %v743_v30  ;;  %v1089_v52 = vmul.f32 %v2709_v36, %v2962_v27  ;;  %v3243_v34 = vld [vmem:[#allocation2 + $0xb0] sm:$0xff]  ;;  %v3252_v7 = vld [vmem:[#allocation2 + $0xb8] sm:$0x3]  ;;  %v301_v43 = vld [vmem:[%s2666_s10 + $0xa8] sm:$0xff] }
  0xa1   : > { %v1193_v62 = vrot.slane %v1087_v39, 1  ;;  %v1194_v60 = vrot.slane %v1088_v40, 1  ;;  %v1328_v49 = vmul.f32 %v2712_v37, %v2945_v14  ;;  %v1329_v61 = vmul.f32 %v2712_v37, %v2955_v22 }
  0xa2   : > { %2501 = vmatmul.msk.bf16.gmra.mxu0 %vm344_vm1, %v2173_v41  ;;  %v1049_v57 = vadd.f32 %v1017_v58, %v984_v54  ;;  %v1050_v63 = vadd.f32 %v1018_v24, %v985_v50  ;;  %v1196_v0 = vrot.slane %v1089_v52, 1  ;;  %v1330_v42 = vmul.f32 %v2712_v37, %v2962_v27  ;;  %v300_v58 = vld [vmem:[%s2666_s10 + $0xa0] sm:$0xff] }
  0xa3   : > { %v1195_v46 = vsel %vm619_vm3, %v1193_v62, %v1194_v60  ;;  %v1434_v47 = vrot.slane %v1328_v49, 2  ;;  %v1435_v8 = vrot.slane %v1329_v61, 2  ;;  %v1564_v14 = vmul.f32 %v2725_v44, %v3239_v53 }
  0xa4   : > { %v1197_v22 = vsel %vm619_vm3, %v1194_v60, %v1196_v0  ;;  %v1290_v9 = vadd.f32 %v1195_v46, %v1049_v57  ;;  %v1437_v13 = vrot.slane %v1330_v42, 2  ;;  %v1565_v15 = vmul.f32 %v2725_v44, %v3243_v34 }
  0xa5   : > { %v1291_v18 = vadd.f32 %v1197_v22, %v1050_v63  ;;  %v1436_v27 = vsel %vm861_vm4, %v1434_v47, %v1435_v8  ;;  %v1634_v20 = vmul.f32 %v2728_v45, %v3239_v53  ;;  %v1635_v21 = vmul.f32 %v2728_v45, %v3243_v34 }
  0xa6   : > { %v1438_v12 = vsel %vm861_vm4, %v1435_v8, %v1437_v13  ;;  %v1531_v26 = vadd.f32 %v1436_v27, %v1290_v9  ;;  %v1636_v23 = vmul.f32 %v2728_v45, %v3252_v7  ;;  %v1875_v25 = vmul.f32 %v3271_v51, %v3239_v53  ;;  %v3304_v27 = vld [vmem:[%s4089_s2] ss:$0 sm:$0xff] }
  0xa7   : > { %v1532_v59 = vadd.f32 %v1438_v12, %v1291_v18  ;;  %v1740_v17 = vrot.slane %v1634_v20, 1  ;;  %v1741_v30 = vrot.slane %v1635_v21, 1  ;;  %v1876_v38 = vmul.f32 %v3271_v51, %v3243_v34 }
  0xa8   : > { %v1596_v24 = vadd.f32 %v1564_v14, %v1531_v26  ;;  %v1743_v39 = vrot.slane %v1636_v23, 1  ;;  %v1877_v40 = vmul.f32 %v3271_v51, %v3252_v7  ;;  %v1981_v41 = vrot.slane %v1875_v25, 2 }
  0xa9   : > { %v1597_v54 = vadd.f32 %v1565_v15, %v1532_v59  ;;  %v1742_v50 = vsel %vm619_vm3, %v1740_v17, %v1741_v30  ;;  %v1982_v52 = vrot.slane %v1876_v38, 2  ;;  %v332_v62 = vmax.f32 %v300_v58, 0.0 }
  0xaa   : > { %v1744_v60 = vsel %vm619_vm3, %v1741_v30, %v1743_v39  ;;  %v1837_v49 = vadd.f32 %v1742_v50, %v1596_v24  ;;  %v1984_v61 = vrot.slane %v1877_v40, 2  ;;  %v333_v57 = vmax.f32 %v301_v43, 0.0 }
  0xab   : > { %v1838_v63 = vadd.f32 %v1744_v60, %v1597_v54  ;;  %v1983_v0 = vsel %vm861_vm4, %v1981_v41, %v1982_v52  ;;  %421 = vst.msk [vmem:[#allocation2 + $0x109] sm:$0xff] %vm344_vm1, %v332_v62  ;;  %v508_v42 = vmul.f32 %v2682_v10, %v2993_v28  ;;  %v509_v46 = vmul.f32 %v2682_v10, %v3000_v35 }
  0xac   : > { %v1985_v47 = vsel %vm861_vm4, %v1982_v52, %v1984_v61  ;;  %v2078_v8 = vadd.f32 %v1983_v0, %v1837_v49  ;;  %422 = vst.msk [vmem:[#allocation2 + $0x111] sm:$0xff] %vm344_vm1, %v333_v57  ;;  %v550_v14 = vmul.f32 %v2671_v5, %v2993_v28  ;;  %v551_v22 = vmul.f32 %v2671_v5, %v3000_v35 }
  0xad   : > { %v2079_v9 = vadd.f32 %v1985_v47, %v1838_v63  ;;  %v552_v13 = vmul.f32 %v2671_v5, %v3008_v4  ;;  %v792_v15 = vmul.f32 %v2674_v6, %v2993_v28  ;;  %v793_v18 = vmul.f32 %v2674_v6, %v3000_v35  ;;  %v3313_v35 = vld [vmem:[%s4090_s3] ss:$0 sm:$0xff] }
  0xae   : > { %v2114_v20 = vmul.f32 %v3304_v27, %v2078_v8  ;;  %v665_v21 = vrot.slane %v550_v14, 1  ;;  %v666_v12 = vrot.slane %v551_v22, 1  ;;  %v794_v26 = vmul.f32 %v2674_v6, %v3008_v4 }
  0xaf   : > { %v2115_v23 = vmul.f32 %v3304_v27, %v2079_v9  ;;  %v668_v25 = vrot.slane %v552_v13, 1  ;;  %v907_v58 = vrot.slane %v792_v15, 2  ;;  %v908_v28 = vrot.slane %v793_v18, 2 }
  0xb0   : > { %v2150_v59 = vadd.f32 %v3313_v35, %v2114_v20  ;;  %v667_v17 = vsel %vm619_vm3, %v665_v21, %v666_v12  ;;  %v910_v30 = vrot.slane %v794_v26, 2  ;;  %v1025_v38 = vmul.f32 %v2704_v33, %v3018_v19 }
  0xb1   : > { %v2151_v4 = vadd.f32 %v3313_v35, %v2115_v23  ;;  %v669_v43 = vsel %vm619_vm3, %v666_v12, %v668_v25  ;;  %v750_v24 = vadd.f32 %v667_v17, %v508_v42  ;;  %v909_v39 = vsel %vm861_vm4, %v907_v58, %v908_v28 }
  0xb2   : > { %v751_v40 = vadd.f32 %v669_v43, %v509_v46  ;;  %v911_v41 = vsel %vm861_vm4, %v908_v28, %v910_v30  ;;  %v1026_v54 = vmul.f32 %v2704_v33, %v3020_v2  ;;  %v1099_v50 = vmul.f32 %v2709_v36, %v3018_v19  ;;  %v3327_v62 = vld [vmem:[#allocation2 + $0x108] sm:$0xff]  ;;  %v308_v30 = vld [vmem:[%s2666_s10 + $0xe0] sm:$0xff] }
  0xb3   : > { %v2177_v52 = vpack.c.bf16 %v2151_v4, %v2150_v59  ;;  %v992_v60 = vadd.f32 %v909_v39, %v750_v24  ;;  %v1100_v49 = vmul.f32 %v2709_v36, %v3020_v2  ;;  %v1101_v61 = vmul.f32 %v2709_v36, %v3030_v32  ;;  %v3333_v57 = vld [vmem:[#allocation2 + $0x110] sm:$0xff]  ;;  %v3342_v9 = vld [vmem:[#allocation2 + $0x118] sm:$0x3]  ;;  %v309_v39 = vld [vmem:[%s2666_s10 + $0xe8] sm:$0xff] }
  0xb4   : > { %v993_v63 = vadd.f32 %v911_v41, %v751_v40  ;;  %v1213_v0 = vrot.slane %v1099_v50, 1  ;;  %v1340_v42 = vmul.f32 %v2712_v37, %v3018_v19  ;;  %v1341_v46 = vmul.f32 %v2712_v37, %v3020_v2 }
  0xb5   : > { %2505 = vmatmul.msk.bf16.gmra.mxu1 %vm344_vm1, %v2177_v52  ;;  %v1057_v47 = vadd.f32 %v1025_v38, %v992_v60  ;;  %v1214_v8 = vrot.slane %v1100_v49, 1  ;;  %v1216_v14 = vrot.slane %v1101_v61, 1  ;;  %v1342_v22 = vmul.f32 %v2712_v37, %v3030_v32 }
  0xb6   : > { %v1058_v13 = vadd.f32 %v1026_v54, %v993_v63  ;;  %v1454_v15 = vrot.slane %v1340_v42, 2  ;;  %v1455_v18 = vrot.slane %v1341_v46, 2  ;;  %v1572_v19 = vmul.f32 %v2725_v44, %v3327_v62 }
  0xb7   : > { %v1215_v20 = vsel %vm619_vm3, %v1213_v0, %v1214_v8  ;;  %v1217_v2 = vsel %vm619_vm3, %v1214_v8, %v1216_v14  ;;  %v1457_v21 = vrot.slane %v1342_v22, 2  ;;  %v1573_v12 = vmul.f32 %v2725_v44, %v3333_v57 }
  0xb8   : > { %v1298_v26 = vadd.f32 %v1215_v20, %v1057_v47  ;;  %v1299_v32 = vadd.f32 %v1217_v2, %v1058_v13  ;;  %v1456_v23 = vsel %vm861_vm4, %v1454_v15, %v1455_v18  ;;  %v1646_v25 = vmul.f32 %v2728_v45, %v3327_v62 }
  0xb9   : > { %v1458_v58 = vsel %vm861_vm4, %v1455_v18, %v1457_v21  ;;  %v1647_v28 = vmul.f32 %v2728_v45, %v3333_v57  ;;  %v1648_v59 = vmul.f32 %v2728_v45, %v3342_v9  ;;  %v1887_v17 = vmul.f32 %v3271_v51, %v3327_v62 }
  0xba   : > { %v1539_v38 = vadd.f32 %v1456_v23, %v1298_v26  ;;  %v1540_v4 = vadd.f32 %v1458_v58, %v1299_v32  ;;  %v1760_v43 = vrot.slane %v1646_v25, 1  ;;  %v1888_v24 = vmul.f32 %v3271_v51, %v3333_v57 }
  0xbb   : > { %v1761_v40 = vrot.slane %v1647_v28, 1  ;;  %v1763_v41 = vrot.slane %v1648_v59, 1  ;;  %v1889_v54 = vmul.f32 %v3271_v51, %v3342_v9  ;;  %v2001_v50 = vrot.slane %v1887_v17, 2 }
  0xbc   : > { %v1604_v52 = vadd.f32 %v1572_v19, %v1539_v38  ;;  %v1605_v60 = vadd.f32 %v1573_v12, %v1540_v4  ;;  %v2002_v49 = vrot.slane %v1888_v24, 2  ;;  %v340_v61 = vmax.f32 %v308_v30, 0.0 }
  0xbd   : > { %v1762_v63 = vsel %vm619_vm3, %v1760_v43, %v1761_v40  ;;  %v1764_v0 = vsel %vm619_vm3, %v1761_v40, %v1763_v41  ;;  %v2004_v42 = vrot.slane %v1889_v54, 2  ;;  %v341_v46 = vmax.f32 %v309_v39, 0.0 }
  0xbe   : > { %v1845_v47 = vadd.f32 %v1762_v63, %v1604_v52  ;;  %v1846_v8 = vadd.f32 %v1764_v0, %v1605_v60  ;;  %v2003_v14 = vsel %vm861_vm4, %v2001_v50, %v2002_v49  ;;  %429 = vst.msk [vmem:[#allocation2 + $0x169] sm:$0xff] %vm344_vm1, %v340_v61  ;;  %v516_v22 = vmul.f32 %v2682_v10, %v3062_v55 }
  0xbf   : > { %v2005_v13 = vsel %vm861_vm4, %v2002_v49, %v2004_v42  ;;  %430 = vst.msk [vmem:[#allocation2 + $0x171] sm:$0xff] %vm344_vm1, %v341_v46  ;;  %v517_v15 = vmul.f32 %v2682_v10, %v3067_v1  ;;  %v562_v18 = vmul.f32 %v2671_v5, %v3062_v55  ;;  %v563_v19 = vmul.f32 %v2671_v5, %v3067_v1 }
  0xc0   : > { %v2086_v20 = vadd.f32 %v2003_v14, %v1845_v47  ;;  %v2087_v2 = vadd.f32 %v2005_v13, %v1846_v8  ;;  %v564_v21 = vmul.f32 %v2671_v5, %v3076_v16  ;;  %v804_v12 = vmul.f32 %v2674_v6, %v3062_v55 }
  0xc1   : > { %v685_v26 = vrot.slane %v562_v18, 1  ;;  %v686_v32 = vrot.slane %v563_v19, 1  ;;  %v805_v23 = vmul.f32 %v2674_v6, %v3067_v1  ;;  %v806_v25 = vmul.f32 %v2674_v6, %v3076_v16 }
  0xc2   : > { %v2122_v58 = vmul.f32 %v3304_v27, %v2086_v20  ;;  %v2123_v28 = vmul.f32 %v3304_v27, %v2087_v2  ;;  %v688_v59 = vrot.slane %v564_v21, 1  ;;  %v927_v17 = vrot.slane %v804_v12, 2 }
  0xc3   : > { %v687_v30 = vsel %vm619_vm3, %v685_v26, %v686_v32  ;;  %v928_v38 = vrot.slane %v805_v23, 2  ;;  %v930_v4 = vrot.slane %v806_v25, 2  ;;  %v1033_v55 = vmul.f32 %v2704_v33, %v3087_v31 }
  0xc4   : > { %v2158_v43 = vadd.f32 %v3313_v35, %v2122_v58  ;;  %v2159_v1 = vadd.f32 %v3313_v35, %v2123_v28  ;;  %v689_v24 = vsel %vm619_vm3, %v686_v32, %v688_v59  ;;  %v758_v16 = vadd.f32 %v687_v30, %v516_v22 }
  0xc5   : > { %v759_v39 = vadd.f32 %v689_v24, %v517_v15  ;;  %v929_v40 = vsel %vm861_vm4, %v927_v17, %v928_v38  ;;  %v931_v41 = vsel %vm861_vm4, %v928_v38, %v930_v4  ;;  %v1034_v54 = vmul.f32 %v2704_v33, %v3095_v48  ;;  %v3404_v61 = vld [vmem:[#allocation2 + $0x168] sm:$0xff] }
  0xc6   : > { %v2181_v50 = vpack.c.bf16 %v2159_v1, %v2158_v43  ;;  %v1000_v52 = vadd.f32 %v929_v40, %v758_v16  ;;  %v1111_v60 = vmul.f32 %v2709_v36, %v3087_v31  ;;  %v1112_v49 = vmul.f32 %v2709_v36, %v3095_v48  ;;  %v3406_v63 = vld [vmem:[#allocation2 + $0x170] sm:$0xff]  ;;  %v3417_v15 = vld [vmem:[#allocation2 + $0x178] sm:$0x3] }
  0xc7   : > { %v1001_v0 = vadd.f32 %v931_v41, %v759_v39  ;;  %v1113_v42 = vmul.f32 %v2709_v36, %v3102_v3  ;;  %v1352_v46 = vmul.f32 %v2712_v37, %v3087_v31  ;;  %v1353_v47 = vmul.f32 %v2712_v37, %v3095_v48  ;;  %v2540_v41 = vld [vmem:[#allocation2 + $0x30] sm:$0xff] }
  0xc8   : > { %2509 = vmatmul.msk.bf16.gmra.mxu2 %vm344_vm1, %v2181_v50  ;;  %v1065_v8 = vadd.f32 %v1033_v55, %v1000_v52  ;;  %v1233_v14 = vrot.slane %v1111_v60, 1  ;;  %v1234_v22 = vrot.slane %v1112_v49, 1  ;;  %v1354_v13 = vmul.f32 %v2712_v37, %v3102_v3 }
  0xc9   : > { %v1066_v18 = vadd.f32 %v1034_v54, %v1001_v0  ;;  %v1236_v19 = vrot.slane %v1113_v42, 1  ;;  %v1474_v20 = vrot.slane %v1352_v46, 2  ;;  %v1475_v2 = vrot.slane %v1353_v47, 2  ;;  %v2541_v46 = vld [vmem:[#allocation2 + $0x38] sm:$0xff] }
  0xca   : > { %v1235_v21 = vsel %vm619_vm3, %v1233_v14, %v1234_v22  ;;  %v1477_v31 = vrot.slane %v1354_v13, 2  ;;  %v1580_v48 = vmul.f32 %v2725_v44, %v3404_v61  ;;  %v1581_v12 = vmul.f32 %v2725_v44, %v3406_v63 }
  0xcb   : > { %v1237_v26 = vsel %vm619_vm3, %v1234_v22, %v1236_v19  ;;  %v1306_v32 = vadd.f32 %v1235_v21, %v1065_v8  ;;  %v1476_v3 = vsel %vm861_vm4, %v1474_v20, %v1475_v2  ;;  %v1658_v23 = vmul.f32 %v2728_v45, %v3404_v61 }
  0xcc   : > { %v1307_v25 = vadd.f32 %v1237_v26, %v1066_v18  ;;  %v1478_v58 = vsel %vm861_vm4, %v1475_v2, %v1477_v31  ;;  %v1659_v28 = vmul.f32 %v2728_v45, %v3406_v63  ;;  %v1660_v59 = vmul.f32 %v2728_v45, %v3417_v15  ;;  %v2542_v18 = vld [vmem:[#allocation2 + $0x40] sm:$0x3] }
  0xcd   : > { %v1547_v17 = vadd.f32 %v1476_v3, %v1306_v32  ;;  %v1780_v30 = vrot.slane %v1658_v23, 1  ;;  %v1899_v38 = vmul.f32 %v3271_v51, %v3404_v61  ;;  %v1900_v4 = vmul.f32 %v3271_v51, %v3406_v63 }
  0xce   : > { %v1548_v55 = vadd.f32 %v1478_v58, %v1307_v25  ;;  %v1781_v43 = vrot.slane %v1659_v28, 1  ;;  %v1783_v1 = vrot.slane %v1660_v59, 1  ;;  %v1901_v24 = vmul.f32 %v3271_v51, %v3417_v15 }
  0xcf   : > { %v1612_v16 = vadd.f32 %v1580_v48, %v1547_v17  ;;  %v2021_v39 = vrot.slane %v1899_v38, 2  ;;  %v2022_v40 = vrot.slane %v1900_v4, 2  ;;  %v494_v54 = vmul.f32 %v2540_v41, %v2682_v10 }
  0xd0   : > { %v1613_v50 = vadd.f32 %v1581_v12, %v1548_v55  ;;  %v1782_v52 = vsel %vm619_vm3, %v1780_v30, %v1781_v43  ;;  %v1784_v60 = vsel %vm619_vm3, %v1781_v43, %v1783_v1  ;;  %v2024_v49 = vrot.slane %v1901_v24, 2 }
  0xd1   : > { %v1853_v0 = vadd.f32 %v1782_v52, %v1612_v16  ;;  %v2023_v42 = vsel %vm861_vm4, %v2021_v39, %v2022_v40  ;;  %v495_v47 = vmul.f32 %v2541_v46, %v2682_v10  ;;  %v529_v8 = vmul.f32 %v2540_v41, %v2671_v5 }
  0xd2   : > { %v1854_v14 = vadd.f32 %v1784_v60, %v1613_v50  ;;  %v2025_v22 = vsel %vm861_vm4, %v2022_v40, %v2024_v49  ;;  %v530_v13 = vmul.f32 %v2541_v46, %v2671_v5  ;;  %v531_v19 = vmul.f32 %v2542_v18, %v2671_v5 }
  0xd3   : > { %v2094_v20 = vadd.f32 %v2023_v42, %v1853_v0  ;;  %v630_v2 = vrot.slane %v529_v8, 1  ;;  %v771_v21 = vmul.f32 %v2540_v41, %v2674_v6  ;;  %v772_v31 = vmul.f32 %v2541_v46, %v2674_v6 }
  0xd4   : > { %v2095_v48 = vadd.f32 %v2025_v22, %v1854_v14  ;;  %v631_v12 = vrot.slane %v530_v13, 1  ;;  %v633_v26 = vrot.slane %v531_v19, 1  ;;  %v773_v32 = vmul.f32 %v2542_v18, %v2674_v6  ;;  %v3476_v18 = vld [vmem:[#allocation2 + $0x60] sm:$0xff] }
  0xd5   : > { %v2130_v3 = vmul.f32 %v3304_v27, %v2094_v20  ;;  %v872_v23 = vrot.slane %v771_v21, 2  ;;  %v873_v25 = vrot.slane %v772_v31, 2  ;;  %v1011_v58 = vmul.f32 %v2704_v33, %v3164_v11  ;;  %v3482_v20 = vld [vmem:[#allocation2 + $0x68] sm:$0xff] }
  0xd6   : > { %v2131_v28 = vmul.f32 %v3304_v27, %v2095_v48  ;;  %v632_v59 = vsel %vm619_vm3, %v630_v2, %v631_v12  ;;  %v634_v17 = vsel %vm619_vm3, %v631_v12, %v633_v26  ;;  %v875_v30 = vrot.slane %v773_v32, 2  ;;  %v3491_v32 = vld [vmem:[#allocation2 + $0x70] sm:$0x3] }
  0xd7   : > { %v2166_v38 = vadd.f32 %v3313_v35, %v2130_v3  ;;  %v736_v4 = vadd.f32 %v632_v59, %v494_v54  ;;  %v737_v55 = vadd.f32 %v634_v17, %v495_v47  ;;  %v874_v43 = vsel %vm861_vm4, %v872_v23, %v873_v25 }
  0xd8   : > { %v2167_v1 = vadd.f32 %v3313_v35, %v2131_v28  ;;  %v876_v24 = vsel %vm861_vm4, %v873_v25, %v875_v30  ;;  %v1012_v16 = vmul.f32 %v2704_v33, %v3171_v29  ;;  %v1078_v39 = vmul.f32 %v2709_v36, %v3164_v11 }
  0xd9   : > { %v978_v40 = vadd.f32 %v874_v43, %v736_v4  ;;  %v979_v41 = vadd.f32 %v876_v24, %v737_v55  ;;  %v1079_v50 = vmul.f32 %v2709_v36, %v3171_v29  ;;  %v1080_v54 = vmul.f32 %v2709_v36, %v3177_v56 }
  0xda   : > { %v2185_v52 = vpack.c.bf16 %v2167_v1, %v2166_v38  ;;  %v1178_v60 = vrot.slane %v1078_v39, 1  ;;  %v1319_v49 = vmul.f32 %v2712_v37, %v3164_v11  ;;  %v1320_v0 = vmul.f32 %v2712_v37, %v3171_v29 }
  0xdb   : > { %v1043_v42 = vadd.f32 %v1011_v58, %v978_v40  ;;  %v1044_v46 = vadd.f32 %v1012_v16, %v979_v41  ;;  %v1179_v47 = vrot.slane %v1079_v50, 1  ;;  %v1181_v8 = vrot.slane %v1080_v54, 1  ;;  %v2546_v16 = vld [vmem:[#allocation2 + $0x90] sm:$0xff]  ;;  %v2547_v54 = vld [vmem:[#allocation2 + $0x98] sm:$0xff] }
  0xdc   : > { %2513 = vmatmul.msk.bf16.gmra.mxu3 %vm344_vm1, %v2185_v52  ;;  %v1321_v14 = vmul.f32 %v2712_v37, %v3177_v56  ;;  %v1419_v22 = vrot.slane %v1319_v49, 2  ;;  %v1420_v13 = vrot.slane %v1320_v0, 2  ;;  %v1558_v19 = vmul.f32 %v3476_v18, %v2725_v44 }
  0xdd   : > { %v1180_v11 = vsel %vm619_vm3, %v1178_v60, %v1179_v47  ;;  %v1182_v29 = vsel %vm619_vm3, %v1179_v47, %v1181_v8  ;;  %v1559_v2 = vmul.f32 %v3482_v20, %v2725_v44  ;;  %v1625_v21 = vmul.f32 %v3476_v18, %v2728_v45  ;;  %v2548_v8 = vld [vmem:[#allocation2 + $0xa0] sm:$0x3] }
  0xde   : > { %v1284_v56 = vadd.f32 %v1180_v11, %v1043_v42  ;;  %v1285_v31 = vadd.f32 %v1182_v29, %v1044_v46  ;;  %v1421_v48 = vsel %vm861_vm4, %v1419_v22, %v1420_v13  ;;  %v1422_v12 = vrot.slane %v1321_v14, 2 }
  0xdf   : > { %v1626_v26 = vmul.f32 %v3482_v20, %v2728_v45  ;;  %v1627_v3 = vmul.f32 %v3491_v32, %v2728_v45  ;;  %v1725_v23 = vrot.slane %v1625_v21, 1  ;;  %v1866_v25 = vmul.f32 %v3476_v18, %v3271_v51 }
  0xe0   : > { %v1423_v58 = vsel %vm861_vm4, %v1420_v13, %v1422_v12  ;;  %v1525_v28 = vadd.f32 %v1421_v48, %v1284_v56  ;;  %v1867_v59 = vmul.f32 %v3482_v20, %v3271_v51  ;;  %v1868_v17 = vmul.f32 %v3491_v32, %v3271_v51 }
  0xe1   : > { %v1526_v30 = vadd.f32 %v1423_v58, %v1285_v31  ;;  %v1726_v38 = vrot.slane %v1626_v26, 1  ;;  %v1728_v4 = vrot.slane %v1627_v3, 1  ;;  %v1966_v55 = vrot.slane %v1866_v25, 2 }
  0xe2   : > { %v1590_v43 = vadd.f32 %v1558_v19, %v1525_v28  ;;  %v1967_v1 = vrot.slane %v1867_v59, 2  ;;  %v1969_v24 = vrot.slane %v1868_v17, 2  ;;  %v502_v39 = vmul.f32 %v2546_v16, %v2682_v10 }
  0xe3   : > { %v1591_v40 = vadd.f32 %v1559_v2, %v1526_v30  ;;  %v1727_v41 = vsel %vm619_vm3, %v1725_v23, %v1726_v38  ;;  %v1729_v50 = vsel %vm619_vm3, %v1726_v38, %v1728_v4  ;;  %v503_v52 = vmul.f32 %v2547_v54, %v2682_v10 }
  0xe4   : > { %v1831_v60 = vadd.f32 %v1727_v41, %v1590_v43  ;;  %v1968_v49 = vsel %vm861_vm4, %v1966_v55, %v1967_v1  ;;  %v1970_v0 = vsel %vm861_vm4, %v1967_v1, %v1969_v24  ;;  %v541_v42 = vmul.f32 %v2546_v16, %v2671_v5 }
  0xe5   : > { %v1832_v46 = vadd.f32 %v1729_v50, %v1591_v40  ;;  %v542_v47 = vmul.f32 %v2547_v54, %v2671_v5  ;;  %v543_v14 = vmul.f32 %v2548_v8, %v2671_v5  ;;  %v783_v22 = vmul.f32 %v2546_v16, %v2674_v6 }
  0xe6   : > { %v2072_v13 = vadd.f32 %v1968_v49, %v1831_v60  ;;  %v650_v19 = vrot.slane %v541_v42, 1  ;;  %v784_v11 = vmul.f32 %v2547_v54, %v2674_v6  ;;  %v785_v29 = vmul.f32 %v2548_v8, %v2674_v6 }
  0xe7   : > { %v2073_v2 = vadd.f32 %v1970_v0, %v1832_v46  ;;  %v651_v21 = vrot.slane %v542_v47, 1  ;;  %v653_v56 = vrot.slane %v543_v14, 1  ;;  %v892_v31 = vrot.slane %v783_v22, 2  ;;  %v3540_v14 = vld [vmem:[#allocation2 + $0xc0] sm:$0xff] }
  0xe8   : > { %v2108_v48 = vmul.f32 %v3304_v27, %v2072_v13  ;;  %v893_v12 = vrot.slane %v784_v11, 2  ;;  %v895_v26 = vrot.slane %v785_v29, 2  ;;  %v1019_v3 = vmul.f32 %v2704_v33, %v3239_v53 }
  0xe9   : > { %v2109_v23 = vmul.f32 %v3304_v27, %v2073_v2  ;;  %v652_v25 = vsel %vm619_vm3, %v650_v19, %v651_v21  ;;  %v654_v58 = vsel %vm619_vm3, %v651_v21, %v653_v56  ;;  %v1020_v28 = vmul.f32 %v2704_v33, %v3243_v34  ;;  %v3545_v19 = vld [vmem:[#allocation2 + $0xc8] sm:$0xff] }
  0xea   : > { %v2144_v59 = vadd.f32 %v3313_v35, %v2108_v48  ;;  %v744_v17 = vadd.f32 %v652_v25, %v502_v39  ;;  %v745_v30 = vadd.f32 %v654_v58, %v503_v52  ;;  %v894_v38 = vsel %vm861_vm4, %v892_v31, %v893_v12  ;;  %v3555_v48 = vld [vmem:[#allocation2 + $0xd0] sm:$0x3] }
  0xeb   : > { %v2145_v4 = vadd.f32 %v3313_v35, %v2109_v23  ;;  %v896_v55 = vsel %vm861_vm4, %v893_v12, %v895_v26  ;;  %v1090_v43 = vmul.f32 %v2709_v36, %v3239_v53  ;;  %v1091_v1 = vmul.f32 %v2709_v36, %v3243_v34 }
  0xec   : > { %v986_v24 = vadd.f32 %v894_v38, %v744_v17  ;;  %v987_v16 = vadd.f32 %v896_v55, %v745_v30  ;;  %v1092_v40 = vmul.f32 %v2709_v36, %v3252_v7  ;;  %v1331_v39 = vmul.f32 %v2712_v37, %v3239_v53 }
  0xed   : > { %v2174_v41 = vpack.c.bf16 %v2145_v4, %v2144_v59  ;;  %v1198_v50 = vrot.slane %v1090_v43, 1  ;;  %v1199_v54 = vrot.slane %v1091_v1, 1  ;;  %v1332_v52 = vmul.f32 %v2712_v37, %v3243_v34  ;;  %v2552_v43 = vld [vmem:[#allocation2 + $0xf0] sm:$0xff] }
  0xee   : > { %v1051_v60 = vadd.f32 %v1019_v3, %v986_v24  ;;  %v1052_v49 = vadd.f32 %v1020_v28, %v987_v16  ;;  %v1201_v0 = vrot.slane %v1092_v40, 1  ;;  %v1333_v42 = vmul.f32 %v2712_v37, %v3252_v7 }
  0xef   : > { %2502 = vmatmul.msk.bf16.gmra.mxu0 %vm344_vm1, %v2174_v41  ;;  %v1200_v46 = vsel %vm619_vm3, %v1198_v50, %v1199_v54  ;;  %v1439_v47 = vrot.slane %v1331_v39, 2  ;;  %v1440_v8 = vrot.slane %v1332_v52, 2  ;;  %v1566_v53 = vmul.f32 %v3540_v14, %v2725_v44  ;;  %v2553_v39 = vld [vmem:[#allocation2 + $0xf8] sm:$0xff] }
  0xf0   : > { %v1202_v22 = vsel %vm619_vm3, %v1199_v54, %v1201_v0  ;;  %v1292_v34 = vadd.f32 %v1200_v46, %v1051_v60  ;;  %v1442_v13 = vrot.slane %v1333_v42, 2  ;;  %v1567_v7 = vmul.f32 %v3545_v19, %v2725_v44  ;;  %v2554_v42 = vld [vmem:[#allocation2 + $0x100] sm:$0x3] }
  0xf1   : > { %v1293_v11 = vadd.f32 %v1202_v22, %v1052_v49  ;;  %v1441_v29 = vsel %vm861_vm4, %v1439_v47, %v1440_v8  ;;  %v1637_v2 = vmul.f32 %v3540_v14, %v2728_v45  ;;  %v1638_v21 = vmul.f32 %v3545_v19, %v2728_v45 }
  0xf2   : > { %v1443_v56 = vsel %vm861_vm4, %v1440_v8, %v1442_v13  ;;  %v1533_v31 = vadd.f32 %v1441_v29, %v1292_v34  ;;  %v1639_v12 = vmul.f32 %v3555_v48, %v2728_v45  ;;  %v1878_v26 = vmul.f32 %v3540_v14, %v3271_v51 }
  0xf3   : > { %v1534_v3 = vadd.f32 %v1443_v56, %v1293_v11  ;;  %v1745_v23 = vrot.slane %v1637_v2, 1  ;;  %v1746_v25 = vrot.slane %v1638_v21, 1  ;;  %v1879_v58 = vmul.f32 %v3545_v19, %v3271_v51 }
  0xf4   : > { %v1598_v28 = vadd.f32 %v1566_v53, %v1533_v31  ;;  %v1748_v59 = vrot.slane %v1639_v12, 1  ;;  %v1880_v17 = vmul.f32 %v3555_v48, %v3271_v51  ;;  %v1986_v30 = vrot.slane %v1878_v26, 2 }
  0xf5   : > { %v1599_v38 = vadd.f32 %v1567_v7, %v1534_v3  ;;  %v1747_v4 = vsel %vm619_vm3, %v1745_v23, %v1746_v25  ;;  %v1987_v55 = vrot.slane %v1879_v58, 2  ;;  %v510_v1 = vmul.f32 %v2552_v43, %v2682_v10 }
  0xf6   : > { %v1749_v24 = vsel %vm619_vm3, %v1746_v25, %v1748_v59  ;;  %v1839_v16 = vadd.f32 %v1747_v4, %v1598_v28  ;;  %v1989_v40 = vrot.slane %v1880_v17, 2  ;;  %v511_v41 = vmul.f32 %v2553_v39, %v2682_v10 }
  0xf7   : > { %v1840_v50 = vadd.f32 %v1749_v24, %v1599_v38  ;;  %v1988_v54 = vsel %vm861_vm4, %v1986_v30, %v1987_v55  ;;  %v553_v52 = vmul.f32 %v2552_v43, %v2671_v5  ;;  %v554_v60 = vmul.f32 %v2553_v39, %v2671_v5 }
  0xf8   : > { %v1990_v49 = vsel %vm861_vm4, %v1987_v55, %v1989_v40  ;;  %v2080_v0 = vadd.f32 %v1988_v54, %v1839_v16  ;;  %v555_v46 = vmul.f32 %v2554_v42, %v2671_v5  ;;  %v795_v47 = vmul.f32 %v2552_v43, %v2674_v6 }
  0xf9   : > { %v2081_v8 = vadd.f32 %v1990_v49, %v1840_v50  ;;  %v670_v53 = vrot.slane %v553_v52, 1  ;;  %v671_v22 = vrot.slane %v554_v60, 1  ;;  %v796_v34 = vmul.f32 %v2553_v39, %v2674_v6 }
  0xfa   : > { %v2116_v13 = vmul.f32 %v3304_v27, %v2080_v0  ;;  %v673_v7 = vrot.slane %v555_v46, 1  ;;  %v797_v11 = vmul.f32 %v2554_v42, %v2674_v6  ;;  %v912_v29 = vrot.slane %v795_v47, 2  ;;  %v3603_v42 = vld [vmem:[#allocation2 + $0x120] sm:$0xff]  ;;  %v3607_v46 = vld [vmem:[#allocation2 + $0x128] sm:$0xff] }
  0xfb   : > { %v2117_v2 = vmul.f32 %v3304_v27, %v2081_v8  ;;  %v672_v21 = vsel %vm619_vm3, %v670_v53, %v671_v22  ;;  %v913_v56 = vrot.slane %v796_v34, 2  ;;  %v1027_v31 = vmul.f32 %v2704_v33, %v3327_v62 }
  0xfc   : > { %v2152_v12 = vadd.f32 %v3313_v35, %v2116_v13  ;;  %v674_v26 = vsel %vm619_vm3, %v671_v22, %v673_v7  ;;  %v752_v3 = vadd.f32 %v672_v21, %v510_v1  ;;  %v915_v23 = vrot.slane %v797_v11, 2  ;;  %v3617_v7 = vld [vmem:[#allocation2 + $0x130] sm:$0x3] }
  0xfd   : > { %v2153_v25 = vadd.f32 %v3313_v35, %v2117_v2  ;;  %v753_v58 = vadd.f32 %v674_v26, %v511_v41  ;;  %v914_v28 = vsel %vm861_vm4, %v912_v29, %v913_v56  ;;  %v1028_v59 = vmul.f32 %v2704_v33, %v3333_v57  ;;  %v310_v29 = vld [vmem:[%s2666_s10 + $0xf0] sm:$0xff] }
  0xfe   : > { %v916_v17 = vsel %vm861_vm4, %v913_v56, %v915_v23  ;;  %v994_v30 = vadd.f32 %v914_v28, %v752_v3  ;;  %v1102_v38 = vmul.f32 %v2709_v36, %v3327_v62  ;;  %v1103_v4 = vmul.f32 %v2709_v36, %v3333_v57 }
  0xff   : > { %v2178_v55 = vpack.c.bf16 %v2153_v25, %v2152_v12  ;;  %v995_v43 = vadd.f32 %v916_v17, %v753_v58  ;;  %v1104_v1 = vmul.f32 %v2709_v36, %v3342_v9  ;;  %v1343_v24 = vmul.f32 %v2712_v37, %v3327_v62  ;;  %v311_v25 = vld [vmem:[%s2666_s10 + $0xf8] sm:$0xff] }
 0x100   : > { %v1059_v16 = vadd.f32 %v1027_v31, %v994_v30  ;;  %v1218_v40 = vrot.slane %v1102_v38, 1  ;;  %v1219_v39 = vrot.slane %v1103_v4, 1  ;;  %v1344_v41 = vmul.f32 %v2712_v37, %v3333_v57 }
 0x101   : > { %2506 = vmatmul.msk.bf16.gmra.mxu1 %vm344_vm1, %v2178_v55  ;;  %v1060_v50 = vadd.f32 %v1028_v59, %v995_v43  ;;  %v1221_v54 = vrot.slane %v1104_v1, 1  ;;  %v1345_v52 = vmul.f32 %v2712_v37, %v3342_v9  ;;  %v1459_v60 = vrot.slane %v1343_v24, 2 }
 0x102   : > { %v1220_v49 = vsel %vm619_vm3, %v1218_v40, %v1219_v39  ;;  %v1460_v0 = vrot.slane %v1344_v41, 2  ;;  %v1574_v62 = vmul.f32 %v3603_v42, %v2725_v44  ;;  %v1575_v57 = vmul.f32 %v3607_v46, %v2725_v44 }
 0x103   : > { %v1222_v47 = vsel %vm619_vm3, %v1219_v39, %v1221_v54  ;;  %v1300_v8 = vadd.f32 %v1220_v49, %v1059_v16  ;;  %v1462_v53 = vrot.slane %v1345_v52, 2  ;;  %v1649_v9 = vmul.f32 %v3603_v42, %v2728_v45  ;;  %v2558_v16 = vld [vmem:[#allocation2 + $0x150] sm:$0xff] }
 0x104   : > { %v1301_v22 = vadd.f32 %v1222_v47, %v1060_v50  ;;  %v1461_v34 = vsel %vm861_vm4, %v1459_v60, %v1460_v0  ;;  %v1650_v13 = vmul.f32 %v3607_v46, %v2728_v45  ;;  %v1651_v11 = vmul.f32 %v3617_v7, %v2728_v45  ;;  %v2559_v50 = vld [vmem:[#allocation2 + $0x158] sm:$0xff] }
 0x105   : > { %v1463_v2 = vsel %vm861_vm4, %v1460_v0, %v1462_v53  ;;  %v1541_v21 = vadd.f32 %v1461_v34, %v1300_v8  ;;  %v1765_v56 = vrot.slane %v1649_v9, 1  ;;  %v1890_v31 = vmul.f32 %v3603_v42, %v3271_v51 }
 0x106   : > { %v1542_v12 = vadd.f32 %v1463_v2, %v1301_v22  ;;  %v1766_v26 = vrot.slane %v1650_v13, 1  ;;  %v1768_v3 = vrot.slane %v1651_v11, 1  ;;  %v1891_v23 = vmul.f32 %v3607_v46, %v3271_v51 }
 0x107   : > { %v1606_v58 = vadd.f32 %v1574_v62, %v1541_v21  ;;  %v1892_v28 = vmul.f32 %v3617_v7, %v3271_v51  ;;  %v2006_v59 = vrot.slane %v1890_v31, 2  ;;  %v342_v17 = vmax.f32 %v310_v29, 0.0  ;;  %v2560_v62 = vld [vmem:[#allocation2 + $0x160] sm:$0x3] }
 0x108   : > { %v1607_v30 = vadd.f32 %v1575_v57, %v1542_v12  ;;  %v1767_v38 = vsel %vm619_vm3, %v1765_v56, %v1766_v26  ;;  %v1769_v4 = vsel %vm619_vm3, %v1766_v26, %v1768_v3  ;;  %v2007_v55 = vrot.slane %v1891_v23, 2 }
 0x109   : > { %v1847_v43 = vadd.f32 %v1767_v38, %v1606_v58  ;;  %v2009_v1 = vrot.slane %v1892_v28, 2  ;;  %v343_v24 = vmax.f32 %v311_v25, 0.0  ;;  %431 = vst.msk [vmem:[#allocation2 + $0x181] sm:$0xff] %vm344_vm1, %v342_v17  ;;  %v518_v40 = vmul.f32 %v2558_v16, %v2682_v10 }
 0x10a   : > { %v1848_v39 = vadd.f32 %v1769_v4, %v1607_v30  ;;  %v2008_v41 = vsel %vm861_vm4, %v2006_v59, %v2007_v55  ;;  %v519_v54 = vmul.f32 %v2559_v50, %v2682_v10  ;;  %v565_v52 = vmul.f32 %v2558_v16, %v2671_v5 }
 0x10b   : > { %v2010_v60 = vsel %vm861_vm4, %v2007_v55, %v2009_v1  ;;  %v2088_v49 = vadd.f32 %v2008_v41, %v1847_v43  ;;  %432 = vst.msk [vmem:[#allocation2 + $0x189] sm:$0xff] %vm344_vm1, %v343_v24  ;;  %v566_v0 = vmul.f32 %v2559_v50, %v2671_v5  ;;  %v567_v57 = vmul.f32 %v2560_v62, %v2671_v5 }
 0x10c   : > { %v2089_v47 = vadd.f32 %v2010_v60, %v1848_v39  ;;  %v690_v8 = vrot.slane %v565_v52, 1  ;;  %v807_v53 = vmul.f32 %v2558_v16, %v2674_v6  ;;  %v808_v9 = vmul.f32 %v2559_v50, %v2674_v6 }
 0x10d   : > { %v2124_v22 = vmul.f32 %v3304_v27, %v2088_v49  ;;  %v691_v34 = vrot.slane %v566_v0, 1  ;;  %v693_v13 = vrot.slane %v567_v57, 1  ;;  %v809_v11 = vmul.f32 %v2560_v62, %v2674_v6 }
 0x10e   : > { %v2125_v29 = vmul.f32 %v3304_v27, %v2089_v47  ;;  %v932_v2 = vrot.slane %v807_v53, 2  ;;  %v933_v21 = vrot.slane %v808_v9, 2  ;;  %v1035_v56 = vmul.f32 %v2704_v33, %v3404_v61 }
 0x10f   : > { %v2160_v31 = vadd.f32 %v3313_v35, %v2124_v22  ;;  %v692_v12 = vsel %vm619_vm3, %v690_v8, %v691_v34  ;;  %v694_v26 = vsel %vm619_vm3, %v691_v34, %v693_v13  ;;  %v935_v3 = vrot.slane %v809_v11, 2 }
 0x110   : > { %v2161_v23 = vadd.f32 %v3313_v35, %v2125_v29  ;;  %v760_v25 = vadd.f32 %v692_v12, %v518_v40  ;;  %v761_v58 = vadd.f32 %v694_v26, %v519_v54  ;;  %v934_v28 = vsel %vm861_vm4, %v932_v2, %v933_v21  ;;  %v3660_v55 = vld [vmem:[#allocation2 + $0x180] sm:$0xff] }
 0x111   : > { %v936_v59 = vsel %vm861_vm4, %v933_v21, %v935_v3  ;;  %v1036_v17 = vmul.f32 %v2704_v33, %v3406_v63  ;;  %v1114_v30 = vmul.f32 %v2709_v36, %v3404_v61  ;;  %v1115_v38 = vmul.f32 %v2709_v36, %v3406_v63 }
 0x112   : > { %v2182_v4 = vpack.c.bf16 %v2161_v23, %v2160_v31  ;;  %v1002_v43 = vadd.f32 %v934_v28, %v760_v25  ;;  %v1003_v1 = vadd.f32 %v936_v59, %v761_v58  ;;  %v1116_v24 = vmul.f32 %v2709_v36, %v3417_v15  ;;  %v3664_v16 = vld [vmem:[#allocation2 + $0x188] sm:$0xff]  ;;  %v3673_v0 = vld [vmem:[#allocation2 + $0x190] sm:$0x3] }
 0x113   : > { %v1238_v40 = vrot.slane %v1114_v30, 1  ;;  %v1239_v39 = vrot.slane %v1115_v38, 1  ;;  %v1355_v41 = vmul.f32 %v2712_v37, %v3404_v61  ;;  %v1356_v50 = vmul.f32 %v2712_v37, %v3406_v63  ;;  %v2561_v30 = vld [vmem:[#allocation2 + $0x48] sm:$0xff] }
 0x114   : > { %2510 = vmatmul.msk.bf16.gmra.mxu2 %vm344_vm1, %v2182_v4  ;;  %v1067_v54 = vadd.f32 %v1035_v56, %v1002_v43  ;;  %v1068_v52 = vadd.f32 %v1036_v17, %v1003_v1  ;;  %v1241_v60 = vrot.slane %v1116_v24, 1  ;;  %v1357_v49 = vmul.f32 %v2712_v37, %v3417_v15  ;;  %v2562_v24 = vld [vmem:[#allocation2 + $0x50] sm:$0xff] }
 0x115   : > { %v1240_v62 = vsel %vm619_vm3, %v1238_v40, %v1239_v39  ;;  %v1479_v57 = vrot.slane %v1355_v41, 2  ;;  %v1480_v47 = vrot.slane %v1356_v50, 2  ;;  %v1582_v61 = vmul.f32 %v2725_v44, %v3660_v55 }
 0x116   : > { %v1242_v8 = vsel %vm619_vm3, %v1239_v39, %v1241_v60  ;;  %v1308_v63 = vadd.f32 %v1240_v62, %v1067_v54  ;;  %v1482_v53 = vrot.slane %v1357_v49, 2  ;;  %v1583_v9 = vmul.f32 %v2725_v44, %v3664_v16  ;;  %v2563_v60 = vld [vmem:[#allocation2 + $0x58] sm:$0x3] }
 0x117   : > { %v1309_v22 = vadd.f32 %v1242_v8, %v1068_v52  ;;  %v1481_v34 = vsel %vm861_vm4, %v1479_v57, %v1480_v47  ;;  %v1661_v15 = vmul.f32 %v2728_v45, %v3660_v55  ;;  %v1662_v13 = vmul.f32 %v2728_v45, %v3664_v16 }
 0x118   : > { %v1483_v11 = vsel %vm861_vm4, %v1480_v47, %v1482_v53  ;;  %v1549_v29 = vadd.f32 %v1481_v34, %v1308_v63  ;;  %v1663_v2 = vmul.f32 %v2728_v45, %v3673_v0  ;;  %v1902_v21 = vmul.f32 %v3271_v51, %v3660_v55 }
 0x119   : > { %v1550_v56 = vadd.f32 %v1483_v11, %v1309_v22  ;;  %v1785_v31 = vrot.slane %v1661_v15, 1  ;;  %v1786_v12 = vrot.slane %v1662_v13, 1  ;;  %v1903_v26 = vmul.f32 %v3271_v51, %v3664_v16 }
 0x11a   : > { %v1614_v3 = vadd.f32 %v1582_v61, %v1549_v29  ;;  %v1788_v23 = vrot.slane %v1663_v2, 1  ;;  %v1904_v25 = vmul.f32 %v3271_v51, %v3673_v0  ;;  %v2026_v58 = vrot.slane %v1902_v21, 2 }
 0x11b   : > { %v1615_v28 = vadd.f32 %v1583_v9, %v1550_v56  ;;  %v1787_v59 = vsel %vm619_vm3, %v1785_v31, %v1786_v12  ;;  %v2027_v17 = vrot.slane %v1903_v26, 2  ;;  %v496_v38 = vmul.f32 %v2561_v30, %v2682_v10 }
 0x11c   : > { %v1789_v4 = vsel %vm619_vm3, %v1786_v12, %v1788_v23  ;;  %v1855_v43 = vadd.f32 %v1787_v59, %v1614_v3  ;;  %v2029_v1 = vrot.slane %v1904_v25, 2  ;;  %v497_v40 = vmul.f32 %v2562_v24, %v2682_v10 }
 0x11d   : > { %v1856_v39 = vadd.f32 %v1789_v4, %v1615_v28  ;;  %v2028_v41 = vsel %vm861_vm4, %v2026_v58, %v2027_v17  ;;  %v532_v51 = vmul.f32 %v2561_v30, %v2671_v5  ;;  %v533_v50 = vmul.f32 %v2562_v24, %v2671_v5 }
 0x11e   : > { %v2030_v54 = vsel %vm861_vm4, %v2027_v17, %v2029_v1  ;;  %v2096_v52 = vadd.f32 %v2028_v41, %v1855_v43  ;;  %v534_v49 = vmul.f32 %v2563_v60, %v2671_v5  ;;  %v774_v62 = vmul.f32 %v2561_v30, %v2674_v6 }
 0x11f   : > { %v2097_v57 = vadd.f32 %v2030_v54, %v1856_v39  ;;  %v635_v47 = vrot.slane %v532_v51, 1  ;;  %v636_v61 = vrot.slane %v533_v50, 1  ;;  %v775_v8 = vmul.f32 %v2562_v24, %v2674_v6  ;;  %v2564_v50 = vld [vmem:[#allocation2 + $0x78] sm:$0xff]  ;;  %v2565_v54 = vld [vmem:[#allocation2 + $0x80] sm:$0xff] }
 0x120   : > { %v2132_v63 = vmul.f32 %v3304_v27, %v2096_v52  ;;  %v638_v53 = vrot.slane %v534_v49, 1  ;;  %v776_v9 = vmul.f32 %v2563_v60, %v2674_v6  ;;  %v877_v22 = vrot.slane %v774_v62, 2 }
 0x121   : > { %v2133_v34 = vmul.f32 %v3304_v27, %v2097_v57  ;;  %v637_v15 = vsel %vm619_vm3, %v635_v47, %v636_v61  ;;  %v878_v13 = vrot.slane %v775_v8, 2  ;;  %v1013_v11 = vmul.f32 %v3476_v18, %v2704_v33 }
 0x122   : > { %v2168_v29 = vadd.f32 %v3313_v35, %v2132_v63  ;;  %v639_v2 = vsel %vm619_vm3, %v636_v61, %v638_v53  ;;  %v738_v21 = vadd.f32 %v637_v15, %v496_v38  ;;  %v880_v56 = vrot.slane %v776_v9, 2  ;;  %v2566_v61 = vld [vmem:[#allocation2 + $0x88] sm:$0x3] }
 0x123   : > { %v2169_v31 = vadd.f32 %v3313_v35, %v2133_v34  ;;  %v739_v12 = vadd.f32 %v639_v2, %v497_v40  ;;  %v879_v26 = vsel %vm861_vm4, %v877_v22, %v878_v13  ;;  %v1014_v27 = vmul.f32 %v3482_v20, %v2704_v33  ;;  %v3744_v22 = vld [vmem:[%s4088_s1 + $0x8] ss:$0 sm:$0xff] }
 0x124   : > { %v881_v3 = vsel %vm861_vm4, %v878_v13, %v880_v56  ;;  %v980_v23 = vadd.f32 %v879_v26, %v738_v21  ;;  %v1081_v25 = vmul.f32 %v3476_v18, %v2709_v36  ;;  %v1082_v58 = vmul.f32 %v3482_v20, %v2709_v36 }
 0x125   : > { %v2186_v28 = vpack.c.bf16 %v2169_v31, %v2168_v29  ;;  %v981_v59 = vadd.f32 %v881_v3, %v739_v12  ;;  %v1083_v35 = vmul.f32 %v3491_v32, %v2709_v36  ;;  %v1322_v17 = vmul.f32 %v3476_v18, %v2712_v37  ;;  %v2568_v31 = vld [vmem:[#allocation2 + $0xa8] sm:$0xff] }
 0x126   : > { %v1045_v30 = vadd.f32 %v1013_v11, %v980_v23  ;;  %v1183_v38 = vrot.slane %v1081_v25, 1  ;;  %v1184_v4 = vrot.slane %v1082_v58, 1  ;;  %v1323_v43 = vmul.f32 %v3482_v20, %v2712_v37 }
 0x127   : > { %2514 = vmatmul.msk.bf16.gmra.mxu3 %vm344_vm1, %v2186_v28  ;;  %v1046_v1 = vadd.f32 %v1014_v27, %v981_v59  ;;  %v1186_v24 = vrot.slane %v1083_v35, 1  ;;  %v1324_v40 = vmul.f32 %v3491_v32, %v2712_v37  ;;  %v1424_v39 = vrot.slane %v1322_v17, 2  ;;  %v2569_v28 = vld [vmem:[#allocation2 + $0xb0] sm:$0xff] }
 0x128   : > { %v1185_v41 = vsel %vm619_vm3, %v1183_v38, %v1184_v4  ;;  %v1425_v51 = vrot.slane %v1323_v43, 2  ;;  %v1560_v18 = vmul.f32 %v2564_v50, %v2725_v44  ;;  %v1561_v52 = vmul.f32 %v2565_v54, %v2725_v44 }
 0x129   : > { %v1187_v60 = vsel %vm619_vm3, %v1184_v4, %v1186_v24  ;;  %v1286_v20 = vadd.f32 %v1185_v41, %v1045_v30  ;;  %v1427_v49 = vrot.slane %v1324_v40, 2  ;;  %v1628_v62 = vmul.f32 %v2564_v50, %v2728_v45  ;;  %v2570_v4 = vld [vmem:[#allocation2 + $0xb8] sm:$0x3] }
 0x12a   : > { %v1287_v57 = vadd.f32 %v1187_v60, %v1046_v1  ;;  %v1426_v47 = vsel %vm861_vm4, %v1424_v39, %v1425_v51  ;;  %v1629_v32 = vmul.f32 %v2565_v54, %v2728_v45  ;;  %v1630_v8 = vmul.f32 %v2566_v61, %v2728_v45 }
 0x12b   : > { %v1428_v63 = vsel %vm861_vm4, %v1425_v51, %v1427_v49  ;;  %v1527_v53 = vadd.f32 %v1426_v47, %v1286_v20  ;;  %v1730_v9 = vrot.slane %v1628_v62, 1  ;;  %v1869_v34 = vmul.f32 %v3744_v22, %v2564_v50 }
 0x12c   : > { %v1528_v15 = vadd.f32 %v1428_v63, %v1287_v57  ;;  %v1731_v13 = vrot.slane %v1629_v32, 1  ;;  %v1733_v11 = vrot.slane %v1630_v8, 1  ;;  %v1870_v29 = vmul.f32 %v3744_v22, %v2565_v54  ;;  %v3763_v54 = vld [vmem:[%s4089_s2] ss:$0 sm:$0xff] }
 0x12d   : > { %v1592_v2 = vadd.f32 %v1560_v18, %v1527_v53  ;;  %v1871_v21 = vmul.f32 %v3744_v22, %v2566_v61  ;;  %v1971_v56 = vrot.slane %v1869_v34, 2  ;;  %v504_v12 = vmul.f32 %v2568_v31, %v2682_v10  ;;  %v3775_v61 = vld [vmem:[%s4090_s3] ss:$0 sm:$0xff] }
 0x12e   : > { %v1593_v26 = vadd.f32 %v1561_v52, %v1528_v15  ;;  %v1732_v27 = vsel %vm619_vm3, %v1730_v9, %v1731_v13  ;;  %v1734_v3 = vsel %vm619_vm3, %v1731_v13, %v1733_v11  ;;  %v1972_v23 = vrot.slane %v1870_v29, 2 }
 0x12f   : > { %v1833_v25 = vadd.f32 %v1732_v27, %v1592_v2  ;;  %v1974_v58 = vrot.slane %v1871_v21, 2  ;;  %v505_v59 = vmul.f32 %v2569_v28, %v2682_v10  ;;  %v544_v35 = vmul.f32 %v2568_v31, %v2671_v5 }
 0x130   : > { %v1834_v17 = vadd.f32 %v1734_v3, %v1593_v26  ;;  %v1973_v30 = vsel %vm861_vm4, %v1971_v56, %v1972_v23  ;;  %v545_v38 = vmul.f32 %v2569_v28, %v2671_v5  ;;  %v546_v43 = vmul.f32 %v2570_v4, %v2671_v5 }
 0x131   : > { %v1975_v1 = vsel %vm861_vm4, %v1972_v23, %v1974_v58  ;;  %v2074_v24 = vadd.f32 %v1973_v30, %v1833_v25  ;;  %v655_v40 = vrot.slane %v544_v35, 1  ;;  %v786_v39 = vmul.f32 %v2568_v31, %v2674_v6 }
 0x132   : > { %v2075_v41 = vadd.f32 %v1975_v1, %v1834_v17  ;;  %v656_v51 = vrot.slane %v545_v38, 1  ;;  %v658_v50 = vrot.slane %v546_v43, 1  ;;  %v787_v18 = vmul.f32 %v2569_v28, %v2674_v6  ;;  %v2573_v17 = vld [vmem:[#allocation2 + $0xd8] sm:$0xff]  ;;  %v2574_v43 = vld [vmem:[#allocation2 + $0xe0] sm:$0xff] }
 0x133   : > { %v2110_v52 = vmul.f32 %v3763_v54, %v2074_v24  ;;  %v788_v60 = vmul.f32 %v2570_v4, %v2674_v6  ;;  %v897_v20 = vrot.slane %v786_v39, 2  ;;  %v1021_v49 = vmul.f32 %v3540_v14, %v2704_v33 }
 0x134   : > { %v2111_v62 = vmul.f32 %v3763_v54, %v2075_v41  ;;  %v657_v57 = vsel %vm619_vm3, %v655_v40, %v656_v51  ;;  %v659_v47 = vsel %vm619_vm3, %v656_v51, %v658_v50  ;;  %v898_v32 = vrot.slane %v787_v18, 2  ;;  %v2575_v51 = vld [vmem:[#allocation2 + $0xe8] sm:$0x3] }
 0x135   : > { %v2146_v8 = vadd.f32 %v3775_v61, %v2110_v52  ;;  %v746_v63 = vadd.f32 %v657_v57, %v504_v12  ;;  %v747_v53 = vadd.f32 %v659_v47, %v505_v59  ;;  %v900_v9 = vrot.slane %v788_v60, 2 }
 0x136   : > { %v2147_v34 = vadd.f32 %v3775_v61, %v2111_v62  ;;  %v899_v15 = vsel %vm861_vm4, %v897_v20, %v898_v32  ;;  %v1022_v13 = vmul.f32 %v3545_v19, %v2704_v33  ;;  %v1093_v11 = vmul.f32 %v3540_v14, %v2709_v36 }
 0x137   : > { %v901_v29 = vsel %vm861_vm4, %v898_v32, %v900_v9  ;;  %v988_v2 = vadd.f32 %v899_v15, %v746_v63  ;;  %v1094_v21 = vmul.f32 %v3545_v19, %v2709_v36  ;;  %v1095_v56 = vmul.f32 %v3555_v48, %v2709_v36  ;;  %v2576_v9 = vld [vmem:[#allocation2 + $0x108] sm:$0xff] }
 0x138   : > { %v2175_v31 = vpack.c.bf16 %v2147_v34, %v2146_v8  ;;  %v989_v12 = vadd.f32 %v901_v29, %v747_v53  ;;  %v1203_v26 = vrot.slane %v1093_v11, 1  ;;  %v1334_v27 = vmul.f32 %v3540_v14, %v2712_v37 }
 0x139   : > { %v1053_v3 = vadd.f32 %v1021_v49, %v988_v2  ;;  %v1204_v23 = vrot.slane %v1094_v21, 1  ;;  %v1206_v25 = vrot.slane %v1095_v56, 1  ;;  %v1335_v58 = vmul.f32 %v3545_v19, %v2712_v37  ;;  %v2577_v56 = vld [vmem:[#allocation2 + $0x110] sm:$0xff] }
 0x13a   : > { %2503 = vmatmul.msk.bf16.gmra.mxu0 %vm344_vm1, %v2175_v31  ;;  %v1054_v28 = vadd.f32 %v1022_v13, %v989_v12  ;;  %v1336_v59 = vmul.f32 %v3555_v48, %v2712_v37  ;;  %v1444_v35 = vrot.slane %v1334_v27, 2  ;;  %v1568_v30 = vmul.f32 %v2573_v17, %v2725_v44 }
 0x13b   : > { %v1205_v38 = vsel %vm619_vm3, %v1203_v26, %v1204_v23  ;;  %v1207_v14 = vsel %vm619_vm3, %v1204_v23, %v1206_v25  ;;  %v1445_v4 = vrot.slane %v1335_v58, 2  ;;  %v1569_v1 = vmul.f32 %v2574_v43, %v2725_v44  ;;  %v2578_v23 = vld [vmem:[#allocation2 + $0x118] sm:$0x3] }
 0x13c   : > { %v1294_v24 = vadd.f32 %v1205_v38, %v1053_v3  ;;  %v1295_v19 = vadd.f32 %v1207_v14, %v1054_v28  ;;  %v1447_v40 = vrot.slane %v1336_v59, 2  ;;  %v1640_v39 = vmul.f32 %v2573_v17, %v2728_v45 }
 0x13d   : > { %v1446_v41 = vsel %vm861_vm4, %v1444_v35, %v1445_v4  ;;  %v1641_v48 = vmul.f32 %v2574_v43, %v2728_v45  ;;  %v1642_v50 = vmul.f32 %v2575_v51, %v2728_v45  ;;  %v1881_v18 = vmul.f32 %v2573_v17, %v3744_v22 }
 0x13e   : > { %v1448_v52 = vsel %vm861_vm4, %v1445_v4, %v1447_v40  ;;  %v1535_v60 = vadd.f32 %v1446_v41, %v1294_v24  ;;  %v1750_v20 = vrot.slane %v1640_v39, 1  ;;  %v1882_v49 = vmul.f32 %v2574_v43, %v3744_v22 }
 0x13f   : > { %v1536_v62 = vadd.f32 %v1448_v52, %v1295_v19  ;;  %v1751_v57 = vrot.slane %v1641_v48, 1  ;;  %v1753_v47 = vrot.slane %v1642_v50, 1  ;;  %v1883_v32 = vmul.f32 %v2575_v51, %v3744_v22 }
 0x140   : > { %v1600_v8 = vadd.f32 %v1568_v30, %v1535_v60  ;;  %v1991_v63 = vrot.slane %v1881_v18, 2  ;;  %v1992_v53 = vrot.slane %v1882_v49, 2  ;;  %v512_v34 = vmul.f32 %v2576_v9, %v2682_v10 }
 0x141   : > { %v1601_v15 = vadd.f32 %v1569_v1, %v1536_v62  ;;  %v1752_v13 = vsel %vm619_vm3, %v1750_v20, %v1751_v57  ;;  %v1754_v11 = vsel %vm619_vm3, %v1751_v57, %v1753_v47  ;;  %v1994_v29 = vrot.slane %v1883_v32, 2 }
 0x142   : > { %v1841_v2 = vadd.f32 %v1752_v13, %v1600_v8  ;;  %v1993_v21 = vsel %vm861_vm4, %v1991_v63, %v1992_v53  ;;  %v513_v31 = vmul.f32 %v2577_v56, %v2682_v10  ;;  %v556_v12 = vmul.f32 %v2576_v9, %v2671_v5 }
 0x143   : > { %v1842_v26 = vadd.f32 %v1754_v11, %v1601_v15  ;;  %v1995_v27 = vsel %vm861_vm4, %v1992_v53, %v1994_v29  ;;  %v557_v3 = vmul.f32 %v2577_v56, %v2671_v5  ;;  %v558_v25 = vmul.f32 %v2578_v23, %v2671_v5 }
 0x144   : > { %v2082_v58 = vadd.f32 %v1993_v21, %v1841_v2  ;;  %v675_v28 = vrot.slane %v556_v12, 1  ;;  %v798_v59 = vmul.f32 %v2576_v9, %v2674_v6  ;;  %v799_v35 = vmul.f32 %v2577_v56, %v2674_v6  ;;  %v2579_v56 = vld [vmem:[#allocation2 + $0x138] sm:$0xff] }
 0x145   : > { %v2083_v17 = vadd.f32 %v1995_v27, %v1842_v26  ;;  %v676_v30 = vrot.slane %v557_v3, 1  ;;  %v678_v38 = vrot.slane %v558_v25, 1  ;;  %v800_v14 = vmul.f32 %v2578_v23, %v2674_v6  ;;  %v2580_v26 = vld [vmem:[#allocation2 + $0x140] sm:$0xff] }
 0x146   : > { %v2118_v4 = vmul.f32 %v3763_v54, %v2082_v58  ;;  %v917_v43 = vrot.slane %v798_v59, 2  ;;  %v918_v1 = vrot.slane %v799_v35, 2  ;;  %v1029_v24 = vmul.f32 %v3603_v42, %v2704_v33 }
 0x147   : > { %v2119_v19 = vmul.f32 %v3763_v54, %v2083_v17  ;;  %v677_v40 = vsel %vm619_vm3, %v675_v28, %v676_v30  ;;  %v679_v39 = vsel %vm619_vm3, %v676_v30, %v678_v38  ;;  %v920_v41 = vrot.slane %v800_v14, 2  ;;  %v2581_v28 = vld [vmem:[#allocation2 + $0x148] sm:$0x3] }
 0x148   : > { %v2154_v48 = vadd.f32 %v3775_v61, %v2118_v4  ;;  %v754_v51 = vadd.f32 %v677_v40, %v512_v34  ;;  %v755_v50 = vadd.f32 %v679_v39, %v513_v31  ;;  %v919_v18 = vsel %vm861_vm4, %v917_v43, %v918_v1  ;;  %v3857_v40 = vpop.f32.mrf.mxu0  ;;  %v3859_v39 = vpop.f32.mrf.mxu1 }
 0x149   : > { %v2155_v52 = vadd.f32 %v3775_v61, %v2119_v19  ;;  %v921_v60 = vsel %vm861_vm4, %v918_v1, %v920_v41  ;;  %v1030_v20 = vmul.f32 %v3607_v46, %v2704_v33  ;;  %v1105_v49 = vmul.f32 %v3603_v42, %v2709_v36 }
 0x14a   : > { %v996_v62 = vadd.f32 %v919_v18, %v754_v51  ;;  %v997_v57 = vadd.f32 %v921_v60, %v755_v50  ;;  %v1106_v47 = vmul.f32 %v3607_v46, %v2709_v36  ;;  %v1107_v32 = vmul.f32 %v3617_v7, %v2709_v36  ;;  %v2582_v50 = vld [vmem:[#allocation2 + $0x168] sm:$0xff]  ;;  %v3864_v60 = vpop.f32.mrf.mxu3 }
 0x14b   : > { %v2179_v8 = vpack.c.bf16 %v2155_v52, %v2154_v48  ;;  %v1223_v63 = vrot.slane %v1105_v49, 1  ;;  %v1346_v53 = vmul.f32 %v3603_v42, %v2712_v37  ;;  %v1347_v9 = vmul.f32 %v3607_v46, %v2712_v37  ;;  %v3862_v52 = vpop.f32.mrf.mxu2 }
 0x14c   : > { %v1061_v34 = vadd.f32 %v1029_v24, %v996_v62  ;;  %v1062_v15 = vadd.f32 %v1030_v20, %v997_v57  ;;  %v1224_v13 = vrot.slane %v1106_v47, 1  ;;  %v1226_v11 = vrot.slane %v1107_v32, 1  ;;  %v2583_v57 = vld [vmem:[#allocation2 + $0x170] sm:$0xff] }
 0x14d   : > { %2507 = vmatmul.msk.bf16.gmra.mxu1 %vm344_vm1, %v2179_v8  ;;  %v1348_v29 = vmul.f32 %v3617_v7, %v2712_v37  ;;  %v1464_v2 = vrot.slane %v1346_v53, 2  ;;  %v1465_v21 = vrot.slane %v1347_v9, 2  ;;  %v1576_v31 = vmul.f32 %v2579_v56, %v2725_v44 }
 0x14e   : > { %v1225_v12 = vsel %vm619_vm3, %v1223_v63, %v1224_v13  ;;  %v1227_v42 = vsel %vm619_vm3, %v1224_v13, %v1226_v11  ;;  %v1577_v46 = vmul.f32 %v2580_v26, %v2725_v44  ;;  %v1652_v27 = vmul.f32 %v2579_v56, %v2728_v45 }
 0x14f   : > { %v1302_v3 = vadd.f32 %v1225_v12, %v1061_v34  ;;  %v1303_v23 = vadd.f32 %v1227_v42, %v1062_v15  ;;  %v1466_v25 = vsel %vm861_vm4, %v1464_v2, %v1465_v21  ;;  %v1467_v58 = vrot.slane %v1348_v29, 2  ;;  %v2584_v15 = vld [vmem:[#allocation2 + $0x178] sm:$0x3] }
 0x150   : > { %v1653_v7 = vmul.f32 %v2580_v26, %v2728_v45  ;;  %v1654_v59 = vmul.f32 %v2581_v28, %v2728_v45  ;;  %v1770_v35 = vrot.slane %v1652_v27, 1  ;;  %v1893_v17 = vmul.f32 %v2579_v56, %v3744_v22 }
 0x151   : > { %v1468_v30 = vsel %vm861_vm4, %v1465_v21, %v1467_v58  ;;  %v1543_v38 = vadd.f32 %v1466_v25, %v1302_v3  ;;  %v1894_v14 = vmul.f32 %v2580_v26, %v3744_v22  ;;  %v1895_v4 = vmul.f32 %v2581_v28, %v3744_v22  ;;  %v3885_v58 = vpop.f32.mrf.mxu0 }
 0x152   : > { %v1544_v43 = vadd.f32 %v1468_v30, %v1303_v23  ;;  %v1771_v1 = vrot.slane %v1653_v7, 1  ;;  %v1773_v24 = vrot.slane %v1654_v59, 1  ;;  %v2011_v19 = vrot.slane %v1893_v17, 2  ;;  %v3887_v7 = vpop.f32.mrf.mxu1 }
 0x153   : > { %v1608_v41 = vadd.f32 %v1576_v31, %v1543_v38  ;;  %v2012_v48 = vrot.slane %v1894_v14, 2  ;;  %v2014_v51 = vrot.slane %v1895_v4, 2  ;;  %v520_v18 = vmul.f32 %v2582_v50, %v2682_v10  ;;  %v3891_v30 = vpop.f32.mrf.mxu2 }
 0x154   : > { %v1609_v20 = vadd.f32 %v1577_v46, %v1544_v43  ;;  %v1772_v49 = vsel %vm619_vm3, %v1770_v35, %v1771_v1  ;;  %v1774_v62 = vsel %vm619_vm3, %v1771_v1, %v1773_v24  ;;  %v521_v47 = vmul.f32 %v2583_v57, %v2682_v10  ;;  %v3899_v43 = vpop.f32.mrf.mxu3  ;;  %v484_v1 = vld [vmem:[#allocation2 + $0x198] sm:$0xff] }
 0x155   : > { %v1849_v32 = vadd.f32 %v1772_v49, %v1608_v41  ;;  %v2013_v8 = vsel %vm861_vm4, %v2011_v19, %v2012_v48  ;;  %v2015_v63 = vsel %vm861_vm4, %v2012_v48, %v2014_v51  ;;  %v568_v53 = vmul.f32 %v2582_v50, %v2671_v5 }
 0x156   : > { %v1850_v9 = vadd.f32 %v1774_v62, %v1609_v20  ;;  %v569_v34 = vmul.f32 %v2583_v57, %v2671_v5  ;;  %v570_v13 = vmul.f32 %v2584_v15, %v2671_v5  ;;  %v810_v11 = vmul.f32 %v2582_v50, %v2674_v6  ;;  %v485_v50 = vld [vmem:[#allocation2 + $0x1a0] sm:$0xff] }
 0x157   : > { %v2090_v29 = vadd.f32 %v2013_v8, %v1849_v32  ;;  %v695_v2 = vrot.slane %v568_v53, 1  ;;  %v811_v21 = vmul.f32 %v2583_v57, %v2674_v6  ;;  %v812_v10 = vmul.f32 %v2584_v15, %v2674_v6  ;;  %v486_v8 = vld [vmem:[#allocation2 + $0x1a8] sm:$0x3] }
 0x158   : > { %v2091_v56 = vadd.f32 %v2015_v63, %v1850_v9  ;;  %v696_v31 = vrot.slane %v569_v34, 1  ;;  %v698_v12 = vrot.slane %v570_v13, 1  ;;  %v937_v42 = vrot.slane %v810_v11, 2 }
 0x159   : > { %v2126_v26 = vmul.f32 %v3763_v54, %v2090_v29  ;;  %v938_v46 = vrot.slane %v811_v21, 2  ;;  %v940_v27 = vrot.slane %v812_v10, 2  ;;  %v1037_v3 = vmul.f32 %v2704_v33, %v3660_v55  ;;  %v3920_v29 = vld [vmem:[%s4092_s5] ss:$0 sm:$0xff] }
 0x15a   : > { %v2127_v5 = vmul.f32 %v3763_v54, %v2091_v56  ;;  %v697_v23 = vsel %vm619_vm3, %v695_v2, %v696_v31  ;;  %v699_v25 = vsel %vm619_vm3, %v696_v31, %v698_v12  ;;  %v1038_v6 = vmul.f32 %v2704_v33, %v3664_v16  ;;  %v2256_v2 = vpop.f32.mrf.mxu0  ;;  %v2276_v31 = vpop.f32.mrf.mxu1 }
 0x15b   : > { %v2162_v28 = vadd.f32 %v3775_v61, %v2126_v26  ;;  %v762_v59 = vadd.f32 %v697_v23, %v520_v18  ;;  %v763_v35 = vadd.f32 %v699_v25, %v521_v47  ;;  %v939_v17 = vsel %vm861_vm4, %v937_v42, %v938_v46 }
 0x15c   : > { %v2163_v38 = vadd.f32 %v3775_v61, %v2127_v5  ;;  %v941_v14 = vsel %vm861_vm4, %v938_v46, %v940_v27  ;;  %v1117_v4 = vmul.f32 %v2709_v36, %v3660_v55  ;;  %v1118_v33 = vmul.f32 %v2709_v36, %v3664_v16  ;;  %v3929_v27 = vld [vmem:[%s4093_s6] ss:$0 sm:$0xff] }
 0x15d   : > { %v1004_v24 = vadd.f32 %v939_v17, %v762_v59  ;;  %v1005_v19 = vadd.f32 %v941_v14, %v763_v35  ;;  %v1119_v41 = vmul.f32 %v2709_v36, %v3673_v0  ;;  %v1358_v48 = vmul.f32 %v2712_v37, %v3660_v55 }
 0x15e   : > { %v2183_v51 = vpack.c.bf16 %v2163_v38, %v2162_v28  ;;  %v1243_v18 = vrot.slane %v1117_v4, 1  ;;  %v1244_v20 = vrot.slane %v1118_v33, 1  ;;  %v1359_v49 = vmul.f32 %v2712_v37, %v3664_v16 }
 0x15f   : > { %v1069_v62 = vadd.f32 %v1037_v3, %v1004_v24  ;;  %v1070_v57 = vadd.f32 %v1038_v6, %v1005_v19  ;;  %v1246_v47 = vrot.slane %v1119_v41, 1  ;;  %v1360_v32 = vmul.f32 %v2712_v37, %v3673_v0  ;;  %v2316_v17 = vpop.f32.mrf.mxu3 }
 0x160   : > { %2511 = vmatmul.msk.bf16.gmra.mxu2 %vm344_vm1, %v2183_v51  ;;  %v1245_v36 = vsel %vm619_vm3, %v1243_v18, %v1244_v20  ;;  %v1484_v63 = vrot.slane %v1358_v48, 2  ;;  %v1485_v55 = vrot.slane %v1359_v49, 2  ;;  %v1584_v53 = vmul.f32 %v2725_v44, %v484_v1 }
 0x161   : > { %v1247_v9 = vsel %vm619_vm3, %v1244_v20, %v1246_v47  ;;  %v1310_v34 = vadd.f32 %v1245_v36, %v1069_v62  ;;  %v1487_v15 = vrot.slane %v1360_v32, 2  ;;  %v1585_v16 = vmul.f32 %v2725_v44, %v485_v50 }
 0x162   : > { %v1311_v13 = vadd.f32 %v1247_v9, %v1070_v57  ;;  %v1486_v11 = vsel %vm861_vm4, %v1484_v63, %v1485_v55  ;;  %v1664_v37 = vmul.f32 %v2728_v45, %v484_v1  ;;  %v1665_v0 = vmul.f32 %v2728_v45, %v485_v50  ;;  %v2258_v20 = vpop.f32.mrf.mxu0  ;;  %v2278_v63 = vpop.f32.mrf.mxu1 }
 0x163   : > { %v1488_v21 = vsel %vm861_vm4, %v1485_v55, %v1487_v15  ;;  %v1551_v10 = vadd.f32 %v1486_v11, %v1310_v34  ;;  %v1666_v56 = vmul.f32 %v2728_v45, %v486_v8  ;;  %v1905_v44 = vmul.f32 %v3744_v22, %v484_v1  ;;  %v2296_v45 = vpop.f32.mrf.mxu2 }
 0x164   : > { %v1552_v12 = vadd.f32 %v1488_v21, %v1311_v13  ;;  %v1790_v42 = vrot.slane %v1664_v37, 1  ;;  %v1791_v26 = vrot.slane %v1665_v0, 1  ;;  %v1906_v46 = vmul.f32 %v3744_v22, %v485_v50 }
 0x165   : > { %v1616_v3 = vadd.f32 %v1584_v53, %v1551_v10  ;;  %v1793_v5 = vrot.slane %v1666_v56, 1  ;;  %v1907_v23 = vmul.f32 %v3744_v22, %v486_v8  ;;  %v2031_v25 = vrot.slane %v1905_v44, 2 }
 0x166   : > { %v1617_v6 = vadd.f32 %v1585_v16, %v1552_v12  ;;  %v1792_v28 = vsel %vm619_vm3, %v1790_v42, %v1791_v26  ;;  %v2032_v59 = vrot.slane %v1906_v46, 2  ;;  %v2335_v35 = vmul.f32 %v3920_v29, %v3857_v40 }
 0x167   : > { %v1794_v38 = vsel %vm619_vm3, %v1791_v26, %v1793_v5  ;;  %v1857_v14 = vadd.f32 %v1792_v28, %v1616_v3  ;;  %v2034_v4 = vrot.slane %v1907_v23, 2  ;;  %v2343_v40 = vmul.f32 %v3920_v29, %v3859_v39  ;;  %v2318_v11 = vpop.f32.mrf.mxu3 }
 0x168   : > { %v1858_v22 = vadd.f32 %v1794_v38, %v1617_v6  ;;  %v2033_v33 = vsel %vm861_vm4, %v2031_v25, %v2032_v59  ;;  %v2371_v1 = vadd.f32 %v3929_v27, %v2335_v35  ;;  %v2336_v41 = vmul.f32 %v3920_v29, %v3885_v58 }
 0x169   : > { %v2035_v24 = vsel %vm861_vm4, %v2032_v59, %v2034_v4  ;;  %v2098_v19 = vadd.f32 %v2033_v33, %v1857_v14  ;;  %v2351_v48 = vmul.f32 %v3920_v29, %v3862_v52  ;;  %v2379_v50 = vadd.f32 %v3929_v27, %v2343_v40 }
 0x16a   : > { %v2099_v51 = vadd.f32 %v2035_v24, %v1858_v22  ;;  %2404 = vst.msk [vmem:[%s3941_s15] sm:$0xff] %vm2403_vm5, %v2371_v1  ;;  %v2359_v18 = vmul.f32 %v3920_v29, %v3864_v60  ;;  %v2344_v39 = vmul.f32 %v3920_v29, %v3887_v7  ;;  %v2372_v58 = vadd.f32 %v3929_v27, %v2336_v41 }
 0x16b   : > { %v2134_v49 = vmul.f32 %v3763_v54, %v2098_v19  ;;  %v2387_v52 = vadd.f32 %v3929_v27, %v2351_v48  ;;  %v2337_v62 = vmul.f32 %v3920_v29, %v2256_v2  ;;  %2412 = vst.msk [vmem:[%s3941_s15 + $0x40] sm:$0xff] %vm2403_vm5, %v2379_v50  ;;  %v2352_v7 = vmul.f32 %v3920_v29, %v3891_v30  ;;  %v2298_v15 = vpop.f32.mrf.mxu2 }
 0x16c   : > { %v2135_v57 = vmul.f32 %v3763_v54, %v2099_v51  ;;  %v2395_v60 = vadd.f32 %v3929_v27, %v2359_v18  ;;  %v2380_v47 = vadd.f32 %v3929_v27, %v2344_v39  ;;  %2405 = vst.msk [vmem:[%s3941_s15 + $0x8] sm:$0xff] %vm2403_vm5, %v2372_v58  ;;  %v2360_v54 = vmul.f32 %v3920_v29, %v3899_v43  ;;  %v2261_v2 = vpop.f32.mrf.mxu0 }
 0x16d   : > { %v2170_v32 = vadd.f32 %v3775_v61, %v2134_v49  ;;  %v2373_v8 = vadd.f32 %v3929_v27, %v2337_v62  ;;  %v2345_v36 = vmul.f32 %v3920_v29, %v2276_v31  ;;  %2420 = vst.msk [vmem:[%s3941_s15 + $0x80] sm:$0xff] %vm2403_vm5, %v2387_v52  ;;  %v2388_v30 = vadd.f32 %v3929_v27, %v2352_v7 }
 0x16e   : > { %v2171_v55 = vadd.f32 %v3775_v61, %v2135_v57  ;;  %v2338_v53 = vmul.f32 %v3920_v29, %v2258_v20  ;;  %v2353_v9 = vmul.f32 %v3920_v29, %v2296_v45  ;;  %2428 = vst.msk [vmem:[%s3941_s15 + $0xc0] sm:$0xff] %vm2403_vm5, %v2395_v60  ;;  %v2396_v43 = vadd.f32 %v3929_v27, %v2360_v54 }
 0x16f   : > { %v2361_v34 = vmul.f32 %v3920_v29, %v2316_v17  ;;  %2413 = vst.msk [vmem:[%s3941_s15 + $0x48] sm:$0xff] %vm2403_vm5, %v2380_v47  ;;  %v2381_v61 = vadd.f32 %v3929_v27, %v2345_v36  ;;  %v2346_v13 = vmul.f32 %v3920_v29, %v2278_v63  ;;  %v2354_v21 = vmul.f32 %v3920_v29, %v2298_v15 }
 0x170   : > { %v2187_v16 = vpack.c.bf16 %v2171_v55, %v2170_v32  ;;  %2406 = vst.msk [vmem:[%s3941_s15 + $0x10] sm:$0xff] %vm2403_vm5, %v2373_v8  ;;  %v2374_v37 = vadd.f32 %v3929_v27, %v2338_v53  ;;  %v2389_v0 = vadd.f32 %v3929_v27, %v2353_v9  ;;  %v2339_v56 = vmul.f32 %v3920_v29, %v2261_v2 }
 0x171   : > { %2421 = vst.msk [vmem:[%s3941_s15 + $0x88] sm:$0xff] %vm2403_vm5, %v2388_v30  ;;  %v2397_v10 = vadd.f32 %v3929_v27, %v2361_v34  ;;  %v2362_v44 = vmul.f32 %v3920_v29, %v2318_v11  ;;  %v2382_v31 = vadd.f32 %v3929_v27, %v2346_v13  ;;  %v2390_v42 = vadd.f32 %v3929_v27, %v2354_v21 }
 0x172   : > { %2515 = vmatmul.msk.bf16.gmra.mxu3 %vm344_vm1, %v2187_v16  ;;  %2429 = vst.msk [vmem:[%s3941_s15 + $0xc8] sm:$0xff] %vm2403_vm5, %v2396_v43  ;;  %v2375_v12 = vadd.f32 %v3929_v27, %v2339_v56 }
 0x173   : > { %2414 = vst.msk [vmem:[%s3941_s15 + $0x50] sm:$0xff] %vm2403_vm5, %v2381_v61  ;;  %v2398_v26 = vadd.f32 %v3929_v27, %v2362_v44 }
 0x174   : > { %2407 = vst.msk [vmem:[%s3941_s15 + $0x18] sm:$0xff] %vm2403_vm5, %v2374_v37  ;;  %v2263_v46 = vpop.f32.mrf.mxu0 }
 0x175   : > { %2422 = vst.msk [vmem:[%s3941_s15 + $0x90] sm:$0xff] %vm2403_vm5, %v2389_v0  ;;  %v2340_v3 = vmul.f32 %v3920_v29, %v2263_v46 }
 0x176   : > { %2430 = vst.msk [vmem:[%s3941_s15 + $0xd0] sm:$0xff] %vm2403_vm5, %v2397_v10 }
 0x177   : > { %2415 = vst.msk [vmem:[%s3941_s15 + $0x58] sm:$0xff] %vm2403_vm5, %v2382_v31  ;;  %v2376_v5 = vadd.f32 %v3929_v27, %v2340_v3 }
 0x178   : > { %2408 = vst.msk [vmem:[%s3941_s15 + $0x20] sm:$0xff] %vm2403_vm5, %v2375_v12 }
 0x179   : > { %2423 = vst.msk [vmem:[%s3941_s15 + $0x98] sm:$0xff] %vm2403_vm5, %v2390_v42 }
 0x17a   : > { %2431 = vst.msk [vmem:[%s3941_s15 + $0xd8] sm:$0xff] %vm2403_vm5, %v2398_v26 }
 0x17b   : > { %2409 = vst.msk [vmem:[%s3941_s15 + $0x28] sm:$0xff] %vm2403_vm5, %v2376_v5 }
 0x17e   : > { %v2281_v23 = vpop.f32.mrf.mxu1 }
 0x17f   : > { %v2347_v25 = vmul.f32 %v3920_v29, %v2281_v23 }
 0x181   : > { %v2383_v45 = vadd.f32 %v3929_v27, %v2347_v25 }
 0x183   : > { %2416 = vst.msk [vmem:[%s3941_s15 + $0x60] sm:$0xff] %vm2403_vm5, %v2383_v45 }
 0x186   : > { %v2283_v6 = vpop.f32.mrf.mxu1 }
 0x187   : > { %v2348_v28 = vmul.f32 %v3920_v29, %v2283_v6 }
 0x189   : > { %v2384_v59 = vadd.f32 %v3929_v27, %v2348_v28 }
 0x18b   : > { %2417 = vst.msk [vmem:[%s3941_s15 + $0x68] sm:$0xff] %vm2403_vm5, %v2384_v59 }
 0x197   : > { %v2301_v35 = vpop.f32.mrf.mxu2 }
 0x198   : > { %v2355_v17 = vmul.f32 %v3920_v29, %v2301_v35 }
 0x19a   : > { %v2391_v38 = vadd.f32 %v3929_v27, %v2355_v17 }
 0x19c   : > { %2424 = vst.msk [vmem:[%s3941_s15 + $0xa0] sm:$0xff] %vm2403_vm5, %v2391_v38 }
 0x19f   : > { %v2303_v14 = vpop.f32.mrf.mxu2 }
 0x1a0   : > { %v2356_v4 = vmul.f32 %v3920_v29, %v2303_v14 }
 0x1a2   : > { %v2392_v22 = vadd.f32 %v3929_v27, %v2356_v4 }
 0x1a4   : > { %2425 = vst.msk [vmem:[%s3941_s15 + $0xa8] sm:$0xff] %vm2403_vm5, %v2392_v22 }
 0x1aa   : > { %v2321_v33 = vpop.f32.mrf.mxu3 }
 0x1ab   : > { %v2363_v1 = vmul.f32 %v3920_v29, %v2321_v33 }
 0x1ad   : > { %v2399_v40 = vadd.f32 %v3929_v27, %v2363_v1 }
 0x1af   : > { %2432 = vst.msk [vmem:[%s3941_s15 + $0xe0] sm:$0xff] %vm2403_vm5, %v2399_v40 }
 0x1b2   : > { %v2323_v24 = vpop.f32.mrf.mxu3 }
 0x1b3   : > { %v2364_v19 = vmul.f32 %v3920_v29, %v2323_v24 }
 0x1b5   : > { %v2400_v41 = vadd.f32 %v3929_v27, %v2364_v19 }
 0x1b7   : > { %v2266_v48 = vpop.f32.mrf.mxu0  ;;  %2433 = vst.msk [vmem:[%s3941_s15 + $0xe8] sm:$0xff] %vm2403_vm5, %v2400_v41 }
 0x1b8   : > { %v2341_v51 = vmul.f32 %v3920_v29, %v2266_v48 }
 0x1ba   : > { %v2377_v50 = vadd.f32 %v3929_v27, %v2341_v51 }
 0x1bc   : > { %2410 = vst.msk [vmem:[%s3941_s15 + $0x30] sm:$0xff] %vm2403_vm5, %v2377_v50 }
 0x1bf   : > { %v2268_v18 = vpop.f32.mrf.mxu0 }
 0x1c0   : > { %v2342_v39 = vmul.f32 %v3920_v29, %v2268_v18 }
 0x1c2   : > { %v2378_v20 = vadd.f32 %v3929_v27, %v2342_v39 }
 0x1c4   : > { %2411 = vst.msk [vmem:[%s3941_s15 + $0x38] sm:$0xff] %vm2403_vm5, %v2378_v20 }
 0x1ca   : > { %v2286_v49 = vpop.f32.mrf.mxu1 }
 0x1cb   : > { %v2349_v58 = vmul.f32 %v3920_v29, %v2286_v49 }
 0x1cd   : > { %v2385_v52 = vadd.f32 %v3929_v27, %v2349_v58 }
 0x1cf   : > { %2418 = vst.msk [vmem:[%s3941_s15 + $0x70] sm:$0xff] %vm2403_vm5, %v2385_v52 }
 0x1d2   : > { %v2288_v62 = vpop.f32.mrf.mxu1 }
 0x1d3   : > { %v2350_v57 = vmul.f32 %v3920_v29, %v2288_v62 }
 0x1d5   : > { %v2386_v60 = vadd.f32 %v3929_v27, %v2350_v57 }
 0x1d7   : > { %2419 = vst.msk [vmem:[%s3941_s15 + $0x78] sm:$0xff] %vm2403_vm5, %v2386_v60 }
 0x1e3   : > { %v2306_v47 = vpop.f32.mrf.mxu2 }
 0x1e4   : > { %v2357_v7 = vmul.f32 %v3920_v29, %v2306_v47 }
 0x1e6   : > { %v2393_v32 = vadd.f32 %v3929_v27, %v2357_v7 }
 0x1e8   : > { %2426 = vst.msk [vmem:[%s3941_s15 + $0xb0] sm:$0xff] %vm2403_vm5, %v2393_v32 }
 0x1eb   : > { %v2308_v8 = vpop.f32.mrf.mxu2 }
 0x1ec   : > { %v2358_v54 = vmul.f32 %v3920_v29, %v2308_v8 }
 0x1ee   : > { %v2394_v36 = vadd.f32 %v3929_v27, %v2358_v54 }
 0x1f0   : > { %2427 = vst.msk [vmem:[%s3941_s15 + $0xb8] sm:$0xff] %vm2403_vm5, %v2394_v36 }
 0x1f5   : > { %v2326_v63 = vpop.f32.mrf.mxu3 }
 0x1f6   : > { %v2365_v55 = vmul.f32 %v3920_v29, %v2326_v63 }
 0x1f8   : > { %v2401_v30 = vadd.f32 %v3929_v27, %v2365_v55 }
 0x1fa   : > { %2434 = vst.msk [vmem:[%s3941_s15 + $0xf0] sm:$0xff] %vm2403_vm5, %v2401_v30 }
 0x1fd   : > { %v2328_v53 = vpop.f32.mrf.mxu3 }
 0x1fe   : > { %v2366_v9 = vmul.f32 %v3920_v29, %v2328_v53 }
 0x200   : > { %v2402_v43 = vadd.f32 %v3929_v27, %v2366_v9 }
 0x202   : > { %2435 = vst.msk [vmem:[%s3941_s15 + $0xf8] sm:$0xff] %vm2403_vm5, %v2402_v43 }
 0x203 PF: > { %s17_s24 = sadd.s32 1, %s2591_s24  }
 0x204   : > { %p14_p4 = scmp.ge.s32.totalorder %s17_s24, 4  }
 0x206   :  { %16 = sbr.rel (!%p14_p4) target bundleno = 1 (0x1), region = 79 }

// kernel: xception_block.5
= control target key start
LH: loop header
LB: loop body
LE: loop exit
PB: predicated region body
PF: predicated region fallthrough
CT: control target
= control target key end

     0   :  { %s2601_s24 = smov 0   ;;  %s4038_s0 = inlined_call_operand.vmem [shape: f32[2,16,16,8], index: 0, kind: input, shape index: {}]   ;;  %s4039_s1 = inlined_call_operand.vmem [shape: f32[9,8], index: 1, kind: input, shape index: {}]   ;;  %s4040_s2 = inlined_call_operand.vmem [shape: f32[1,8], index: 2, kind: input, shape index: {}]   ;;  %s4041_s3 = inlined_call_operand.vmem [shape: f32[1,8], index: 3, kind: input, shape index: {}]   ;;  %s4042_s4 = inlined_call_operand.vmem [shape: f32[8,8], index: 4, kind: input, shape index: {}]   ;;  %s4043_s5 = inlined_call_operand.vmem [shape: f32[1,8], index: 5, kind: input, shape index: {}]   ;;  %s4044_s6 = inlined_call_operand.vmem [shape: f32[1,8], index: 6, kind: input, shape index: {}]   ;;  %s4045_s7 = inlined_call_operand.vmem [shape: f32[2,16,16,8], index: 7, kind: output, shape index: {}]  }
   0x1 LB: > { %s2458_s25 = sadd.s32 4294967295, %s2558_s24   ;;  %p2462_p0 = scmp.ge.s32.totalorder %s2558_s24, 1  ;;  %s2558_s24 = sphi %s2601_s24, %s17_s24  }
   0x2   : > { %p237_p1 = scmp.lt.s32.totalorder %s2558_s24, 3 }
   0x4   : > { %p238_p2 = pnand %p2462_p0, %p237_p1 }
   0x5   : > { %p269_p3 = scmp.lt.s32.totalorder (!%p238_p2), %s2458_s25, 1 }
   0x6   : > { %241 = sbr.rel (%p238_p2) target bundleno = 513 (0x201), region = 48 }
   0xb   : > { %v2156_v0 = vld [vmem:[%s4042_s4] sm:$0xff]  ;;  %vm2206_vm0 = vcmask 1043456   ;;  %vm312_vm1 = vcmask 64512   ;;  %vm315_vm2 = vcmask 58368   ;;  %v2560_v2 = vmov 0.0   ;;  %s4047_s25 = smov (!%p269_p3, %s2458_s25), 1 }
   0xc   : > { %v2157_v1 = vpack.c.bf16 %v2156_v0, %v2156_v0  ;;  %313 = vst.msk [vmem:[#allocation2] sm:$0xff] %vm312_vm1, %v2560_v2  ;;  %v455_v3 = vld [vmem:[%s4039_s1] sm:$0xff]  ;;  %s2485_s30 = sshll.u32 %s4047_s25, 8  ;;  %vm587_vm3 = vcmask 1046528   ;;  %vm829_vm4 = vcmask 1045504  }
   0xd   : > { %314 = vst.msk [vmem:[#allocation2 + $0x8] sm:$0xff] %vm312_vm1, %v2560_v2  ;;  %v2628_v5 = vperm.slane %v455_v3, 1  ;;  %v2630_v6 = vperm.slane %v455_v3, 2  ;;  %s2637_s10 = scalar_lea.vmem %s4038_s0, %s2485_s30  ;;  %v2641_v7 = vperm.slane %v455_v3, 0  ;;  %v2665_v29 = vperm.slane %v455_v3, 3  ;;  %s3892_s15 = scalar_lea.vmem %s4045_s7, %s2485_s30 }
   0xe   : > { %v2208_v4 = vsel %vm2206_vm0, %v2157_v1, 0  ;;  %316 = vst.msk [vmem:[#allocation2 + $0x10] sm:$0x3] %vm315_vm2, %v2560_v2  ;;  %v280_v8 = vld [vmem:[%s2637_s10] sm:$0xff]  ;;  %v281_v9 = vld [vmem:[%s2637_s10 + $0x8] sm:$0xff]  ;;  %v282_v11 = vld [vmem:[%s2637_s10 + $0x10] sm:$0xff] }
   0xf   : > { %2217 = vmatpush.bf16.msra.mxu0 %v2208_v4  ;;  %2487 = vmatpush.bf16.msra.mxu1 %v2208_v4  ;;  %317 = vst.msk [vmem:[#allocation2 + $0x18] sm:$0xff] %vm312_vm1, %v2560_v2  ;;  %v283_v15 = vld [vmem:[%s2637_s10 + $0x18] sm:$0xff]  ;;  %v2669_v32 = vperm.slane %v455_v3, 4  ;;  %v2671_v33 = vperm.slane %v455_v3, 5  ;;  %v2683_v40 = vperm.slane %v455_v3, 6  ;;  %v2685_v41 = vperm.slane %v455_v3, 7 }
  0x10   : > { %2488 = vmatpush.bf16.msra.mxu2 %v2208_v4  ;;  %2489 = vmatpush.bf16.msra.mxu3 %v2208_v4  ;;  %318 = vst.msk [vmem:[#allocation2 + $0x20] sm:$0xff] %vm312_vm1, %v2560_v2  ;;  %v2720_v58 = vld [vmem:[%s4039_s1 + $0x8] ss:$0 sm:$0xff] }
  0x11   : > { %319 = vst.msk [vmem:[#allocation2 + $0x28] sm:$0x3] %vm315_vm2, %v2560_v2 }
  0x12   : > { %320 = vst.msk [vmem:[#allocation2 + $0x30] sm:$0xff] %vm312_vm1, %v2560_v2 }
  0x13   : > { %321 = vst.msk [vmem:[#allocation2 + $0x38] sm:$0xff] %vm312_vm1, %v2560_v2  ;;  %v401_v10 = vld [vmem:[#allocation2] sm:$0xff] }
  0x14   : > { %322 = vst.msk [vmem:[#allocation2 + $0x40] sm:$0x3] %vm315_vm2, %v2560_v2  ;;  %v402_v12 = vld [vmem:[#allocation2 + $0x8] sm:$0xff]  ;;  %v491_v13 = vmul.f32 %v2628_v5, %v401_v10  ;;  %v733_v14 = vmul.f32 %v2630_v6, %v401_v10  ;;  %v458_v17 = vmul.f32 %v2641_v7, %v401_v10 }
  0x15   : > { %369 = vst.msk [vmem:[#allocation2 + $0x19] sm:$0xff] %vm312_vm1, %v280_v8  ;;  %v403_v16 = vld [vmem:[#allocation2 + $0x10] sm:$0x3]  ;;  %v492_v18 = vmul.f32 %v2628_v5, %v402_v12  ;;  %v734_v19 = vmul.f32 %v2630_v6, %v402_v12  ;;  %v459_v24 = vmul.f32 %v2641_v7, %v402_v12 }
  0x16   : > { %370 = vst.msk [vmem:[#allocation2 + $0x21] sm:$0xff] %vm312_vm1, %v281_v9  ;;  %v493_v20 = vmul.f32 %v2628_v5, %v403_v16  ;;  %v588_v21 = vrot.slane %v491_v13, 1  ;;  %v735_v22 = vmul.f32 %v2630_v6, %v403_v16  ;;  %v830_v23 = vrot.slane %v733_v14, 2 }
  0x17   : > { %371 = vst.msk [vmem:[#allocation2 + $0x31] sm:$0xff] %vm312_vm1, %v282_v11  ;;  %v589_v25 = vrot.slane %v492_v18, 1  ;;  %v831_v26 = vrot.slane %v734_v19, 2 }
  0x18   : > { %372 = vst.msk [vmem:[#allocation2 + $0x39] sm:$0xff] %vm312_vm1, %v283_v15  ;;  %v591_v27 = vrot.slane %v493_v20, 1  ;;  %v833_v28 = vrot.slane %v735_v22, 2 }
  0x19   : > { %v590_v30 = vsel %vm587_vm3, %v588_v21, %v589_v25  ;;  %v832_v31 = vsel %vm829_vm4, %v830_v23, %v831_v26  ;;  %323 = vst.msk [vmem:[#allocation2 + $0x48] sm:$0xff] %vm312_vm1, %v2560_v2 }
  0x1a   : > { %v592_v34 = vsel %vm587_vm3, %v589_v25, %v591_v27  ;;  %v700_v35 = vadd.f32 %v590_v30, %v458_v17  ;;  %v834_v36 = vsel %vm829_vm4, %v831_v26, %v833_v28  ;;  %324 = vst.msk [vmem:[#allocation2 + $0x50] sm:$0xff] %vm312_vm1, %v2560_v2 }
  0x1b   : > { %v701_v37 = vadd.f32 %v592_v34, %v459_v24  ;;  %325 = vst.msk [vmem:[#allocation2 + $0x58] sm:$0x3] %vm315_vm2, %v2560_v2 }
  0x1c   : > { %v2681_v38 = vld [vmem:[#allocation2 + $0x18] sm:$0xff]  ;;  %v942_v39 = vadd.f32 %v832_v31, %v700_v35  ;;  %326 = vst.msk [vmem:[#allocation2 + $0x60] sm:$0xff] %vm312_vm1, %v2560_v2 }
  0x1d   : > { %v2689_v42 = vld [vmem:[#allocation2 + $0x20] sm:$0xff]  ;;  %v2691_v43 = vld [vmem:[#allocation2 + $0x28] sm:$0x3]  ;;  %v943_v44 = vadd.f32 %v834_v36, %v701_v37  ;;  %v975_v45 = vmul.f32 %v2665_v29, %v2681_v38  ;;  %v1040_v46 = vmul.f32 %v2669_v32, %v2681_v38  ;;  %v1281_v47 = vmul.f32 %v2671_v33, %v2681_v38  ;;  %327 = vst.msk [vmem:[#allocation2 + $0x68] sm:$0xff] %vm312_vm1, %v2560_v2 }
  0x1e   : > { %v2701_v48 = vld [vmem:[#allocation2 + $0x30] sm:$0xff]  ;;  %v976_v49 = vmul.f32 %v2665_v29, %v2689_v42  ;;  %v1041_v50 = vmul.f32 %v2669_v32, %v2689_v42  ;;  %v1042_v51 = vmul.f32 %v2669_v32, %v2691_v43  ;;  %v1282_v52 = vmul.f32 %v2671_v33, %v2689_v42  ;;  %328 = vst.msk [vmem:[#allocation2 + $0x70] sm:$0x3] %vm315_vm2, %v2560_v2 }
  0x1f   : > { %v2713_v53 = vld [vmem:[#allocation2 + $0x38] sm:$0xff]  ;;  %v1007_v54 = vadd.f32 %v975_v45, %v942_v39  ;;  %v1136_v55 = vrot.slane %v1040_v46, 1  ;;  %v1283_v56 = vmul.f32 %v2671_v33, %v2691_v43  ;;  %v1377_v57 = vrot.slane %v1281_v47, 2  ;;  %329 = vst.msk [vmem:[#allocation2 + $0x78] sm:$0xff] %vm312_vm1, %v2560_v2  ;;  %v2724_v59 = vld [vmem:[#allocation2 + $0x40] sm:$0x3] }
  0x20   : > { %v1008_v60 = vadd.f32 %v976_v49, %v943_v44  ;;  %v1137_v61 = vrot.slane %v1041_v50, 1  ;;  %v1139_v62 = vrot.slane %v1042_v51, 1  ;;  %v1378_v63 = vrot.slane %v1282_v52, 2  ;;  %330 = vst.msk [vmem:[#allocation2 + $0x80] sm:$0xff] %vm312_vm1, %v2560_v2  ;;  %v2771_v39 = vld [vmem:[%s4040_s2] ss:$0 sm:$0xff] }
  0x21   : > { %v1380_v0 = vrot.slane %v1283_v56, 2  ;;  %v1522_v1 = vmul.f32 %v2683_v40, %v2701_v48  ;;  %v1523_v3 = vmul.f32 %v2683_v40, %v2713_v53  ;;  %v1587_v4 = vmul.f32 %v2685_v41, %v2701_v48  ;;  %331 = vst.msk [vmem:[#allocation2 + $0x88] sm:$0x3] %vm315_vm2, %v2560_v2  ;;  %v2780_v46 = vld [vmem:[%s4041_s3] ss:$0 sm:$0xff] }
  0x22   : > { %v1138_v8 = vsel %vm587_vm3, %v1136_v55, %v1137_v61  ;;  %v1140_v9 = vsel %vm587_vm3, %v1137_v61, %v1139_v62  ;;  %v1379_v10 = vsel %vm829_vm4, %v1377_v57, %v1378_v63  ;;  %v1588_v11 = vmul.f32 %v2685_v41, %v2713_v53  ;;  %332 = vst.msk [vmem:[#allocation2 + $0x90] sm:$0xff] %vm312_vm1, %v2560_v2  ;;  %v287_v55 = vld [vmem:[%s2637_s10 + $0x38] sm:$0xff]  ;;  %v288_v56 = vld [vmem:[%s2637_s10 + $0x40] sm:$0xff]  ;;  %v289_v57 = vld [vmem:[%s2637_s10 + $0x48] sm:$0xff] }
  0x23   : > { %v1248_v12 = vadd.f32 %v1138_v8, %v1007_v54  ;;  %v1249_v13 = vadd.f32 %v1140_v9, %v1008_v60  ;;  %v1381_v14 = vsel %vm829_vm4, %v1378_v63, %v1380_v0  ;;  %v1589_v15 = vmul.f32 %v2685_v41, %v2724_v59  ;;  %333 = vst.msk [vmem:[#allocation2 + $0x98] sm:$0xff] %vm312_vm1, %v2560_v2  ;;  %v286_v54 = vld [vmem:[%s2637_s10 + $0x30] sm:$0xff]  ;;  %v291_v61 = vld [vmem:[%s2637_s10 + $0x58] sm:$0xff]  ;;  %v297_v0 = vld [vmem:[%s2637_s10 + $0x88] sm:$0xff] }
  0x24   : > { %v1683_v16 = vrot.slane %v1587_v4, 1  ;;  %v1684_v17 = vrot.slane %v1588_v11, 1  ;;  %v1828_v18 = vmul.f32 %v2720_v58, %v2701_v48  ;;  %v1829_v19 = vmul.f32 %v2720_v58, %v2713_v53  ;;  %334 = vst.msk [vmem:[#allocation2 + $0xa0] sm:$0x3] %vm315_vm2, %v2560_v2  ;;  %v290_v60 = vld [vmem:[%s2637_s10 + $0x50] sm:$0xff]  ;;  %v295_v63 = vld [vmem:[%s2637_s10 + $0x78] sm:$0xff] }
  0x25   : > { %v1489_v20 = vadd.f32 %v1379_v10, %v1248_v12  ;;  %v1490_v21 = vadd.f32 %v1381_v14, %v1249_v13  ;;  %v1686_v22 = vrot.slane %v1589_v15, 1  ;;  %v1830_v23 = vmul.f32 %v2720_v58, %v2724_v59  ;;  %335 = vst.msk [vmem:[#allocation2 + $0xa8] sm:$0xff] %vm312_vm1, %v2560_v2  ;;  %v294_v62 = vld [vmem:[%s2637_s10 + $0x70] sm:$0xff]  ;;  %v299_v12 = vld [vmem:[%s2637_s10 + $0x98] sm:$0xff] }
  0x26   : > { %v1685_v24 = vsel %vm587_vm3, %v1683_v16, %v1684_v17  ;;  %v1924_v25 = vrot.slane %v1828_v18, 2  ;;  %v1925_v26 = vrot.slane %v1829_v19, 2  ;;  %336 = vst.msk [vmem:[#allocation2 + $0xb0] sm:$0xff] %vm312_vm1, %v2560_v2  ;;  %v302_v18 = vld [vmem:[%s2637_s10 + $0xb0] sm:$0xff]  ;;  %v303_v19 = vld [vmem:[%s2637_s10 + $0xb8] sm:$0xff] }
  0x27   : > { %v1554_v27 = vadd.f32 %v1522_v1, %v1489_v20  ;;  %v1555_v28 = vadd.f32 %v1523_v3, %v1490_v21  ;;  %v1687_v30 = vsel %vm587_vm3, %v1684_v17, %v1686_v22  ;;  %v1927_v31 = vrot.slane %v1830_v23, 2  ;;  %337 = vst.msk [vmem:[#allocation2 + $0xb8] sm:$0x3] %vm315_vm2, %v2560_v2  ;;  %v298_v3 = vld [vmem:[%s2637_s10 + $0x90] sm:$0xff] }
  0x28   : > { %v1926_v34 = vsel %vm829_vm4, %v1924_v25, %v1925_v26  ;;  %338 = vst.msk [vmem:[#allocation2 + $0xc0] sm:$0xff] %vm312_vm1, %v2560_v2 }
  0x29   : > { %v1795_v35 = vadd.f32 %v1685_v24, %v1554_v27  ;;  %v1796_v36 = vadd.f32 %v1687_v30, %v1555_v28  ;;  %v1928_v37 = vsel %vm829_vm4, %v1925_v26, %v1927_v31  ;;  %339 = vst.msk [vmem:[#allocation2 + $0xc8] sm:$0xff] %vm312_vm1, %v2560_v2  ;;  %v304_v31 = vld [vmem:[%s2637_s10 + $0xc0] sm:$0xff] }
  0x2a   : > { %340 = vst.msk [vmem:[#allocation2 + $0xd0] sm:$0x3] %vm315_vm2, %v2560_v2 }
  0x2b   : > { %v2036_v44 = vadd.f32 %v1926_v34, %v1795_v35  ;;  %v2037_v45 = vadd.f32 %v1928_v37, %v1796_v36  ;;  %341 = vst.msk [vmem:[#allocation2 + $0xd8] sm:$0xff] %vm312_vm1, %v2560_v2 }
  0x2c   : > { %342 = vst.msk [vmem:[#allocation2 + $0xe0] sm:$0xff] %vm312_vm1, %v2560_v2 }
  0x2d   : > { %v2072_v47 = vmul.f32 %v2771_v39, %v2036_v44  ;;  %v2073_v49 = vmul.f32 %v2771_v39, %v2037_v45  ;;  %343 = vst.msk [vmem:[#allocation2 + $0xe8] sm:$0x3] %vm315_vm2, %v2560_v2  ;;  %v305_v44 = vld [vmem:[%s2637_s10 + $0xc8] sm:$0xff] }
  0x2e   : > { %344 = vst.msk [vmem:[#allocation2 + $0xf0] sm:$0xff] %vm312_vm1, %v2560_v2 }
  0x2f   : > { %v2108_v50 = vadd.f32 %v2780_v46, %v2072_v47  ;;  %v2109_v51 = vadd.f32 %v2780_v46, %v2073_v49  ;;  %345 = vst.msk [vmem:[#allocation2 + $0xf8] sm:$0xff] %vm312_vm1, %v2560_v2 }
  0x30   : > { %346 = vst.msk [vmem:[#allocation2 + $0x100] sm:$0x3] %vm315_vm2, %v2560_v2 }
  0x31   : > { %v2140_v52 = vpack.c.bf16 %v2109_v51, %v2108_v50  ;;  %347 = vst.msk [vmem:[#allocation2 + $0x108] sm:$0xff] %vm312_vm1, %v2560_v2 }
  0x32   : > { %348 = vst.msk [vmem:[#allocation2 + $0x110] sm:$0xff] %vm312_vm1, %v2560_v2 }
  0x33   : > { %2467 = vmatmul.msk.bf16.vlgmr.msra.gmra.mxu0 %vm312_vm1, %v2140_v52  ;;  %349 = vst.msk [vmem:[#allocation2 + $0x118] sm:$0x3] %vm315_vm2, %v2560_v2  ;;  %v306_v52 = vld [vmem:[%s2637_s10 + $0xd0] sm:$0xff] }
  0x34   : > { %350 = vst.msk [vmem:[#allocation2 + $0x120] sm:$0xff] %vm312_vm1, %v2560_v2 }
  0x35   : > { %351 = vst.msk [vmem:[#allocation2 + $0x128] sm:$0xff] %vm312_vm1, %v2560_v2 }
  0x36   : > { %352 = vst.msk [vmem:[#allocation2 + $0x130] sm:$0x3] %vm315_vm2, %v2560_v2 }
  0x37   : > { %353 = vst.msk [vmem:[#allocation2 + $0x138] sm:$0xff] %vm312_vm1, %v2560_v2 }
  0x38   : > { %354 = vst.msk [vmem:[#allocation2 + $0x140] sm:$0xff] %vm312_vm1, %v2560_v2 }
  0x39   : > { %355 = vst.msk [vmem:[#allocation2 + $0x148] sm:$0x3] %vm315_vm2, %v2560_v2 }
  0x3a   : > { %356 = vst.msk [vmem:[#allocation2 + $0x150] sm:$0xff] %vm312_vm1, %v2560_v2 }
  0x3b   : > { %357 = vst.msk [vmem:[#allocation2 + $0x158] sm:$0xff] %vm312_vm1, %v2560_v2 }
  0x3c   : > { %358 = vst.msk [vmem:[#allocation2 + $0x160] sm:$0x3] %vm315_vm2, %v2560_v2 }
  0x3d   : > { %359 = vst.msk [vmem:[#allocation2 + $0x168] sm:$0xff] %vm312_vm1, %v2560_v2 }
  0x3e   : > { %360 = vst.msk [vmem:[#allocation2 + $0x170] sm:$0xff] %vm312_vm1, %v2560_v2 }
  0x3f   : > { %361 = vst.msk [vmem:[#allocation2 + $0x178] sm:$0x3] %vm315_vm2, %v2560_v2 }
  0x40   : > { %362 = vst.msk [vmem:[#allocation2 + $0x180] sm:$0xff] %vm312_vm1, %v2560_v2 }
  0x41   : > { %363 = vst.msk [vmem:[#allocation2 + $0x188] sm:$0xff] %vm312_vm1, %v2560_v2 }
  0x42   : > { %364 = vst.msk [vmem:[#allocation2 + $0x190] sm:$0x3] %vm315_vm2, %v2560_v2 }
  0x43   : > { %365 = vst.msk [vmem:[#allocation2 + $0x198] sm:$0xff] %vm312_vm1, %v2560_v2 }
  0x44   : > { %366 = vst.msk [vmem:[#allocation2 + $0x1a0] sm:$0xff] %vm312_vm1, %v2560_v2 }
  0x45   : > { %367 = vst.msk [vmem:[#allocation2 + $0x1a8] sm:$0x3] %vm315_vm2, %v2560_v2  ;;  %v296_v2 = vld [vmem:[%s2637_s10 + $0x80] sm:$0xff] }
  0x46   : > { %375 = vst.msk [vmem:[#allocation2 + $0x61] sm:$0xff] %vm312_vm1, %v286_v54 }
  0x47   : > { %376 = vst.msk [vmem:[#allocation2 + $0x69] sm:$0xff] %vm312_vm1, %v287_v55 }
  0x48   : > { %377 = vst.msk [vmem:[#allocation2 + $0x79] sm:$0xff] %vm312_vm1, %v288_v56 }
  0x49   : > { %378 = vst.msk [vmem:[#allocation2 + $0x81] sm:$0xff] %vm312_vm1, %v289_v57 }
  0x4a   : > { %379 = vst.msk [vmem:[#allocation2 + $0x91] sm:$0xff] %vm312_vm1, %v290_v60  ;;  %v307_v60 = vld [vmem:[%s2637_s10 + $0xd8] sm:$0xff] }
  0x4b   : > { %380 = vst.msk [vmem:[#allocation2 + $0x99] sm:$0xff] %vm312_vm1, %v291_v61 }
  0x4c   : > { %383 = vst.msk [vmem:[#allocation2 + $0xc1] sm:$0xff] %vm312_vm1, %v294_v62 }
  0x4d   : > { %v413_v1 = vld [vmem:[#allocation2 + $0x60] sm:$0xff]  ;;  %384 = vst.msk [vmem:[#allocation2 + $0xc9] sm:$0xff] %vm312_vm1, %v295_v63 }
  0x4e   : > { %v414_v4 = vld [vmem:[#allocation2 + $0x68] sm:$0xff]  ;;  %v415_v8 = vld [vmem:[#allocation2 + $0x70] sm:$0x3]  ;;  %v466_v9 = vmul.f32 %v2641_v7, %v413_v1  ;;  %v503_v10 = vmul.f32 %v2628_v5, %v413_v1  ;;  %v745_v11 = vmul.f32 %v2630_v6, %v413_v1  ;;  %385 = vst.msk [vmem:[#allocation2 + $0xd9] sm:$0xff] %vm312_vm1, %v296_v2 }
  0x4f   : > { %v2865_v13 = vld [vmem:[#allocation2 + $0x78] sm:$0xff]  ;;  %v467_v14 = vmul.f32 %v2641_v7, %v414_v4  ;;  %v504_v15 = vmul.f32 %v2628_v5, %v414_v4  ;;  %v505_v16 = vmul.f32 %v2628_v5, %v415_v8  ;;  %v746_v17 = vmul.f32 %v2630_v6, %v414_v4  ;;  %386 = vst.msk [vmem:[#allocation2 + $0xe1] sm:$0xff] %vm312_vm1, %v297_v0 }
  0x50   : > { %v2874_v20 = vld [vmem:[#allocation2 + $0x80] sm:$0xff]  ;;  %v2876_v21 = vld [vmem:[#allocation2 + $0x88] sm:$0x3]  ;;  %v608_v22 = vrot.slane %v503_v10, 1  ;;  %v747_v23 = vmul.f32 %v2630_v6, %v415_v8  ;;  %v850_v24 = vrot.slane %v745_v11, 2  ;;  %v983_v25 = vmul.f32 %v2665_v29, %v2865_v13  ;;  %387 = vst.msk [vmem:[#allocation2 + $0xf1] sm:$0xff] %vm312_vm1, %v298_v3 }
  0x51   : > { %v609_v26 = vrot.slane %v504_v15, 1  ;;  %v611_v27 = vrot.slane %v505_v16, 1  ;;  %v851_v28 = vrot.slane %v746_v17, 2  ;;  %v984_v30 = vmul.f32 %v2665_v29, %v2874_v20  ;;  %388 = vst.msk [vmem:[#allocation2 + $0xf9] sm:$0xff] %vm312_vm1, %v299_v12  ;;  %v2894_v45 = vld [vmem:[#allocation2 + $0x90] sm:$0xff] }
  0x52   : > { %v853_v34 = vrot.slane %v747_v23, 2  ;;  %v1052_v35 = vmul.f32 %v2669_v32, %v2865_v13  ;;  %v1053_v36 = vmul.f32 %v2669_v32, %v2874_v20  ;;  %v1054_v37 = vmul.f32 %v2669_v32, %v2876_v21  ;;  %391 = vst.msk [vmem:[#allocation2 + $0x121] sm:$0xff] %vm312_vm1, %v302_v18  ;;  %v2906_v61 = vld [vmem:[#allocation2 + $0x98] sm:$0xff]  ;;  %v2913_v1 = vld [vmem:[#allocation2 + $0xa0] sm:$0x3] }
  0x53   : > { %v610_v47 = vsel %vm587_vm3, %v608_v22, %v609_v26  ;;  %v612_v49 = vsel %vm587_vm3, %v609_v26, %v611_v27  ;;  %v852_v50 = vsel %vm829_vm4, %v850_v24, %v851_v28  ;;  %v1293_v51 = vmul.f32 %v2671_v33, %v2865_v13  ;;  %392 = vst.msk [vmem:[#allocation2 + $0x129] sm:$0xff] %vm312_vm1, %v303_v19 }
  0x54   : > { %v708_v54 = vadd.f32 %v610_v47, %v466_v9  ;;  %v709_v55 = vadd.f32 %v612_v49, %v467_v14  ;;  %v854_v56 = vsel %vm829_vm4, %v851_v28, %v853_v34  ;;  %v1156_v57 = vrot.slane %v1052_v35, 1  ;;  %393 = vst.msk [vmem:[#allocation2 + $0x139] sm:$0xff] %vm312_vm1, %v304_v31  ;;  %v426_v49 = vld [vmem:[#allocation2 + $0xc8] sm:$0xff] }
  0x55   : > { %v1157_v62 = vrot.slane %v1053_v36, 1  ;;  %v1159_v63 = vrot.slane %v1054_v37, 1  ;;  %v1294_v2 = vmul.f32 %v2671_v33, %v2874_v20  ;;  %v1295_v0 = vmul.f32 %v2671_v33, %v2876_v21  ;;  %394 = vst.msk [vmem:[#allocation2 + $0x141] sm:$0xff] %vm312_vm1, %v305_v44  ;;  %v425_v36 = vld [vmem:[#allocation2 + $0xc0] sm:$0xff] }
  0x56   : > { %v950_v3 = vadd.f32 %v852_v50, %v708_v54  ;;  %v951_v4 = vadd.f32 %v854_v56, %v709_v55  ;;  %v1397_v8 = vrot.slane %v1293_v51, 2  ;;  %v1530_v9 = vmul.f32 %v2683_v40, %v2894_v45  ;;  %395 = vst.msk [vmem:[#allocation2 + $0x151] sm:$0xff] %vm312_vm1, %v306_v52  ;;  %v427_v50 = vld [vmem:[#allocation2 + $0xd0] sm:$0x3] }
  0x57   : > { %v1158_v10 = vsel %vm587_vm3, %v1156_v57, %v1157_v62  ;;  %v1160_v11 = vsel %vm587_vm3, %v1157_v62, %v1159_v63  ;;  %v1398_v12 = vrot.slane %v1294_v2, 2  ;;  %v1400_v14 = vrot.slane %v1295_v0, 2  ;;  %396 = vst.msk [vmem:[#allocation2 + $0x159] sm:$0xff] %vm312_vm1, %v307_v60 }
  0x58   : > { %v1015_v15 = vadd.f32 %v983_v25, %v950_v3  ;;  %v1016_v16 = vadd.f32 %v984_v30, %v951_v4  ;;  %v1531_v17 = vmul.f32 %v2683_v40, %v2906_v61  ;;  %v1599_v18 = vmul.f32 %v2685_v41, %v2894_v45  ;;  %v2944_v3 = vld [vmem:[#allocation2 + $0xd8] sm:$0xff] }
  0x59   : > { %v1399_v19 = vsel %vm829_vm4, %v1397_v8, %v1398_v12  ;;  %v1401_v22 = vsel %vm829_vm4, %v1398_v12, %v1400_v14  ;;  %v1600_v23 = vmul.f32 %v2685_v41, %v2906_v61  ;;  %v1601_v24 = vmul.f32 %v2685_v41, %v2913_v1 }
  0x5a   : > { %v1256_v26 = vadd.f32 %v1158_v10, %v1015_v15  ;;  %v1257_v27 = vadd.f32 %v1160_v11, %v1016_v16  ;;  %v1703_v25 = vrot.slane %v1599_v18, 1  ;;  %v1840_v28 = vmul.f32 %v2720_v58, %v2894_v45 }
  0x5b   : > { %v1704_v30 = vrot.slane %v1600_v23, 1  ;;  %v1706_v31 = vrot.slane %v1601_v24, 1  ;;  %v1841_v34 = vmul.f32 %v2720_v58, %v2906_v61  ;;  %v1842_v35 = vmul.f32 %v2720_v58, %v2913_v1 }
  0x5c   : > { %v1497_v37 = vadd.f32 %v1399_v19, %v1256_v26  ;;  %v1498_v44 = vadd.f32 %v1401_v22, %v1257_v27  ;;  %v1944_v47 = vrot.slane %v1840_v28, 2  ;;  %v474_v51 = vmul.f32 %v2641_v7, %v425_v36  ;;  %v2951_v22 = vld [vmem:[#allocation2 + $0xe0] sm:$0xff] }
  0x5d   : > { %v1705_v52 = vsel %vm587_vm3, %v1703_v25, %v1704_v30  ;;  %v1707_v54 = vsel %vm587_vm3, %v1704_v30, %v1706_v31  ;;  %v1945_v55 = vrot.slane %v1841_v34, 2  ;;  %v1947_v56 = vrot.slane %v1842_v35, 2  ;;  %v2959_v34 = vld [vmem:[#allocation2 + $0xe8] sm:$0x3] }
  0x5e   : > { %v1562_v57 = vadd.f32 %v1530_v9, %v1497_v37  ;;  %v1563_v60 = vadd.f32 %v1531_v17, %v1498_v44  ;;  %v475_v62 = vmul.f32 %v2641_v7, %v426_v49  ;;  %v515_v63 = vmul.f32 %v2628_v5, %v425_v36  ;;  %v284_v37 = vld [vmem:[%s2637_s10 + $0x20] sm:$0xff]  ;;  %v285_v44 = vld [vmem:[%s2637_s10 + $0x28] sm:$0xff] }
  0x5f   : > { %v1946_v2 = vsel %vm829_vm4, %v1944_v47, %v1945_v55  ;;  %v1948_v0 = vsel %vm829_vm4, %v1945_v55, %v1947_v56  ;;  %v516_v4 = vmul.f32 %v2628_v5, %v426_v49  ;;  %v517_v8 = vmul.f32 %v2628_v5, %v427_v50  ;;  %373 = vst.msk [vmem:[#allocation2 + $0x49] sm:$0xff] %vm312_vm1, %v284_v37  ;;  %v293_v37 = vld [vmem:[%s2637_s10 + $0x68] sm:$0xff] }
  0x60   : > { %v1803_v10 = vadd.f32 %v1705_v52, %v1562_v57  ;;  %v1804_v11 = vadd.f32 %v1707_v54, %v1563_v60  ;;  %v628_v12 = vrot.slane %v515_v63, 1  ;;  %v757_v9 = vmul.f32 %v2630_v6, %v425_v36  ;;  %374 = vst.msk [vmem:[#allocation2 + $0x51] sm:$0xff] %vm312_vm1, %v285_v44  ;;  %v2973_v57 = vld [vmem:[#allocation2 + $0xf0] sm:$0xff]  ;;  %v2975_v60 = vld [vmem:[#allocation2 + $0xf8] sm:$0xff] }
  0x61   : > { %v629_v14 = vrot.slane %v516_v4, 1  ;;  %v631_v15 = vrot.slane %v517_v8, 1  ;;  %v758_v16 = vmul.f32 %v2630_v6, %v426_v49  ;;  %v759_v17 = vmul.f32 %v2630_v6, %v427_v50  ;;  %382 = vst.msk [vmem:[#allocation2 + $0xb1] sm:$0xff] %vm312_vm1, %v293_v37  ;;  %v3026_v37 = vld [vmem:[#allocation2 + $0x140] sm:$0xff] }
  0x62   : > { %v2044_v18 = vadd.f32 %v1946_v2, %v1803_v10  ;;  %v2045_v19 = vadd.f32 %v1948_v0, %v1804_v11  ;;  %v870_v23 = vrot.slane %v757_v9, 2  ;;  %v991_v24 = vmul.f32 %v2665_v29, %v2944_v3 }
  0x63   : > { %v630_v26 = vsel %vm587_vm3, %v628_v12, %v629_v14  ;;  %v632_v27 = vsel %vm587_vm3, %v629_v14, %v631_v15  ;;  %v871_v25 = vrot.slane %v758_v16, 2  ;;  %v873_v28 = vrot.slane %v759_v17, 2  ;;  %v2985_v12 = vld [vmem:[#allocation2 + $0x100] sm:$0x3] }
  0x64   : > { %v2080_v30 = vmul.f32 %v2771_v39, %v2044_v18  ;;  %v2081_v31 = vmul.f32 %v2771_v39, %v2045_v19  ;;  %v716_v35 = vadd.f32 %v630_v26, %v474_v51  ;;  %v717_v36 = vadd.f32 %v632_v27, %v475_v62 }
  0x65   : > { %v872_v47 = vsel %vm829_vm4, %v870_v23, %v871_v25  ;;  %v874_v49 = vsel %vm829_vm4, %v871_v25, %v873_v28  ;;  %v992_v50 = vmul.f32 %v2665_v29, %v2951_v22  ;;  %v1064_v52 = vmul.f32 %v2669_v32, %v2944_v3 }
  0x66   : > { %v2116_v54 = vadd.f32 %v2780_v46, %v2080_v30  ;;  %v2117_v55 = vadd.f32 %v2780_v46, %v2081_v31  ;;  %v958_v51 = vadd.f32 %v872_v47, %v716_v35  ;;  %v959_v56 = vadd.f32 %v874_v49, %v717_v36  ;;  %v292_v36 = vld [vmem:[%s2637_s10 + $0x60] sm:$0xff] }
  0x67   : > { %v1065_v62 = vmul.f32 %v2669_v32, %v2951_v22  ;;  %v1066_v63 = vmul.f32 %v2669_v32, %v2959_v34  ;;  %v1176_v2 = vrot.slane %v1064_v52, 1  ;;  %v1305_v0 = vmul.f32 %v2671_v33, %v2944_v3  ;;  %381 = vst.msk [vmem:[#allocation2 + $0xa9] sm:$0xff] %vm312_vm1, %v292_v36 }
  0x68   : > { %v2144_v4 = vpack.c.bf16 %v2117_v55, %v2116_v54  ;;  %v1023_v8 = vadd.f32 %v991_v24, %v958_v51  ;;  %v1024_v10 = vadd.f32 %v992_v50, %v959_v56  ;;  %v1306_v11 = vmul.f32 %v2671_v33, %v2951_v22  ;;  %v437_v56 = vld [vmem:[#allocation2 + $0x120] sm:$0xff] }
  0x69   : > { %v1177_v9 = vrot.slane %v1065_v62, 1  ;;  %v1179_v14 = vrot.slane %v1066_v63, 1  ;;  %v1307_v15 = vmul.f32 %v2671_v33, %v2959_v34  ;;  %v1417_v16 = vrot.slane %v1305_v0, 2  ;;  %v438_v62 = vld [vmem:[#allocation2 + $0x128] sm:$0xff] }
  0x6a   : > { %2471 = vmatmul.msk.bf16.vlgmr.msra.gmra.mxu1 %vm312_vm1, %v2144_v4  ;;  %v1418_v17 = vrot.slane %v1306_v11, 2  ;;  %v1538_v18 = vmul.f32 %v2683_v40, %v2973_v57  ;;  %v1539_v19 = vmul.f32 %v2683_v40, %v2975_v60  ;;  %v1611_v23 = vmul.f32 %v2685_v41, %v2973_v57  ;;  %v439_v4 = vld [vmem:[#allocation2 + $0x130] sm:$0x3] }
  0x6b   : > { %v1178_v24 = vsel %vm587_vm3, %v1176_v2, %v1177_v9  ;;  %v1180_v26 = vsel %vm587_vm3, %v1177_v9, %v1179_v14  ;;  %v1420_v27 = vrot.slane %v1307_v15, 2  ;;  %v1612_v25 = vmul.f32 %v2685_v41, %v2975_v60 }
  0x6c   : > { %v1264_v28 = vadd.f32 %v1178_v24, %v1023_v8  ;;  %v1265_v30 = vadd.f32 %v1180_v26, %v1024_v10  ;;  %v1419_v31 = vsel %vm829_vm4, %v1417_v16, %v1418_v17  ;;  %v1613_v35 = vmul.f32 %v2685_v41, %v2985_v12 }
  0x6d   : > { %v1421_v44 = vsel %vm829_vm4, %v1418_v17, %v1420_v27  ;;  %v1723_v47 = vrot.slane %v1611_v23, 1  ;;  %v1724_v49 = vrot.slane %v1612_v25, 1  ;;  %v1852_v50 = vmul.f32 %v2720_v58, %v2973_v57  ;;  %v3021_v25 = vld [vmem:[#allocation2 + $0x138] sm:$0xff] }
  0x6e   : > { %v1505_v52 = vadd.f32 %v1419_v31, %v1264_v28  ;;  %v1506_v54 = vadd.f32 %v1421_v44, %v1265_v30  ;;  %v1726_v55 = vrot.slane %v1613_v35, 1  ;;  %v1853_v51 = vmul.f32 %v2720_v58, %v2975_v60 }
  0x6f   : > { %v1725_v63 = vsel %vm587_vm3, %v1723_v47, %v1724_v49  ;;  %v1854_v2 = vmul.f32 %v2720_v58, %v2985_v12  ;;  %v1964_v0 = vrot.slane %v1852_v50, 2  ;;  %v482_v8 = vmul.f32 %v2641_v7, %v437_v56 }
  0x70   : > { %v1570_v10 = vadd.f32 %v1538_v18, %v1505_v52  ;;  %v1571_v11 = vadd.f32 %v1539_v19, %v1506_v54  ;;  %v1727_v9 = vsel %vm587_vm3, %v1724_v49, %v1726_v55  ;;  %v1965_v14 = vrot.slane %v1853_v51, 2 }
  0x71   : > { %v1967_v15 = vrot.slane %v1854_v2, 2  ;;  %v483_v16 = vmul.f32 %v2641_v7, %v438_v62  ;;  %v527_v17 = vmul.f32 %v2628_v5, %v437_v56  ;;  %v528_v23 = vmul.f32 %v2628_v5, %v438_v62 }
  0x72   : > { %v1811_v24 = vadd.f32 %v1725_v63, %v1570_v10  ;;  %v1812_v26 = vadd.f32 %v1727_v9, %v1571_v11  ;;  %v1966_v27 = vsel %vm829_vm4, %v1964_v0, %v1965_v14  ;;  %v529_v28 = vmul.f32 %v2628_v5, %v439_v4 }
  0x73   : > { %v1968_v18 = vsel %vm829_vm4, %v1965_v14, %v1967_v15  ;;  %v648_v19 = vrot.slane %v527_v17, 1  ;;  %v649_v30 = vrot.slane %v528_v23, 1  ;;  %v769_v31 = vmul.f32 %v2630_v6, %v437_v56  ;;  %v3035_v56 = vld [vmem:[#allocation2 + $0x148] sm:$0x3]  ;;  %v3046_v17 = vld [vmem:[#allocation2 + $0x150] sm:$0xff] }
  0x74   : > { %v2052_v35 = vadd.f32 %v1966_v27, %v1811_v24  ;;  %v2053_v36 = vadd.f32 %v1968_v18, %v1812_v26  ;;  %v651_v44 = vrot.slane %v529_v28, 1  ;;  %v770_v47 = vmul.f32 %v2630_v6, %v438_v62 }
  0x75   : > { %v650_v49 = vsel %vm587_vm3, %v648_v19, %v649_v30  ;;  %v771_v50 = vmul.f32 %v2630_v6, %v439_v4  ;;  %v890_v52 = vrot.slane %v769_v31, 2  ;;  %v999_v54 = vmul.f32 %v2665_v29, %v3021_v25  ;;  %v3054_v19 = vld [vmem:[#allocation2 + $0x158] sm:$0xff] }
  0x76   : > { %v2088_v55 = vmul.f32 %v2771_v39, %v2052_v35  ;;  %v2089_v51 = vmul.f32 %v2771_v39, %v2053_v36  ;;  %v652_v63 = vsel %vm587_vm3, %v649_v30, %v651_v44  ;;  %v724_v2 = vadd.f32 %v650_v49, %v482_v8  ;;  %v3061_v44 = vld [vmem:[#allocation2 + $0x160] sm:$0x3] }
  0x77   : > { %v725_v0 = vadd.f32 %v652_v63, %v483_v16  ;;  %v891_v10 = vrot.slane %v770_v47, 2  ;;  %v893_v62 = vrot.slane %v771_v50, 2  ;;  %v1000_v11 = vmul.f32 %v2665_v29, %v3026_v37 }
  0x78   : > { %v2124_v4 = vadd.f32 %v2780_v46, %v2088_v55  ;;  %v2125_v9 = vadd.f32 %v2780_v46, %v2089_v51  ;;  %v1076_v14 = vmul.f32 %v2669_v32, %v3021_v25  ;;  %v1077_v15 = vmul.f32 %v2669_v32, %v3026_v37  ;;  %v300_v55 = vld [vmem:[%s2637_s10 + $0xa0] sm:$0xff]  ;;  %v301_v51 = vld [vmem:[%s2637_s10 + $0xa8] sm:$0xff] }
  0x79   : > { %v892_v8 = vsel %vm829_vm4, %v890_v52, %v891_v10  ;;  %v894_v16 = vsel %vm829_vm4, %v891_v10, %v893_v62  ;;  %v1078_v23 = vmul.f32 %v2669_v32, %v3035_v56  ;;  %v1317_v24 = vmul.f32 %v2671_v33, %v3021_v25  ;;  %389 = vst.msk [vmem:[#allocation2 + $0x109] sm:$0xff] %vm312_vm1, %v300_v55 }
  0x7a   : > { %v2148_v26 = vpack.c.bf16 %v2125_v9, %v2124_v4  ;;  %v966_v27 = vadd.f32 %v892_v8, %v724_v2  ;;  %v967_v28 = vadd.f32 %v894_v16, %v725_v0  ;;  %v1196_v18 = vrot.slane %v1076_v14, 1  ;;  %390 = vst.msk [vmem:[#allocation2 + $0x111] sm:$0xff] %vm312_vm1, %v301_v51 }
  0x7b   : > { %v1197_v30 = vrot.slane %v1077_v15, 1  ;;  %v1199_v31 = vrot.slane %v1078_v23, 1  ;;  %v1318_v35 = vmul.f32 %v2671_v33, %v3026_v37  ;;  %v1319_v36 = vmul.f32 %v2671_v33, %v3035_v56 }
  0x7c   : > { %2475 = vmatmul.msk.bf16.vlgmr.msra.gmra.mxu2 %vm312_vm1, %v2148_v26  ;;  %v1031_v47 = vadd.f32 %v999_v54, %v966_v27  ;;  %v1032_v49 = vadd.f32 %v1000_v11, %v967_v28  ;;  %v1437_v50 = vrot.slane %v1317_v24, 2  ;;  %v1546_v52 = vmul.f32 %v2683_v40, %v3046_v17 }
  0x7d   : > { %v1198_v63 = vsel %vm587_vm3, %v1196_v18, %v1197_v30  ;;  %v1200_v2 = vsel %vm587_vm3, %v1197_v30, %v1199_v31  ;;  %v1438_v0 = vrot.slane %v1318_v35, 2  ;;  %v1440_v10 = vrot.slane %v1319_v36, 2 }
  0x7e   : > { %v1272_v62 = vadd.f32 %v1198_v63, %v1031_v47  ;;  %v1273_v4 = vadd.f32 %v1200_v2, %v1032_v49  ;;  %v1547_v54 = vmul.f32 %v2683_v40, %v3054_v19  ;;  %v1623_v11 = vmul.f32 %v2685_v41, %v3046_v17 }
  0x7f   : > { %v1439_v9 = vsel %vm829_vm4, %v1437_v50, %v1438_v0  ;;  %v1441_v14 = vsel %vm829_vm4, %v1438_v0, %v1440_v10  ;;  %v1624_v15 = vmul.f32 %v2685_v41, %v3054_v19  ;;  %v1625_v8 = vmul.f32 %v2685_v41, %v3061_v44 }
  0x80   : > { %v1513_v16 = vadd.f32 %v1439_v9, %v1272_v62  ;;  %v1514_v23 = vadd.f32 %v1441_v14, %v1273_v4  ;;  %v1743_v24 = vrot.slane %v1623_v11, 1  ;;  %v1864_v26 = vmul.f32 %v2720_v58, %v3046_v17 }
  0x81   : > { %v1744_v27 = vrot.slane %v1624_v15, 1  ;;  %v1746_v28 = vrot.slane %v1625_v8, 1  ;;  %v1865_v18 = vmul.f32 %v2720_v58, %v3054_v19  ;;  %v1866_v30 = vmul.f32 %v2720_v58, %v3061_v44 }
  0x82   : > { %v1578_v31 = vadd.f32 %v1546_v52, %v1513_v16  ;;  %v1579_v35 = vadd.f32 %v1547_v54, %v1514_v23  ;;  %v1984_v36 = vrot.slane %v1864_v26, 2  ;;  %v460_v47 = vmul.f32 %v2641_v7, %v2681_v38 }
  0x83   : > { %v1745_v49 = vsel %vm587_vm3, %v1743_v24, %v1744_v27  ;;  %v1747_v50 = vsel %vm587_vm3, %v1744_v27, %v1746_v28  ;;  %v1985_v55 = vrot.slane %v1865_v18, 2  ;;  %v1987_v51 = vrot.slane %v1866_v30, 2 }
  0x84   : > { %v1819_v63 = vadd.f32 %v1745_v49, %v1578_v31  ;;  %v1820_v2 = vadd.f32 %v1747_v50, %v1579_v35  ;;  %v461_v0 = vmul.f32 %v2641_v7, %v2689_v42  ;;  %v494_v10 = vmul.f32 %v2628_v5, %v2681_v38 }
  0x85   : > { %v1986_v52 = vsel %vm829_vm4, %v1984_v36, %v1985_v55  ;;  %v1988_v62 = vsel %vm829_vm4, %v1985_v55, %v1987_v51  ;;  %v495_v4 = vmul.f32 %v2628_v5, %v2689_v42  ;;  %v496_v54 = vmul.f32 %v2628_v5, %v2691_v43 }
  0x86   : > { %v2060_v11 = vadd.f32 %v1986_v52, %v1819_v63  ;;  %v2061_v9 = vadd.f32 %v1988_v62, %v1820_v2  ;;  %v593_v14 = vrot.slane %v494_v10, 1  ;;  %v736_v15 = vmul.f32 %v2630_v6, %v2681_v38  ;;  %v3121_v10 = vld [vmem:[#allocation2 + $0x48] sm:$0xff] }
  0x87   : > { %v594_v8 = vrot.slane %v495_v4, 1  ;;  %v596_v16 = vrot.slane %v496_v54, 1  ;;  %v737_v23 = vmul.f32 %v2630_v6, %v2689_v42  ;;  %v738_v24 = vmul.f32 %v2630_v6, %v2691_v43 }
  0x88   : > { %v2096_v26 = vmul.f32 %v2771_v39, %v2060_v11  ;;  %v2097_v27 = vmul.f32 %v2771_v39, %v2061_v9  ;;  %v835_v28 = vrot.slane %v736_v15, 2  ;;  %v977_v18 = vmul.f32 %v2665_v29, %v2701_v48 }
  0x89   : > { %v595_v30 = vsel %vm587_vm3, %v593_v14, %v594_v8  ;;  %v597_v38 = vsel %vm587_vm3, %v594_v8, %v596_v16  ;;  %v836_v31 = vrot.slane %v737_v23, 2  ;;  %v838_v35 = vrot.slane %v738_v24, 2  ;;  %v3134_v14 = vld [vmem:[#allocation2 + $0x58] sm:$0x3] }
  0x8a   : > { %v2132_v36 = vadd.f32 %v2780_v46, %v2096_v26  ;;  %v2133_v42 = vadd.f32 %v2780_v46, %v2097_v27  ;;  %v702_v49 = vadd.f32 %v595_v30, %v460_v47  ;;  %v703_v43 = vadd.f32 %v597_v38, %v461_v0  ;;  %v3125_v47 = vld [vmem:[#allocation2 + $0x50] sm:$0xff]  ;;  %v309_v30 = vld [vmem:[%s2637_s10 + $0xe8] sm:$0xff] }
  0x8b   : > { %v837_v50 = vsel %vm829_vm4, %v835_v28, %v836_v31  ;;  %v839_v55 = vsel %vm829_vm4, %v836_v31, %v838_v35  ;;  %v978_v51 = vmul.f32 %v2665_v29, %v2713_v53  ;;  %v1043_v63 = vmul.f32 %v2669_v32, %v2701_v48  ;;  %398 = vst.msk [vmem:[#allocation2 + $0x171] sm:$0xff] %vm312_vm1, %v309_v30 }
  0x8c   : > { %v2152_v2 = vpack.c.bf16 %v2133_v42, %v2132_v36  ;;  %v944_v52 = vadd.f32 %v837_v50, %v702_v49  ;;  %v945_v62 = vadd.f32 %v839_v55, %v703_v43  ;;  %v1044_v4 = vmul.f32 %v2669_v32, %v2713_v53 }
  0x8d   : > { %v1045_v0 = vmul.f32 %v2669_v32, %v2724_v59  ;;  %v1141_v54 = vrot.slane %v1043_v63, 1  ;;  %v1284_v11 = vmul.f32 %v2671_v33, %v2701_v48  ;;  %v1285_v9 = vmul.f32 %v2671_v33, %v2713_v53  ;;  %v308_v48 = vld [vmem:[%s2637_s10 + $0xe0] sm:$0xff] }
  0x8e   : > { %2479 = vmatmul.msk.bf16.vlgmr.msra.gmra.mxu3 %vm312_vm1, %v2152_v2  ;;  %v1009_v15 = vadd.f32 %v977_v18, %v944_v52  ;;  %v1010_v8 = vadd.f32 %v978_v51, %v945_v62  ;;  %v1142_v16 = vrot.slane %v1044_v4, 1  ;;  %v1286_v23 = vmul.f32 %v2671_v33, %v2724_v59  ;;  %397 = vst.msk [vmem:[#allocation2 + $0x169] sm:$0xff] %vm312_vm1, %v308_v48 }
  0x8f   : > { %v1144_v24 = vrot.slane %v1045_v0, 1  ;;  %v1382_v26 = vrot.slane %v1284_v11, 2  ;;  %v1383_v27 = vrot.slane %v1285_v9, 2  ;;  %v1524_v28 = vmul.f32 %v2683_v40, %v3121_v10 }
  0x90   : > { %v1143_v53 = vsel %vm587_vm3, %v1141_v54, %v1142_v16  ;;  %v1385_v38 = vrot.slane %v1286_v23, 2  ;;  %v1525_v31 = vmul.f32 %v2683_v40, %v3125_v47  ;;  %v1590_v18 = vmul.f32 %v2685_v41, %v3121_v10 }
  0x91   : > { %v1145_v59 = vsel %vm587_vm3, %v1142_v16, %v1144_v24  ;;  %v1250_v35 = vadd.f32 %v1143_v53, %v1009_v15  ;;  %v1384_v36 = vsel %vm829_vm4, %v1382_v26, %v1383_v27  ;;  %v1591_v42 = vmul.f32 %v2685_v41, %v3125_v47 }
  0x92   : > { %v1251_v49 = vadd.f32 %v1145_v59, %v1010_v8  ;;  %v1386_v43 = vsel %vm829_vm4, %v1383_v27, %v1385_v38  ;;  %v1592_v50 = vmul.f32 %v2685_v41, %v3134_v14  ;;  %v1688_v55 = vrot.slane %v1590_v18, 1 }
  0x93   : > { %v1491_v51 = vadd.f32 %v1384_v36, %v1250_v35  ;;  %v1689_v63 = vrot.slane %v1591_v42, 1  ;;  %v1831_v2 = vmul.f32 %v2720_v58, %v3121_v10  ;;  %v1832_v52 = vmul.f32 %v2720_v58, %v3125_v47 }
  0x94   : > { %v1492_v62 = vadd.f32 %v1386_v43, %v1251_v49  ;;  %v1691_v4 = vrot.slane %v1592_v50, 1  ;;  %v1833_v0 = vmul.f32 %v2720_v58, %v3134_v14  ;;  %v468_v54 = vmul.f32 %v2641_v7, %v2865_v13 }
  0x95   : > { %v1556_v11 = vadd.f32 %v1524_v28, %v1491_v51  ;;  %v1690_v9 = vsel %vm587_vm3, %v1688_v55, %v1689_v63  ;;  %v1929_v15 = vrot.slane %v1831_v2, 2  ;;  %v1930_v8 = vrot.slane %v1832_v52, 2 }
  0x96   : > { %v1557_v16 = vadd.f32 %v1525_v31, %v1492_v62  ;;  %v1692_v23 = vsel %vm587_vm3, %v1689_v63, %v1691_v4  ;;  %v1932_v24 = vrot.slane %v1833_v0, 2  ;;  %v469_v26 = vmul.f32 %v2641_v7, %v2874_v20 }
  0x97   : > { %v1797_v27 = vadd.f32 %v1690_v9, %v1556_v11  ;;  %v1931_v48 = vsel %vm829_vm4, %v1929_v15, %v1930_v8  ;;  %v506_v58 = vmul.f32 %v2628_v5, %v2865_v13  ;;  %v507_v28 = vmul.f32 %v2628_v5, %v2874_v20 }
  0x98   : > { %v1798_v30 = vadd.f32 %v1692_v23, %v1557_v16  ;;  %v1933_v53 = vsel %vm829_vm4, %v1930_v8, %v1932_v24  ;;  %v508_v38 = vmul.f32 %v2628_v5, %v2876_v21  ;;  %v748_v31 = vmul.f32 %v2630_v6, %v2865_v13  ;;  %v3196_v23 = vld [vmem:[#allocation2 + $0xa8] sm:$0xff] }
  0x99   : > { %v2038_v18 = vadd.f32 %v1931_v48, %v1797_v27  ;;  %v613_v59 = vrot.slane %v506_v58, 1  ;;  %v614_v35 = vrot.slane %v507_v28, 1  ;;  %v749_v36 = vmul.f32 %v2630_v6, %v2874_v20 }
  0x9a   : > { %v2039_v42 = vadd.f32 %v1933_v53, %v1798_v30  ;;  %v616_v49 = vrot.slane %v508_v38, 1  ;;  %v750_v43 = vmul.f32 %v2630_v6, %v2876_v21  ;;  %v855_v50 = vrot.slane %v748_v31, 2 }
  0x9b   : > { %v2074_v55 = vmul.f32 %v2771_v39, %v2038_v18  ;;  %v615_v51 = vsel %vm587_vm3, %v613_v59, %v614_v35  ;;  %v856_v63 = vrot.slane %v749_v36, 2  ;;  %v985_v13 = vmul.f32 %v2665_v29, %v2894_v45  ;;  %v3211_v59 = vld [vmem:[#allocation2 + $0xb8] sm:$0x3] }
  0x9c   : > { %v2075_v2 = vmul.f32 %v2771_v39, %v2039_v42  ;;  %v617_v52 = vsel %vm587_vm3, %v614_v35, %v616_v49  ;;  %v710_v62 = vadd.f32 %v615_v51, %v468_v54  ;;  %v858_v20 = vrot.slane %v750_v43, 2  ;;  %v3198_v54 = vld [vmem:[#allocation2 + $0xb0] sm:$0xff] }
  0x9d   : > { %v2110_v4 = vadd.f32 %v2780_v46, %v2074_v55  ;;  %v711_v0 = vadd.f32 %v617_v52, %v469_v26  ;;  %v857_v21 = vsel %vm829_vm4, %v855_v50, %v856_v63  ;;  %v986_v11 = vmul.f32 %v2665_v29, %v2906_v61 }
  0x9e   : > { %v2111_v9 = vadd.f32 %v2780_v46, %v2075_v2  ;;  %v859_v15 = vsel %vm829_vm4, %v856_v63, %v858_v20  ;;  %v952_v8 = vadd.f32 %v857_v21, %v710_v62  ;;  %v1055_v16 = vmul.f32 %v2669_v32, %v2894_v45  ;;  %v3230_v62 = vld [vmem:[%s4039_s1 + $0x8] ss:$0 sm:$0xff] }
  0x9f   : > { %v953_v24 = vadd.f32 %v859_v15, %v711_v0  ;;  %v1056_v26 = vmul.f32 %v2669_v32, %v2906_v61  ;;  %v1057_v27 = vmul.f32 %v2669_v32, %v2913_v1  ;;  %v1296_v46 = vmul.f32 %v2671_v33, %v2894_v45 }
  0xa0   : > { %v2141_v48 = vpack.c.bf16 %v2111_v9, %v2110_v4  ;;  %v1017_v58 = vadd.f32 %v985_v13, %v952_v8  ;;  %v1161_v28 = vrot.slane %v1055_v16, 1  ;;  %v1297_v30 = vmul.f32 %v2671_v33, %v2906_v61 }
  0xa1   : > { %v1018_v53 = vadd.f32 %v986_v11, %v953_v24  ;;  %v1162_v38 = vrot.slane %v1056_v26, 1  ;;  %v1164_v31 = vrot.slane %v1057_v27, 1  ;;  %v1298_v18 = vmul.f32 %v2671_v33, %v2913_v1 }
  0xa2   : > { %2468 = vmatmul.msk.bf16.gmra.mxu0 %vm312_vm1, %v2141_v48  ;;  %v1402_v35 = vrot.slane %v1296_v46, 2  ;;  %v1403_v36 = vrot.slane %v1297_v30, 2  ;;  %v1532_v45 = vmul.f32 %v2683_v40, %v3196_v23  ;;  %v1533_v42 = vmul.f32 %v2683_v40, %v3198_v54 }
  0xa3   : > { %v1163_v61 = vsel %vm587_vm3, %v1161_v28, %v1162_v38  ;;  %v1165_v49 = vsel %vm587_vm3, %v1162_v38, %v1164_v31  ;;  %v1405_v43 = vrot.slane %v1298_v18, 2  ;;  %v1602_v1 = vmul.f32 %v2685_v41, %v3196_v23 }
  0xa4   : > { %v1258_v50 = vadd.f32 %v1163_v61, %v1017_v58  ;;  %v1259_v55 = vadd.f32 %v1165_v49, %v1018_v53  ;;  %v1404_v51 = vsel %vm829_vm4, %v1402_v35, %v1403_v36  ;;  %v1603_v63 = vmul.f32 %v2685_v41, %v3198_v54 }
  0xa5   : > { %v1406_v13 = vsel %vm829_vm4, %v1403_v36, %v1405_v43  ;;  %v1604_v2 = vmul.f32 %v2685_v41, %v3211_v59  ;;  %v1708_v52 = vrot.slane %v1602_v1, 1  ;;  %v1843_v20 = vmul.f32 %v3230_v62, %v3196_v23 }
  0xa6   : > { %v1499_v4 = vadd.f32 %v1404_v51, %v1258_v50  ;;  %v1500_v0 = vadd.f32 %v1406_v13, %v1259_v55  ;;  %v1709_v21 = vrot.slane %v1603_v63, 1  ;;  %v1844_v11 = vmul.f32 %v3230_v62, %v3198_v54 }
  0xa7   : > { %v1711_v9 = vrot.slane %v1604_v2, 1  ;;  %v1845_v15 = vmul.f32 %v3230_v62, %v3211_v59  ;;  %v1949_v8 = vrot.slane %v1843_v20, 2  ;;  %v476_v16 = vmul.f32 %v2641_v7, %v2944_v3 }
  0xa8   : > { %v1564_v24 = vadd.f32 %v1532_v45, %v1499_v4  ;;  %v1565_v26 = vadd.f32 %v1533_v42, %v1500_v0  ;;  %v1710_v27 = vsel %vm587_vm3, %v1708_v52, %v1709_v21  ;;  %v1950_v46 = vrot.slane %v1844_v11, 2 }
  0xa9   : > { %v1712_v48 = vsel %vm587_vm3, %v1709_v21, %v1711_v9  ;;  %v1952_v58 = vrot.slane %v1845_v15, 2  ;;  %v477_v28 = vmul.f32 %v2641_v7, %v2951_v22  ;;  %v518_v30 = vmul.f32 %v2628_v5, %v2944_v3 }
  0xaa   : > { %v1805_v53 = vadd.f32 %v1710_v27, %v1564_v24  ;;  %v1806_v38 = vadd.f32 %v1712_v48, %v1565_v26  ;;  %v1951_v31 = vsel %vm829_vm4, %v1949_v8, %v1950_v46  ;;  %v519_v18 = vmul.f32 %v2628_v5, %v2951_v22  ;;  %v3286_v48 = vld [vmem:[#allocation2 + $0x110] sm:$0xff] }
  0xab   : > { %v1953_v35 = vsel %vm829_vm4, %v1950_v46, %v1952_v58  ;;  %v520_v36 = vmul.f32 %v2628_v5, %v2959_v34  ;;  %v633_v45 = vrot.slane %v518_v30, 1  ;;  %v760_v42 = vmul.f32 %v2630_v6, %v2944_v3  ;;  %v3264_v3 = vld [vmem:[%s4040_s2] ss:$0 sm:$0xff]  ;;  %v3284_v46 = vld [vmem:[#allocation2 + $0x108] sm:$0xff] }
  0xac   : > { %v2046_v61 = vadd.f32 %v1951_v31, %v1805_v53  ;;  %v2047_v49 = vadd.f32 %v1953_v35, %v1806_v38  ;;  %v634_v43 = vrot.slane %v519_v18, 1  ;;  %v761_v1 = vmul.f32 %v2630_v6, %v2951_v22  ;;  %v3295_v35 = vld [vmem:[#allocation2 + $0x118] sm:$0x3] }
  0xad   : > { %v636_v50 = vrot.slane %v520_v36, 1  ;;  %v762_v55 = vmul.f32 %v2630_v6, %v2959_v34  ;;  %v875_v51 = vrot.slane %v760_v42, 2  ;;  %v993_v63 = vmul.f32 %v2665_v29, %v2973_v57 }
  0xae   : > { %v2082_v13 = vmul.f32 %v2771_v39, %v2046_v61  ;;  %v2083_v2 = vmul.f32 %v3264_v3, %v2047_v49  ;;  %v635_v52 = vsel %vm587_vm3, %v633_v45, %v634_v43  ;;  %v876_v22 = vrot.slane %v761_v1, 2  ;;  %v3274_v39 = vld [vmem:[%s4041_s3] ss:$0 sm:$0xff] }
  0xaf   : > { %v637_v20 = vsel %vm587_vm3, %v634_v43, %v636_v50  ;;  %v718_v4 = vadd.f32 %v635_v52, %v476_v16  ;;  %v878_v34 = vrot.slane %v762_v55, 2  ;;  %v994_v0 = vmul.f32 %v2665_v29, %v2975_v60 }
  0xb0   : > { %v2118_v21 = vadd.f32 %v3274_v39, %v2082_v13  ;;  %v2119_v11 = vadd.f32 %v3274_v39, %v2083_v2  ;;  %v719_v9 = vadd.f32 %v637_v20, %v477_v28  ;;  %v877_v15 = vsel %vm829_vm4, %v875_v51, %v876_v22 }
  0xb1   : > { %v879_v8 = vsel %vm829_vm4, %v876_v22, %v878_v34  ;;  %v960_v24 = vadd.f32 %v877_v15, %v718_v4  ;;  %v1067_v16 = vmul.f32 %v2669_v32, %v2973_v57  ;;  %v1068_v26 = vmul.f32 %v2669_v32, %v2975_v60 }
  0xb2   : > { %v2145_v27 = vpack.c.bf16 %v2119_v11, %v2118_v21  ;;  %v961_v58 = vadd.f32 %v879_v8, %v719_v9  ;;  %v1069_v28 = vmul.f32 %v2669_v32, %v2985_v12  ;;  %v1308_v30 = vmul.f32 %v2671_v33, %v2973_v57 }
  0xb3   : > { %v1025_v53 = vadd.f32 %v993_v63, %v960_v24  ;;  %v1181_v38 = vrot.slane %v1067_v16, 1  ;;  %v1182_v31 = vrot.slane %v1068_v26, 1  ;;  %v1309_v18 = vmul.f32 %v2671_v33, %v2975_v60 }
  0xb4   : > { %2472 = vmatmul.msk.bf16.gmra.mxu1 %vm312_vm1, %v2145_v27  ;;  %v1026_v36 = vadd.f32 %v994_v0, %v961_v58  ;;  %v1184_v45 = vrot.slane %v1069_v28, 1  ;;  %v1310_v42 = vmul.f32 %v2671_v33, %v2985_v12  ;;  %v1422_v61 = vrot.slane %v1308_v30, 2 }
  0xb5   : > { %v1183_v49 = vsel %vm587_vm3, %v1181_v38, %v1182_v31  ;;  %v1423_v43 = vrot.slane %v1309_v18, 2  ;;  %v1540_v57 = vmul.f32 %v2683_v40, %v3284_v46  ;;  %v1541_v1 = vmul.f32 %v2683_v40, %v3286_v48 }
  0xb6   : > { %v1185_v60 = vsel %vm587_vm3, %v1182_v31, %v1184_v45  ;;  %v1266_v50 = vadd.f32 %v1183_v49, %v1025_v53  ;;  %v1425_v55 = vrot.slane %v1310_v42, 2  ;;  %v1614_v51 = vmul.f32 %v2685_v41, %v3284_v46 }
  0xb7   : > { %v1267_v63 = vadd.f32 %v1185_v60, %v1026_v36  ;;  %v1424_v12 = vsel %vm829_vm4, %v1422_v61, %v1423_v43  ;;  %v1615_v13 = vmul.f32 %v2685_v41, %v3286_v48  ;;  %v1616_v2 = vmul.f32 %v2685_v41, %v3295_v35 }
  0xb8   : > { %v1426_v52 = vsel %vm829_vm4, %v1423_v43, %v1425_v55  ;;  %v1507_v22 = vadd.f32 %v1424_v12, %v1266_v50  ;;  %v1728_v20 = vrot.slane %v1614_v51, 1  ;;  %v1855_v4 = vmul.f32 %v3230_v62, %v3284_v46 }
  0xb9   : > { %v1508_v34 = vadd.f32 %v1426_v52, %v1267_v63  ;;  %v1729_v0 = vrot.slane %v1615_v13, 1  ;;  %v1731_v21 = vrot.slane %v1616_v2, 1  ;;  %v1856_v11 = vmul.f32 %v3230_v62, %v3286_v48 }
  0xba   : > { %v1572_v9 = vadd.f32 %v1540_v57, %v1507_v22  ;;  %v1857_v15 = vmul.f32 %v3230_v62, %v3295_v35  ;;  %v1969_v8 = vrot.slane %v1855_v4, 2  ;;  %v484_v24 = vmul.f32 %v2641_v7, %v3021_v25 }
  0xbb   : > { %v1573_v16 = vadd.f32 %v1541_v1, %v1508_v34  ;;  %v1730_v26 = vsel %vm587_vm3, %v1728_v20, %v1729_v0  ;;  %v1732_v27 = vsel %vm587_vm3, %v1729_v0, %v1731_v21  ;;  %v1970_v58 = vrot.slane %v1856_v11, 2  ;;  %v3352_v11 = vld [vmem:[#allocation2 + $0x168] sm:$0xff] }
  0xbc   : > { %v1813_v28 = vadd.f32 %v1730_v26, %v1572_v9  ;;  %v1972_v30 = vrot.slane %v1857_v15, 2  ;;  %v485_v53 = vmul.f32 %v2641_v7, %v3026_v37  ;;  %v530_v38 = vmul.f32 %v2628_v5, %v3021_v25  ;;  %v3359_v26 = vld [vmem:[#allocation2 + $0x170] sm:$0xff] }
  0xbd   : > { %v1814_v31 = vadd.f32 %v1732_v27, %v1573_v16  ;;  %v1971_v18 = vsel %vm829_vm4, %v1969_v8, %v1970_v58  ;;  %v531_v36 = vmul.f32 %v2628_v5, %v3026_v37  ;;  %v532_v45 = vmul.f32 %v2628_v5, %v3035_v56 }
  0xbe   : > { %v1973_v42 = vsel %vm829_vm4, %v1970_v58, %v1972_v30  ;;  %v2054_v61 = vadd.f32 %v1971_v18, %v1813_v28  ;;  %v653_v49 = vrot.slane %v530_v38, 1  ;;  %v772_v43 = vmul.f32 %v2630_v6, %v3021_v25  ;;  %v3366_v18 = vld [vmem:[#allocation2 + $0x178] sm:$0x3] }
  0xbf   : > { %v2055_v57 = vadd.f32 %v1973_v42, %v1814_v31  ;;  %v654_v1 = vrot.slane %v531_v36, 1  ;;  %v656_v60 = vrot.slane %v532_v45, 1  ;;  %v773_v50 = vmul.f32 %v2630_v6, %v3026_v37 }
  0xc0   : > { %v2090_v55 = vmul.f32 %v3264_v3, %v2054_v61  ;;  %v774_v51 = vmul.f32 %v2630_v6, %v3035_v56  ;;  %v895_v63 = vrot.slane %v772_v43, 2  ;;  %v1001_v12 = vmul.f32 %v2665_v29, %v3046_v17 }
  0xc1   : > { %v2091_v13 = vmul.f32 %v3264_v3, %v2055_v57  ;;  %v655_v2 = vsel %vm587_vm3, %v653_v49, %v654_v1  ;;  %v657_v25 = vsel %vm587_vm3, %v654_v1, %v656_v60  ;;  %v896_v52 = vrot.slane %v773_v50, 2 }
  0xc2   : > { %v2126_v22 = vadd.f32 %v3274_v39, %v2090_v55  ;;  %v726_v20 = vadd.f32 %v655_v2, %v484_v24  ;;  %v727_v37 = vadd.f32 %v657_v25, %v485_v53  ;;  %v898_v4 = vrot.slane %v774_v51, 2 }
  0xc3   : > { %v2127_v34 = vadd.f32 %v3274_v39, %v2091_v13  ;;  %v897_v56 = vsel %vm829_vm4, %v895_v63, %v896_v52  ;;  %v1002_v0 = vmul.f32 %v2665_v29, %v3054_v19  ;;  %v1079_v21 = vmul.f32 %v2669_v32, %v3046_v17 }
  0xc4   : > { %v899_v9 = vsel %vm829_vm4, %v896_v52, %v898_v4  ;;  %v968_v15 = vadd.f32 %v897_v56, %v726_v20  ;;  %v1080_v8 = vmul.f32 %v2669_v32, %v3054_v19  ;;  %v1081_v24 = vmul.f32 %v2669_v32, %v3061_v44 }
  0xc5   : > { %v2149_v16 = vpack.c.bf16 %v2127_v34, %v2126_v22  ;;  %v969_v27 = vadd.f32 %v899_v9, %v727_v37  ;;  %v1201_v58 = vrot.slane %v1079_v21, 1  ;;  %v1320_v28 = vmul.f32 %v2671_v33, %v3046_v17 }
  0xc6   : > { %v1033_v30 = vadd.f32 %v1001_v12, %v968_v15  ;;  %v1202_v53 = vrot.slane %v1080_v8, 1  ;;  %v1204_v38 = vrot.slane %v1081_v24, 1  ;;  %v1321_v31 = vmul.f32 %v2671_v33, %v3054_v19 }
  0xc7   : > { %2476 = vmatmul.msk.bf16.gmra.mxu2 %vm312_vm1, %v2149_v16  ;;  %v1034_v36 = vadd.f32 %v1002_v0, %v969_v27  ;;  %v1322_v45 = vmul.f32 %v2671_v33, %v3061_v44  ;;  %v1442_v42 = vrot.slane %v1320_v28, 2  ;;  %v1548_v61 = vmul.f32 %v2683_v40, %v3352_v11  ;;  %v2507_v0 = vld [vmem:[#allocation2 + $0x30] sm:$0xff] }
  0xc8   : > { %v1203_v17 = vsel %vm587_vm3, %v1201_v58, %v1202_v53  ;;  %v1205_v49 = vsel %vm587_vm3, %v1202_v53, %v1204_v38  ;;  %v1443_v43 = vrot.slane %v1321_v31, 2  ;;  %v1549_v19 = vmul.f32 %v2683_v40, %v3359_v26  ;;  %v2508_v58 = vld [vmem:[#allocation2 + $0x38] sm:$0xff] }
  0xc9   : > { %v1274_v57 = vadd.f32 %v1203_v17, %v1033_v30  ;;  %v1275_v1 = vadd.f32 %v1205_v49, %v1034_v36  ;;  %v1445_v60 = vrot.slane %v1322_v45, 2  ;;  %v1626_v50 = vmul.f32 %v2685_v41, %v3352_v11  ;;  %v2509_v36 = vld [vmem:[#allocation2 + $0x40] sm:$0x3] }
  0xca   : > { %v1444_v44 = vsel %vm829_vm4, %v1442_v42, %v1443_v43  ;;  %v1627_v55 = vmul.f32 %v2685_v41, %v3359_v26  ;;  %v1628_v51 = vmul.f32 %v2685_v41, %v3366_v18  ;;  %v1867_v63 = vmul.f32 %v3230_v62, %v3352_v11 }
  0xcb   : > { %v1446_v12 = vsel %vm829_vm4, %v1443_v43, %v1445_v60  ;;  %v1515_v13 = vadd.f32 %v1444_v44, %v1274_v57  ;;  %v1748_v2 = vrot.slane %v1626_v50, 1  ;;  %v1868_v25 = vmul.f32 %v3230_v62, %v3359_v26 }
  0xcc   : > { %v1516_v52 = vadd.f32 %v1446_v12, %v1275_v1  ;;  %v1749_v22 = vrot.slane %v1627_v55, 1  ;;  %v1751_v20 = vrot.slane %v1628_v51, 1  ;;  %v1869_v37 = vmul.f32 %v3230_v62, %v3366_v18 }
  0xcd   : > { %v1580_v4 = vadd.f32 %v1548_v61, %v1515_v13  ;;  %v1989_v34 = vrot.slane %v1867_v63, 2  ;;  %v1990_v56 = vrot.slane %v1868_v25, 2  ;;  %v462_v21 = vmul.f32 %v2507_v0, %v2641_v7 }
  0xce   : > { %v1581_v9 = vadd.f32 %v1549_v19, %v1516_v52  ;;  %v1750_v15 = vsel %vm587_vm3, %v1748_v2, %v1749_v22  ;;  %v1752_v8 = vsel %vm587_vm3, %v1749_v22, %v1751_v20  ;;  %v1992_v24 = vrot.slane %v1869_v37, 2 }
  0xcf   : > { %v1821_v16 = vadd.f32 %v1750_v15, %v1580_v4  ;;  %v1991_v27 = vsel %vm829_vm4, %v1989_v34, %v1990_v56  ;;  %v463_v28 = vmul.f32 %v2508_v58, %v2641_v7  ;;  %v497_v30 = vmul.f32 %v2507_v0, %v2628_v5 }
  0xd0   : > { %v1822_v53 = vadd.f32 %v1752_v8, %v1581_v9  ;;  %v1993_v38 = vsel %vm829_vm4, %v1990_v56, %v1992_v24  ;;  %v498_v31 = vmul.f32 %v2508_v58, %v2628_v5  ;;  %v499_v45 = vmul.f32 %v2509_v36, %v2628_v5 }
  0xd1   : > { %v2062_v42 = vadd.f32 %v1991_v27, %v1821_v16  ;;  %v598_v61 = vrot.slane %v497_v30, 1  ;;  %v739_v17 = vmul.f32 %v2507_v0, %v2630_v6  ;;  %v740_v49 = vmul.f32 %v2508_v58, %v2630_v6 }
  0xd2   : > { %v2063_v43 = vadd.f32 %v1993_v38, %v1822_v53  ;;  %v599_v19 = vrot.slane %v498_v31, 1  ;;  %v601_v57 = vrot.slane %v499_v45, 1  ;;  %v741_v1 = vmul.f32 %v2509_v36, %v2630_v6  ;;  %v3427_v36 = vld [vmem:[#allocation2 + $0x60] sm:$0xff] }
  0xd3   : > { %v2098_v60 = vmul.f32 %v3264_v3, %v2062_v42  ;;  %v840_v50 = vrot.slane %v739_v17, 2  ;;  %v841_v44 = vrot.slane %v740_v49, 2  ;;  %v979_v55 = vmul.f32 %v2665_v29, %v3121_v10  ;;  %v311_v42 = vld [vmem:[%s2637_s10 + $0xf8] sm:$0xff]  ;;  %v3435_v17 = vld [vmem:[#allocation2 + $0x68] sm:$0xff] }
  0xd4   : > { %v2099_v51 = vmul.f32 %v3264_v3, %v2063_v43  ;;  %v600_v63 = vsel %vm587_vm3, %v598_v61, %v599_v19  ;;  %v602_v12 = vsel %vm587_vm3, %v599_v19, %v601_v57  ;;  %v843_v13 = vrot.slane %v741_v1, 2  ;;  %400 = vst.msk [vmem:[#allocation2 + $0x189] sm:$0xff] %vm312_vm1, %v311_v42 }
  0xd5   : > { %v2134_v2 = vadd.f32 %v3274_v39, %v2098_v60  ;;  %v704_v25 = vadd.f32 %v600_v63, %v462_v21  ;;  %v705_v52 = vadd.f32 %v602_v12, %v463_v28  ;;  %v842_v22 = vsel %vm829_vm4, %v840_v50, %v841_v44  ;;  %v3446_v50 = vld [vmem:[#allocation2 + $0x70] sm:$0x3] }
  0xd6   : > { %v2135_v20 = vadd.f32 %v3274_v39, %v2099_v51  ;;  %v844_v37 = vsel %vm829_vm4, %v841_v44, %v843_v13  ;;  %v980_v4 = vmul.f32 %v2665_v29, %v3125_v47  ;;  %v1046_v34 = vmul.f32 %v2669_v32, %v3121_v10 }
  0xd7   : > { %v946_v56 = vadd.f32 %v842_v22, %v704_v25  ;;  %v947_v0 = vadd.f32 %v844_v37, %v705_v52  ;;  %v1047_v9 = vmul.f32 %v2669_v32, %v3125_v47  ;;  %v1048_v21 = vmul.f32 %v2669_v32, %v3134_v14 }
  0xd8   : > { %v2153_v15 = vpack.c.bf16 %v2135_v20, %v2134_v2  ;;  %v1146_v8 = vrot.slane %v1046_v34, 1  ;;  %v1287_v24 = vmul.f32 %v2671_v33, %v3121_v10  ;;  %v1288_v16 = vmul.f32 %v2671_v33, %v3125_v47  ;;  %v310_v10 = vld [vmem:[%s2637_s10 + $0xf0] sm:$0xff] }
  0xd9   : > { %v1011_v27 = vadd.f32 %v979_v55, %v946_v56  ;;  %v1012_v58 = vadd.f32 %v980_v4, %v947_v0  ;;  %v1147_v28 = vrot.slane %v1047_v9, 1  ;;  %v1149_v30 = vrot.slane %v1048_v21, 1  ;;  %399 = vst.msk [vmem:[#allocation2 + $0x181] sm:$0xff] %vm312_vm1, %v310_v10  ;;  %v2513_v56 = vld [vmem:[#allocation2 + $0x90] sm:$0xff] }
  0xda   : > { %2480 = vmatmul.msk.bf16.gmra.mxu3 %vm312_vm1, %v2153_v15  ;;  %v1289_v53 = vmul.f32 %v2671_v33, %v3134_v14  ;;  %v1387_v38 = vrot.slane %v1287_v24, 2  ;;  %v1388_v31 = vrot.slane %v1288_v16, 2  ;;  %v1526_v45 = vmul.f32 %v3427_v36, %v2683_v40 }
  0xdb   : > { %v1148_v47 = vsel %vm587_vm3, %v1146_v8, %v1147_v28  ;;  %v1150_v61 = vsel %vm587_vm3, %v1147_v28, %v1149_v30  ;;  %v1527_v49 = vmul.f32 %v3435_v17, %v2683_v40  ;;  %v1593_v14 = vmul.f32 %v3427_v36, %v2685_v41  ;;  %v2514_v8 = vld [vmem:[#allocation2 + $0x98] sm:$0xff] }
  0xdc   : > { %v1252_v43 = vadd.f32 %v1148_v47, %v1011_v27  ;;  %v1253_v19 = vadd.f32 %v1150_v61, %v1012_v58  ;;  %v1389_v57 = vsel %vm829_vm4, %v1387_v38, %v1388_v31  ;;  %v1390_v1 = vrot.slane %v1289_v53, 2  ;;  %v2515_v38 = vld [vmem:[#allocation2 + $0xa0] sm:$0x3] }
  0xdd   : > { %v1594_v60 = vmul.f32 %v3435_v17, %v2685_v41  ;;  %v1595_v44 = vmul.f32 %v3446_v50, %v2685_v41  ;;  %v1693_v55 = vrot.slane %v1593_v14, 1  ;;  %v1834_v51 = vmul.f32 %v3427_v36, %v3230_v62 }
  0xde   : > { %v1391_v63 = vsel %vm829_vm4, %v1388_v31, %v1390_v1  ;;  %v1493_v12 = vadd.f32 %v1389_v57, %v1252_v43  ;;  %v1835_v13 = vmul.f32 %v3435_v17, %v3230_v62  ;;  %v1836_v2 = vmul.f32 %v3446_v50, %v3230_v62 }
  0xdf   : > { %v1494_v25 = vadd.f32 %v1391_v63, %v1253_v19  ;;  %v1694_v52 = vrot.slane %v1594_v60, 1  ;;  %v1696_v22 = vrot.slane %v1595_v44, 1  ;;  %v1934_v20 = vrot.slane %v1834_v51, 2 }
  0xe0   : > { %v1558_v37 = vadd.f32 %v1526_v45, %v1493_v12  ;;  %v1935_v4 = vrot.slane %v1835_v13, 2  ;;  %v1937_v34 = vrot.slane %v1836_v2, 2  ;;  %v470_v0 = vmul.f32 %v2513_v56, %v2641_v7 }
  0xe1   : > { %v1559_v9 = vadd.f32 %v1527_v49, %v1494_v25  ;;  %v1695_v21 = vsel %vm587_vm3, %v1693_v55, %v1694_v52  ;;  %v1697_v15 = vsel %vm587_vm3, %v1694_v52, %v1696_v22  ;;  %v471_v24 = vmul.f32 %v2514_v8, %v2641_v7 }
  0xe2   : > { %v1799_v16 = vadd.f32 %v1695_v21, %v1558_v37  ;;  %v1936_v27 = vsel %vm829_vm4, %v1934_v20, %v1935_v4  ;;  %v1938_v58 = vsel %vm829_vm4, %v1935_v4, %v1937_v34  ;;  %v509_v28 = vmul.f32 %v2513_v56, %v2628_v5 }
  0xe3   : > { %v1800_v30 = vadd.f32 %v1697_v15, %v1559_v9  ;;  %v510_v53 = vmul.f32 %v2514_v8, %v2628_v5  ;;  %v511_v31 = vmul.f32 %v2515_v38, %v2628_v5  ;;  %v751_v45 = vmul.f32 %v2513_v56, %v2630_v6 }
  0xe4   : > { %v2040_v10 = vadd.f32 %v1936_v27, %v1799_v16  ;;  %v618_v42 = vrot.slane %v509_v28, 1  ;;  %v752_v47 = vmul.f32 %v2514_v8, %v2630_v6  ;;  %v753_v61 = vmul.f32 %v2515_v38, %v2630_v6 }
  0xe5   : > { %v2041_v49 = vadd.f32 %v1938_v58, %v1800_v30  ;;  %v619_v14 = vrot.slane %v510_v53, 1  ;;  %v621_v43 = vrot.slane %v511_v31, 1  ;;  %v860_v19 = vrot.slane %v751_v45, 2  ;;  %v3495_v31 = vld [vmem:[#allocation2 + $0xc0] sm:$0xff] }
  0xe6   : > { %v2076_v57 = vmul.f32 %v3264_v3, %v2040_v10  ;;  %v861_v1 = vrot.slane %v752_v47, 2  ;;  %v863_v60 = vrot.slane %v753_v61, 2  ;;  %v987_v44 = vmul.f32 %v2665_v29, %v3196_v23 }
  0xe7   : > { %v2077_v55 = vmul.f32 %v3264_v3, %v2041_v49  ;;  %v620_v51 = vsel %vm587_vm3, %v618_v42, %v619_v14  ;;  %v622_v63 = vsel %vm587_vm3, %v619_v14, %v621_v43  ;;  %v988_v12 = vmul.f32 %v2665_v29, %v3198_v54  ;;  %v3500_v42 = vld [vmem:[#allocation2 + $0xc8] sm:$0xff] }
  0xe8   : > { %v2112_v13 = vadd.f32 %v3274_v39, %v2076_v57  ;;  %v712_v2 = vadd.f32 %v620_v51, %v470_v0  ;;  %v713_v25 = vadd.f32 %v622_v63, %v471_v24  ;;  %v862_v52 = vsel %vm829_vm4, %v860_v19, %v861_v1  ;;  %v3510_v57 = vld [vmem:[#allocation2 + $0xd0] sm:$0x3] }
  0xe9   : > { %v2113_v22 = vadd.f32 %v3274_v39, %v2077_v55  ;;  %v864_v20 = vsel %vm829_vm4, %v861_v1, %v863_v60  ;;  %v1058_v37 = vmul.f32 %v2669_v32, %v3196_v23  ;;  %v1059_v4 = vmul.f32 %v2669_v32, %v3198_v54 }
  0xea   : > { %v954_v34 = vadd.f32 %v862_v52, %v712_v2  ;;  %v955_v56 = vadd.f32 %v864_v20, %v713_v25  ;;  %v1060_v9 = vmul.f32 %v2669_v32, %v3211_v59  ;;  %v1299_v0 = vmul.f32 %v2671_v33, %v3196_v23 }
  0xeb   : > { %v2142_v21 = vpack.c.bf16 %v2113_v22, %v2112_v13  ;;  %v1166_v15 = vrot.slane %v1058_v37, 1  ;;  %v1167_v8 = vrot.slane %v1059_v4, 1  ;;  %v1300_v24 = vmul.f32 %v2671_v33, %v3198_v54  ;;  %v2519_v37 = vld [vmem:[#allocation2 + $0xf0] sm:$0xff] }
  0xec   : > { %v1019_v16 = vadd.f32 %v987_v44, %v954_v34  ;;  %v1020_v27 = vadd.f32 %v988_v12, %v955_v56  ;;  %v1169_v58 = vrot.slane %v1060_v9, 1  ;;  %v1301_v28 = vmul.f32 %v2671_v33, %v3211_v59 }
  0xed   : > { %2469 = vmatmul.msk.bf16.gmra.mxu0 %vm312_vm1, %v2142_v21  ;;  %v1168_v30 = vsel %vm587_vm3, %v1166_v15, %v1167_v8  ;;  %v1407_v53 = vrot.slane %v1299_v0, 2  ;;  %v1408_v38 = vrot.slane %v1300_v24, 2  ;;  %v1534_v23 = vmul.f32 %v3495_v31, %v2683_v40  ;;  %v2520_v0 = vld [vmem:[#allocation2 + $0xf8] sm:$0xff] }
  0xee   : > { %v1170_v45 = vsel %vm587_vm3, %v1167_v8, %v1169_v58  ;;  %v1260_v54 = vadd.f32 %v1168_v30, %v1019_v16  ;;  %v1410_v10 = vrot.slane %v1301_v28, 2  ;;  %v1535_v59 = vmul.f32 %v3500_v42, %v2683_v40  ;;  %v2521_v28 = vld [vmem:[#allocation2 + $0x100] sm:$0x3] }
  0xef   : > { %v1261_v47 = vadd.f32 %v1170_v45, %v1020_v27  ;;  %v1409_v61 = vsel %vm829_vm4, %v1407_v53, %v1408_v38  ;;  %v1605_v49 = vmul.f32 %v3495_v31, %v2685_v41  ;;  %v1606_v14 = vmul.f32 %v3500_v42, %v2685_v41 }
  0xf0   : > { %v1411_v43 = vsel %vm829_vm4, %v1408_v38, %v1410_v10  ;;  %v1501_v19 = vadd.f32 %v1409_v61, %v1260_v54  ;;  %v1607_v1 = vmul.f32 %v3510_v57, %v2685_v41  ;;  %v1846_v60 = vmul.f32 %v3495_v31, %v3230_v62 }
  0xf1   : > { %v1502_v44 = vadd.f32 %v1411_v43, %v1261_v47  ;;  %v1713_v55 = vrot.slane %v1605_v49, 1  ;;  %v1714_v51 = vrot.slane %v1606_v14, 1  ;;  %v1847_v63 = vmul.f32 %v3500_v42, %v3230_v62 }
  0xf2   : > { %v1566_v12 = vadd.f32 %v1534_v23, %v1501_v19  ;;  %v1716_v13 = vrot.slane %v1607_v1, 1  ;;  %v1848_v2 = vmul.f32 %v3510_v57, %v3230_v62  ;;  %v1954_v25 = vrot.slane %v1846_v60, 2 }
  0xf3   : > { %v1567_v52 = vadd.f32 %v1535_v59, %v1502_v44  ;;  %v1715_v22 = vsel %vm587_vm3, %v1713_v55, %v1714_v51  ;;  %v1955_v20 = vrot.slane %v1847_v63, 2  ;;  %v478_v4 = vmul.f32 %v2519_v37, %v2641_v7 }
  0xf4   : > { %v1717_v34 = vsel %vm587_vm3, %v1714_v51, %v1716_v13  ;;  %v1807_v56 = vadd.f32 %v1715_v22, %v1566_v12  ;;  %v1957_v9 = vrot.slane %v1848_v2, 2  ;;  %v479_v21 = vmul.f32 %v2520_v0, %v2641_v7 }
  0xf5   : > { %v1808_v15 = vadd.f32 %v1717_v34, %v1567_v52  ;;  %v1956_v8 = vsel %vm829_vm4, %v1954_v25, %v1955_v20  ;;  %v521_v24 = vmul.f32 %v2519_v37, %v2628_v5  ;;  %v522_v16 = vmul.f32 %v2520_v0, %v2628_v5 }
  0xf6   : > { %v1958_v27 = vsel %vm829_vm4, %v1955_v20, %v1957_v9  ;;  %v2048_v58 = vadd.f32 %v1956_v8, %v1807_v56  ;;  %v523_v30 = vmul.f32 %v2521_v28, %v2628_v5  ;;  %v763_v53 = vmul.f32 %v2519_v37, %v2630_v6 }
  0xf7   : > { %v2049_v38 = vadd.f32 %v1958_v27, %v1808_v15  ;;  %v638_v23 = vrot.slane %v521_v24, 1  ;;  %v639_v45 = vrot.slane %v522_v16, 1  ;;  %v764_v54 = vmul.f32 %v2520_v0, %v2630_v6 }
  0xf8   : > { %v2084_v10 = vmul.f32 %v3264_v3, %v2048_v58  ;;  %v641_v59 = vrot.slane %v523_v30, 1  ;;  %v765_v47 = vmul.f32 %v2521_v28, %v2630_v6  ;;  %v880_v61 = vrot.slane %v763_v53, 2  ;;  %v3558_v28 = vld [vmem:[#allocation2 + $0x120] sm:$0xff]  ;;  %v3562_v30 = vld [vmem:[#allocation2 + $0x128] sm:$0xff] }
  0xf9   : > { %v2085_v49 = vmul.f32 %v3264_v3, %v2049_v38  ;;  %v640_v14 = vsel %vm587_vm3, %v638_v23, %v639_v45  ;;  %v881_v43 = vrot.slane %v764_v54, 2  ;;  %v995_v19 = vmul.f32 %v2665_v29, %v3284_v46 }
  0xfa   : > { %v2120_v1 = vadd.f32 %v3274_v39, %v2084_v10  ;;  %v642_v60 = vsel %vm587_vm3, %v639_v45, %v641_v59  ;;  %v720_v44 = vadd.f32 %v640_v14, %v478_v4  ;;  %v883_v55 = vrot.slane %v765_v47, 2  ;;  %v3572_v59 = vld [vmem:[#allocation2 + $0x130] sm:$0x3] }
  0xfb   : > { %v2121_v51 = vadd.f32 %v3274_v39, %v2085_v49  ;;  %v721_v63 = vadd.f32 %v642_v60, %v479_v21  ;;  %v882_v12 = vsel %vm829_vm4, %v880_v61, %v881_v43  ;;  %v996_v13 = vmul.f32 %v2665_v29, %v3286_v48 }
  0xfc   : > { %v884_v2 = vsel %vm829_vm4, %v881_v43, %v883_v55  ;;  %v962_v25 = vadd.f32 %v882_v12, %v720_v44  ;;  %v1070_v52 = vmul.f32 %v2669_v32, %v3284_v46  ;;  %v1071_v22 = vmul.f32 %v2669_v32, %v3286_v48  ;;  %v2525_v12 = vld [vmem:[#allocation2 + $0x150] sm:$0xff] }
  0xfd   : > { %v2146_v20 = vpack.c.bf16 %v2121_v51, %v2120_v1  ;;  %v963_v37 = vadd.f32 %v884_v2, %v721_v63  ;;  %v1072_v4 = vmul.f32 %v2669_v32, %v3295_v35  ;;  %v1311_v34 = vmul.f32 %v2671_v33, %v3284_v46 }
  0xfe   : > { %v1027_v56 = vadd.f32 %v995_v19, %v962_v25  ;;  %v1186_v9 = vrot.slane %v1070_v52, 1  ;;  %v1187_v0 = vrot.slane %v1071_v22, 1  ;;  %v1312_v21 = vmul.f32 %v2671_v33, %v3286_v48 }
  0xff   : > { %2473 = vmatmul.msk.bf16.gmra.mxu1 %vm312_vm1, %v2146_v20  ;;  %v1028_v15 = vadd.f32 %v996_v13, %v963_v37  ;;  %v1189_v8 = vrot.slane %v1072_v4, 1  ;;  %v1313_v24 = vmul.f32 %v2671_v33, %v3295_v35  ;;  %v1427_v16 = vrot.slane %v1311_v34, 2  ;;  %v2526_v4 = vld [vmem:[#allocation2 + $0x158] sm:$0xff] }
 0x100   : > { %v1188_v27 = vsel %vm587_vm3, %v1186_v9, %v1187_v0  ;;  %v1428_v58 = vrot.slane %v1312_v21, 2  ;;  %v1542_v46 = vmul.f32 %v3558_v28, %v2683_v40  ;;  %v1543_v48 = vmul.f32 %v3562_v30, %v2683_v40 }
 0x101   : > { %v1190_v53 = vsel %vm587_vm3, %v1187_v0, %v1189_v8  ;;  %v1268_v38 = vadd.f32 %v1188_v27, %v1027_v56  ;;  %v1430_v23 = vrot.slane %v1313_v24, 2  ;;  %v1617_v35 = vmul.f32 %v3558_v28, %v2685_v41 }
 0x102   : > { %v1269_v45 = vadd.f32 %v1190_v53, %v1028_v15  ;;  %v1429_v54 = vsel %vm829_vm4, %v1427_v16, %v1428_v58  ;;  %v1618_v10 = vmul.f32 %v3562_v30, %v2685_v41  ;;  %v1619_v47 = vmul.f32 %v3572_v59, %v2685_v41  ;;  %v2527_v15 = vld [vmem:[#allocation2 + $0x160] sm:$0x3] }
 0x103   : > { %v1431_v61 = vsel %vm829_vm4, %v1428_v58, %v1430_v23  ;;  %v1509_v49 = vadd.f32 %v1429_v54, %v1268_v38  ;;  %v1733_v14 = vrot.slane %v1617_v35, 1  ;;  %v1858_v43 = vmul.f32 %v3558_v28, %v3230_v62 }
 0x104   : > { %v1510_v19 = vadd.f32 %v1431_v61, %v1269_v45  ;;  %v1734_v1 = vrot.slane %v1618_v10, 1  ;;  %v1736_v60 = vrot.slane %v1619_v47, 1  ;;  %v1859_v44 = vmul.f32 %v3562_v30, %v3230_v62 }
 0x105   : > { %v1574_v55 = vadd.f32 %v1542_v46, %v1509_v49  ;;  %v1860_v51 = vmul.f32 %v3572_v59, %v3230_v62  ;;  %v1974_v63 = vrot.slane %v1858_v43, 2  ;;  %v486_v13 = vmul.f32 %v2525_v12, %v2641_v7 }
 0x106   : > { %v1575_v2 = vadd.f32 %v1543_v48, %v1510_v19  ;;  %v1735_v25 = vsel %vm587_vm3, %v1733_v14, %v1734_v1  ;;  %v1737_v52 = vsel %vm587_vm3, %v1734_v1, %v1736_v60  ;;  %v1975_v22 = vrot.slane %v1859_v44, 2 }
 0x107   : > { %v1815_v20 = vadd.f32 %v1735_v25, %v1574_v55  ;;  %v1977_v37 = vrot.slane %v1860_v51, 2  ;;  %v487_v34 = vmul.f32 %v2526_v4, %v2641_v7  ;;  %v533_v56 = vmul.f32 %v2525_v12, %v2628_v5 }
 0x108   : > { %v1816_v9 = vadd.f32 %v1737_v52, %v1575_v2  ;;  %v1976_v0 = vsel %vm829_vm4, %v1974_v63, %v1975_v22  ;;  %v534_v21 = vmul.f32 %v2526_v4, %v2628_v5  ;;  %v535_v8 = vmul.f32 %v2527_v15, %v2628_v5  ;;  %v3608_v63 = vld [vmem:[#allocation2 + $0x180] sm:$0xff] }
 0x109   : > { %v1978_v24 = vsel %vm829_vm4, %v1975_v22, %v1977_v37  ;;  %v2056_v16 = vadd.f32 %v1976_v0, %v1815_v20  ;;  %v658_v27 = vrot.slane %v533_v56, 1  ;;  %v775_v58 = vmul.f32 %v2525_v12, %v2630_v6  ;;  %v3615_v22 = vld [vmem:[#allocation2 + $0x188] sm:$0xff] }
 0x10a   : > { %v2057_v46 = vadd.f32 %v1978_v24, %v1816_v9  ;;  %v659_v48 = vrot.slane %v534_v21, 1  ;;  %v661_v53 = vrot.slane %v535_v8, 1  ;;  %v776_v38 = vmul.f32 %v2526_v4, %v2630_v6  ;;  %v3622_v21 = vld [vmem:[#allocation2 + $0x190] sm:$0x3] }
 0x10b   : > { %v2092_v23 = vmul.f32 %v3264_v3, %v2056_v16  ;;  %v777_v35 = vmul.f32 %v2527_v15, %v2630_v6  ;;  %v900_v45 = vrot.slane %v775_v58, 2  ;;  %v1003_v54 = vmul.f32 %v2665_v29, %v3352_v11 }
 0x10c   : > { %v2093_v10 = vmul.f32 %v3264_v3, %v2057_v46  ;;  %v660_v47 = vsel %vm587_vm3, %v658_v27, %v659_v48  ;;  %v662_v61 = vsel %vm587_vm3, %v659_v48, %v661_v53  ;;  %v901_v49 = vrot.slane %v776_v38, 2 }
 0x10d   : > { %v2128_v14 = vadd.f32 %v3274_v39, %v2092_v23  ;;  %v728_v43 = vadd.f32 %v660_v47, %v486_v13  ;;  %v729_v19 = vadd.f32 %v662_v61, %v487_v34  ;;  %v903_v1 = vrot.slane %v777_v35, 2 }
 0x10e   : > { %v2129_v60 = vadd.f32 %v3274_v39, %v2093_v10  ;;  %v902_v44 = vsel %vm829_vm4, %v900_v45, %v901_v49  ;;  %v1004_v55 = vmul.f32 %v2665_v29, %v3359_v26  ;;  %v1082_v51 = vmul.f32 %v2669_v32, %v3352_v11 }
 0x10f   : > { %v904_v12 = vsel %vm829_vm4, %v901_v49, %v903_v1  ;;  %v970_v2 = vadd.f32 %v902_v44, %v728_v43  ;;  %v1083_v13 = vmul.f32 %v2669_v32, %v3359_v26  ;;  %v1084_v25 = vmul.f32 %v2669_v32, %v3366_v18 }
 0x110   : > { %v2150_v52 = vpack.c.bf16 %v2129_v60, %v2128_v14  ;;  %v971_v20 = vadd.f32 %v904_v12, %v729_v19  ;;  %v1206_v37 = vrot.slane %v1082_v51, 1  ;;  %v1323_v4 = vmul.f32 %v2671_v33, %v3352_v11 }
 0x111   : > { %v1035_v34 = vadd.f32 %v1003_v54, %v970_v2  ;;  %v1207_v56 = vrot.slane %v1083_v13, 1  ;;  %v1209_v9 = vrot.slane %v1084_v25, 1  ;;  %v1324_v0 = vmul.f32 %v2671_v33, %v3359_v26 }
 0x112   : > { %2477 = vmatmul.msk.bf16.gmra.mxu2 %vm312_vm1, %v2150_v52  ;;  %v1036_v15 = vadd.f32 %v1004_v55, %v971_v20  ;;  %v1325_v8 = vmul.f32 %v2671_v33, %v3366_v18  ;;  %v1447_v24 = vrot.slane %v1323_v4, 2  ;;  %v1550_v16 = vmul.f32 %v2683_v40, %v3608_v63  ;;  %v2528_v55 = vld [vmem:[#allocation2 + $0x48] sm:$0xff] }
 0x113   : > { %v1208_v11 = vsel %vm587_vm3, %v1206_v37, %v1207_v56  ;;  %v1210_v27 = vsel %vm587_vm3, %v1207_v56, %v1209_v9  ;;  %v1448_v58 = vrot.slane %v1324_v0, 2  ;;  %v1551_v26 = vmul.f32 %v2683_v40, %v3615_v22  ;;  %v2529_v37 = vld [vmem:[#allocation2 + $0x50] sm:$0xff]  ;;  %v2530_v0 = vld [vmem:[#allocation2 + $0x58] sm:$0x3] }
 0x114   : > { %v1276_v46 = vadd.f32 %v1208_v11, %v1035_v34  ;;  %v1277_v48 = vadd.f32 %v1210_v27, %v1036_v15  ;;  %v1450_v53 = vrot.slane %v1325_v8, 2  ;;  %v1629_v38 = vmul.f32 %v2685_v41, %v3608_v63 }
 0x115   : > { %v1449_v18 = vsel %vm829_vm4, %v1447_v24, %v1448_v58  ;;  %v1630_v23 = vmul.f32 %v2685_v41, %v3615_v22  ;;  %v1631_v35 = vmul.f32 %v2685_v41, %v3622_v21  ;;  %v1870_v45 = vmul.f32 %v3230_v62, %v3608_v63 }
 0x116   : > { %v1451_v54 = vsel %vm829_vm4, %v1448_v58, %v1450_v53  ;;  %v1517_v10 = vadd.f32 %v1449_v18, %v1276_v46  ;;  %v1753_v47 = vrot.slane %v1629_v38, 1  ;;  %v1871_v61 = vmul.f32 %v3230_v62, %v3615_v22 }
 0x117   : > { %v1518_v49 = vadd.f32 %v1451_v54, %v1277_v48  ;;  %v1754_v14 = vrot.slane %v1630_v23, 1  ;;  %v1756_v43 = vrot.slane %v1631_v35, 1  ;;  %v1872_v19 = vmul.f32 %v3230_v62, %v3622_v21 }
 0x118   : > { %v1582_v1 = vadd.f32 %v1550_v16, %v1517_v10  ;;  %v1994_v60 = vrot.slane %v1870_v45, 2  ;;  %v1995_v44 = vrot.slane %v1871_v61, 2  ;;  %v464_v51 = vmul.f32 %v2528_v55, %v2641_v7 }
 0x119   : > { %v1583_v12 = vadd.f32 %v1551_v26, %v1518_v49  ;;  %v1755_v2 = vsel %vm587_vm3, %v1753_v47, %v1754_v14  ;;  %v1757_v13 = vsel %vm587_vm3, %v1754_v14, %v1756_v43  ;;  %v1997_v25 = vrot.slane %v1872_v19, 2 }
 0x11a   : > { %v1823_v52 = vadd.f32 %v1755_v2, %v1582_v1  ;;  %v1996_v20 = vsel %vm829_vm4, %v1994_v60, %v1995_v44  ;;  %v465_v4 = vmul.f32 %v2529_v37, %v2641_v7  ;;  %v500_v62 = vmul.f32 %v2528_v55, %v2628_v5 }
 0x11b   : > { %v1824_v34 = vadd.f32 %v1757_v13, %v1583_v12  ;;  %v1998_v56 = vsel %vm829_vm4, %v1995_v44, %v1997_v25  ;;  %v501_v9 = vmul.f32 %v2529_v37, %v2628_v5  ;;  %v502_v15 = vmul.f32 %v2530_v0, %v2628_v5 }
 0x11c   : > { %v2064_v8 = vadd.f32 %v1996_v20, %v1823_v52  ;;  %v603_v24 = vrot.slane %v500_v62, 1  ;;  %v742_v16 = vmul.f32 %v2528_v55, %v2630_v6  ;;  %v743_v11 = vmul.f32 %v2529_v37, %v2630_v6 }
 0x11d   : > { %v2065_v27 = vadd.f32 %v1998_v56, %v1824_v34  ;;  %v604_v58 = vrot.slane %v501_v9, 1  ;;  %v606_v26 = vrot.slane %v502_v15, 1  ;;  %v744_v46 = vmul.f32 %v2530_v0, %v2630_v6  ;;  %v2531_v34 = vld [vmem:[#allocation2 + $0x78] sm:$0xff]  ;;  %v2532_v0 = vld [vmem:[#allocation2 + $0x80] sm:$0xff] }
 0x11e   : > { %v2100_v48 = vmul.f32 %v3264_v3, %v2064_v8  ;;  %v845_v53 = vrot.slane %v742_v16, 2  ;;  %v846_v38 = vrot.slane %v743_v11, 2  ;;  %v981_v18 = vmul.f32 %v3427_v36, %v2665_v29 }
 0x11f   : > { %v2101_v23 = vmul.f32 %v3264_v3, %v2065_v27  ;;  %v605_v35 = vsel %vm587_vm3, %v603_v24, %v604_v58  ;;  %v607_v45 = vsel %vm587_vm3, %v604_v58, %v606_v26  ;;  %v848_v54 = vrot.slane %v744_v46, 2  ;;  %v2533_v27 = vld [vmem:[#allocation2 + $0x88] sm:$0x3] }
 0x120   : > { %v2136_v10 = vadd.f32 %v3274_v39, %v2100_v48  ;;  %v706_v47 = vadd.f32 %v605_v35, %v464_v51  ;;  %v707_v61 = vadd.f32 %v607_v45, %v465_v4  ;;  %v847_v49 = vsel %vm829_vm4, %v845_v53, %v846_v38  ;;  %v3694_v46 = vld [vmem:[%s4039_s1 + $0x8] ss:$0 sm:$0xff] }
 0x121   : > { %v2137_v14 = vadd.f32 %v3274_v39, %v2101_v23  ;;  %v849_v43 = vsel %vm829_vm4, %v846_v38, %v848_v54  ;;  %v982_v19 = vmul.f32 %v3435_v17, %v2665_v29  ;;  %v1049_v3 = vmul.f32 %v3427_v36, %v2669_v32 }
 0x122   : > { %v948_v1 = vadd.f32 %v847_v49, %v706_v47  ;;  %v949_v60 = vadd.f32 %v849_v43, %v707_v61  ;;  %v1050_v44 = vmul.f32 %v3435_v17, %v2669_v32  ;;  %v1051_v55 = vmul.f32 %v3446_v50, %v2669_v32 }
 0x123   : > { %v2154_v51 = vpack.c.bf16 %v2137_v14, %v2136_v10  ;;  %v1151_v12 = vrot.slane %v1049_v3, 1  ;;  %v1290_v39 = vmul.f32 %v3427_v36, %v2671_v33  ;;  %v1291_v2 = vmul.f32 %v3435_v17, %v2671_v33  ;;  %v2535_v14 = vld [vmem:[#allocation2 + $0xa8] sm:$0xff] }
 0x124   : > { %v1013_v13 = vadd.f32 %v981_v18, %v948_v1  ;;  %v1014_v25 = vadd.f32 %v982_v19, %v949_v60  ;;  %v1152_v52 = vrot.slane %v1050_v44, 1  ;;  %v1154_v20 = vrot.slane %v1051_v55, 1  ;;  %v2536_v60 = vld [vmem:[#allocation2 + $0xb0] sm:$0xff] }
 0x125   : > { %2481 = vmatmul.msk.bf16.gmra.mxu3 %vm312_vm1, %v2154_v51  ;;  %v1292_v37 = vmul.f32 %v3446_v50, %v2671_v33  ;;  %v1392_v4 = vrot.slane %v1290_v39, 2  ;;  %v1393_v62 = vrot.slane %v1291_v2, 2  ;;  %v1528_v56 = vmul.f32 %v2531_v34, %v2683_v40 }
 0x126   : > { %v1153_v9 = vsel %vm587_vm3, %v1151_v12, %v1152_v52  ;;  %v1155_v36 = vsel %vm587_vm3, %v1152_v52, %v1154_v20  ;;  %v1529_v17 = vmul.f32 %v2532_v0, %v2683_v40  ;;  %v1596_v15 = vmul.f32 %v2531_v34, %v2685_v41 }
 0x127   : > { %v1254_v8 = vadd.f32 %v1153_v9, %v1013_v13  ;;  %v1255_v24 = vadd.f32 %v1155_v36, %v1014_v25  ;;  %v1394_v16 = vsel %vm829_vm4, %v1392_v4, %v1393_v62  ;;  %v1395_v11 = vrot.slane %v1292_v37, 2  ;;  %v2537_v25 = vld [vmem:[#allocation2 + $0xb8] sm:$0x3] }
 0x128   : > { %v1597_v50 = vmul.f32 %v2532_v0, %v2685_v41  ;;  %v1598_v58 = vmul.f32 %v2533_v27, %v2685_v41  ;;  %v1698_v26 = vrot.slane %v1596_v15, 1  ;;  %v1837_v48 = vmul.f32 %v3694_v46, %v2531_v34 }
 0x129   : > { %v1396_v53 = vsel %vm829_vm4, %v1393_v62, %v1395_v11  ;;  %v1495_v38 = vadd.f32 %v1394_v16, %v1254_v8  ;;  %v1838_v18 = vmul.f32 %v3694_v46, %v2532_v0  ;;  %v1839_v23 = vmul.f32 %v3694_v46, %v2533_v27 }
 0x12a   : > { %v1496_v35 = vadd.f32 %v1396_v53, %v1255_v24  ;;  %v1699_v45 = vrot.slane %v1597_v50, 1  ;;  %v1701_v54 = vrot.slane %v1598_v58, 1  ;;  %v1939_v10 = vrot.slane %v1837_v48, 2 }
 0x12b   : > { %v1560_v47 = vadd.f32 %v1528_v56, %v1495_v38  ;;  %v1940_v61 = vrot.slane %v1838_v18, 2  ;;  %v1942_v49 = vrot.slane %v1839_v23, 2  ;;  %v472_v43 = vmul.f32 %v2535_v14, %v2641_v7 }
 0x12c   : > { %v1561_v19 = vadd.f32 %v1529_v17, %v1496_v35  ;;  %v1700_v3 = vsel %vm587_vm3, %v1698_v26, %v1699_v45  ;;  %v1702_v1 = vsel %vm587_vm3, %v1699_v45, %v1701_v54  ;;  %v473_v44 = vmul.f32 %v2536_v60, %v2641_v7  ;;  %v3715_v17 = vld [vmem:[%s4040_s2] ss:$0 sm:$0xff] }
 0x12d   : > { %v1801_v55 = vadd.f32 %v1700_v3, %v1560_v47  ;;  %v1941_v51 = vsel %vm829_vm4, %v1939_v10, %v1940_v61  ;;  %v1943_v12 = vsel %vm829_vm4, %v1940_v61, %v1942_v49  ;;  %v512_v39 = vmul.f32 %v2535_v14, %v2628_v5  ;;  %v3728_v26 = vld [vmem:[%s4041_s3] ss:$0 sm:$0xff] }
 0x12e   : > { %v1802_v2 = vadd.f32 %v1702_v1, %v1561_v19  ;;  %v513_v13 = vmul.f32 %v2536_v60, %v2628_v5  ;;  %v514_v52 = vmul.f32 %v2537_v25, %v2628_v5  ;;  %v754_v20 = vmul.f32 %v2535_v14, %v2630_v6 }
 0x12f   : > { %v2042_v37 = vadd.f32 %v1941_v51, %v1801_v55  ;;  %v623_v4 = vrot.slane %v512_v39, 1  ;;  %v755_v62 = vmul.f32 %v2536_v60, %v2630_v6  ;;  %v756_v34 = vmul.f32 %v2537_v25, %v2630_v6 }
 0x130   : > { %v2043_v56 = vadd.f32 %v1943_v12, %v1802_v2  ;;  %v624_v9 = vrot.slane %v513_v13, 1  ;;  %v626_v36 = vrot.slane %v514_v52, 1  ;;  %v865_v0 = vrot.slane %v754_v20, 2  ;;  %v2540_v2 = vld [vmem:[#allocation2 + $0xd8] sm:$0xff] }
 0x131   : > { %v2078_v15 = vmul.f32 %v3715_v17, %v2042_v37  ;;  %v866_v8 = vrot.slane %v755_v62, 2  ;;  %v868_v24 = vrot.slane %v756_v34, 2  ;;  %v989_v16 = vmul.f32 %v3495_v31, %v2665_v29 }
 0x132   : > { %v2079_v11 = vmul.f32 %v3715_v17, %v2043_v56  ;;  %v625_v50 = vsel %vm587_vm3, %v623_v4, %v624_v9  ;;  %v627_v27 = vsel %vm587_vm3, %v624_v9, %v626_v36  ;;  %v990_v58 = vmul.f32 %v3500_v42, %v2665_v29  ;;  %v2542_v9 = vld [vmem:[#allocation2 + $0xe8] sm:$0x3] }
 0x133   : > { %v2114_v48 = vadd.f32 %v3728_v26, %v2078_v15  ;;  %v714_v53 = vadd.f32 %v625_v50, %v472_v43  ;;  %v715_v38 = vadd.f32 %v627_v27, %v473_v44  ;;  %v867_v18 = vsel %vm829_vm4, %v865_v0, %v866_v8 }
 0x134   : > { %v2115_v23 = vadd.f32 %v3728_v26, %v2079_v11  ;;  %v869_v35 = vsel %vm829_vm4, %v866_v8, %v868_v24  ;;  %v1061_v45 = vmul.f32 %v3495_v31, %v2669_v32  ;;  %v1062_v54 = vmul.f32 %v3500_v42, %v2669_v32 }
 0x135   : > { %v956_v10 = vadd.f32 %v867_v18, %v714_v53  ;;  %v957_v47 = vadd.f32 %v869_v35, %v715_v38  ;;  %v1063_v61 = vmul.f32 %v3510_v57, %v2669_v32  ;;  %v1302_v49 = vmul.f32 %v3495_v31, %v2671_v33  ;;  %v2543_v18 = vld [vmem:[#allocation2 + $0x108] sm:$0xff] }
 0x136   : > { %v2143_v14 = vpack.c.bf16 %v2115_v23, %v2114_v48  ;;  %v1171_v43 = vrot.slane %v1061_v45, 1  ;;  %v1172_v19 = vrot.slane %v1062_v54, 1  ;;  %v1303_v3 = vmul.f32 %v3500_v42, %v2671_v33  ;;  %v2541_v42 = vld [vmem:[#allocation2 + $0xe0] sm:$0xff] }
 0x137   : > { %v1021_v1 = vadd.f32 %v989_v16, %v956_v10  ;;  %v1022_v60 = vadd.f32 %v990_v58, %v957_v47  ;;  %v1174_v44 = vrot.slane %v1063_v61, 1  ;;  %v1304_v55 = vmul.f32 %v3510_v57, %v2671_v33  ;;  %v2544_v10 = vld [vmem:[#allocation2 + $0x110] sm:$0xff] }
 0x138   : > { %2470 = vmatmul.msk.bf16.gmra.mxu0 %vm312_vm1, %v2143_v14  ;;  %v1173_v51 = vsel %vm587_vm3, %v1171_v43, %v1172_v19  ;;  %v1412_v12 = vrot.slane %v1302_v49, 2  ;;  %v1413_v39 = vrot.slane %v1303_v3, 2  ;;  %v1536_v31 = vmul.f32 %v2540_v2, %v2683_v40 }
 0x139   : > { %v1175_v13 = vsel %vm587_vm3, %v1172_v19, %v1174_v44  ;;  %v1262_v25 = vadd.f32 %v1173_v51, %v1021_v1  ;;  %v1415_v52 = vrot.slane %v1304_v55, 2  ;;  %v1537_v20 = vmul.f32 %v2541_v42, %v2683_v40  ;;  %v2545_v1 = vld [vmem:[#allocation2 + $0x118] sm:$0x3] }
 0x13a   : > { %v1263_v37 = vadd.f32 %v1175_v13, %v1022_v60  ;;  %v1414_v4 = vsel %vm829_vm4, %v1412_v12, %v1413_v39  ;;  %v1608_v57 = vmul.f32 %v2540_v2, %v2685_v41  ;;  %v1609_v62 = vmul.f32 %v2541_v42, %v2685_v41 }
 0x13b   : > { %v1416_v34 = vsel %vm829_vm4, %v1413_v39, %v1415_v52  ;;  %v1503_v56 = vadd.f32 %v1414_v4, %v1262_v25  ;;  %v1610_v36 = vmul.f32 %v2542_v9, %v2685_v41  ;;  %v1849_v0 = vmul.f32 %v2540_v2, %v3694_v46 }
 0x13c   : > { %v1504_v15 = vadd.f32 %v1416_v34, %v1263_v37  ;;  %v1718_v8 = vrot.slane %v1608_v57, 1  ;;  %v1719_v24 = vrot.slane %v1609_v62, 1  ;;  %v1850_v16 = vmul.f32 %v2541_v42, %v3694_v46 }
 0x13d   : > { %v1568_v11 = vadd.f32 %v1536_v31, %v1503_v56  ;;  %v1721_v50 = vrot.slane %v1610_v36, 1  ;;  %v1851_v27 = vmul.f32 %v2542_v9, %v3694_v46  ;;  %v1959_v58 = vrot.slane %v1849_v0, 2 }
 0x13e   : > { %v1569_v48 = vadd.f32 %v1537_v20, %v1504_v15  ;;  %v1720_v53 = vsel %vm587_vm3, %v1718_v8, %v1719_v24  ;;  %v1960_v38 = vrot.slane %v1850_v16, 2  ;;  %v480_v23 = vmul.f32 %v2543_v18, %v2641_v7 }
 0x13f   : > { %v1722_v35 = vsel %vm587_vm3, %v1719_v24, %v1721_v50  ;;  %v1809_v45 = vadd.f32 %v1720_v53, %v1568_v11  ;;  %v1962_v54 = vrot.slane %v1851_v27, 2  ;;  %v481_v47 = vmul.f32 %v2544_v10, %v2641_v7 }
 0x140   : > { %v1810_v61 = vadd.f32 %v1722_v35, %v1569_v48  ;;  %v1961_v49 = vsel %vm829_vm4, %v1959_v58, %v1960_v38  ;;  %v524_v14 = vmul.f32 %v2543_v18, %v2628_v5  ;;  %v525_v43 = vmul.f32 %v2544_v10, %v2628_v5 }
 0x141   : > { %v1963_v19 = vsel %vm829_vm4, %v1960_v38, %v1962_v54  ;;  %v2050_v3 = vadd.f32 %v1961_v49, %v1809_v45  ;;  %v526_v60 = vmul.f32 %v2545_v1, %v2628_v5  ;;  %v766_v44 = vmul.f32 %v2543_v18, %v2630_v6  ;;  %v2547_v49 = vld [vmem:[#allocation2 + $0x140] sm:$0xff] }
 0x142   : > { %v2051_v55 = vadd.f32 %v1963_v19, %v1810_v61  ;;  %v643_v51 = vrot.slane %v524_v14, 1  ;;  %v644_v12 = vrot.slane %v525_v43, 1  ;;  %v767_v39 = vmul.f32 %v2544_v10, %v2630_v6  ;;  %v2546_v61 = vld [vmem:[#allocation2 + $0x138] sm:$0xff] }
 0x143   : > { %v2086_v2 = vmul.f32 %v3715_v17, %v2050_v3  ;;  %v646_v31 = vrot.slane %v526_v60, 1  ;;  %v768_v13 = vmul.f32 %v2545_v1, %v2630_v6  ;;  %v885_v25 = vrot.slane %v766_v44, 2  ;;  %v2548_v44 = vld [vmem:[#allocation2 + $0x148] sm:$0x3] }
 0x144   : > { %v2087_v52 = vmul.f32 %v3715_v17, %v2051_v55  ;;  %v645_v42 = vsel %vm587_vm3, %v643_v51, %v644_v12  ;;  %v886_v20 = vrot.slane %v767_v39, 2  ;;  %v997_v37 = vmul.f32 %v3558_v28, %v2665_v29 }
 0x145   : > { %v2122_v4 = vadd.f32 %v3728_v26, %v2086_v2  ;;  %v647_v57 = vsel %vm587_vm3, %v644_v12, %v646_v31  ;;  %v722_v62 = vadd.f32 %v645_v42, %v480_v23  ;;  %v888_v34 = vrot.slane %v768_v13, 2 }
 0x146   : > { %v2123_v56 = vadd.f32 %v3728_v26, %v2087_v52  ;;  %v723_v9 = vadd.f32 %v647_v57, %v481_v47  ;;  %v887_v36 = vsel %vm829_vm4, %v885_v25, %v886_v20  ;;  %v998_v0 = vmul.f32 %v3562_v30, %v2665_v29 }
 0x147   : > { %v889_v15 = vsel %vm829_vm4, %v886_v20, %v888_v34  ;;  %v964_v8 = vadd.f32 %v887_v36, %v722_v62  ;;  %v1073_v24 = vmul.f32 %v3558_v28, %v2669_v32  ;;  %v1074_v16 = vmul.f32 %v3562_v30, %v2669_v32  ;;  %v3809_v62 = vpop.f32.mrf.mxu0  ;;  %v3811_v34 = vpop.f32.mrf.mxu1 }
 0x148   : > { %v2147_v11 = vpack.c.bf16 %v2123_v56, %v2122_v4  ;;  %v965_v50 = vadd.f32 %v889_v15, %v723_v9  ;;  %v1075_v27 = vmul.f32 %v3572_v59, %v2669_v32  ;;  %v1314_v58 = vmul.f32 %v3558_v28, %v2671_v33  ;;  %v2549_v4 = vld [vmem:[#allocation2 + $0x168] sm:$0xff]  ;;  %v3815_v15 = vpop.f32.mrf.mxu2 }
 0x149   : > { %v1029_v48 = vadd.f32 %v997_v37, %v964_v8  ;;  %v1191_v53 = vrot.slane %v1073_v24, 1  ;;  %v1192_v38 = vrot.slane %v1074_v16, 1  ;;  %v1315_v18 = vmul.f32 %v3562_v30, %v2671_v33  ;;  %v3817_v8 = vpop.f32.mrf.mxu3 }
 0x14a   : > { %2474 = vmatmul.msk.bf16.gmra.mxu1 %vm312_vm1, %v2147_v11  ;;  %v1030_v23 = vadd.f32 %v998_v0, %v965_v50  ;;  %v1194_v35 = vrot.slane %v1075_v27, 1  ;;  %v1316_v45 = vmul.f32 %v3572_v59, %v2671_v33  ;;  %v1432_v54 = vrot.slane %v1314_v58, 2  ;;  %v2550_v11 = vld [vmem:[#allocation2 + $0x170] sm:$0xff] }
 0x14b   : > { %v1193_v10 = vsel %vm587_vm3, %v1191_v53, %v1192_v38  ;;  %v1433_v47 = vrot.slane %v1315_v18, 2  ;;  %v1544_v28 = vmul.f32 %v2546_v61, %v2683_v40  ;;  %v1545_v14 = vmul.f32 %v2547_v49, %v2683_v40 }
 0x14c   : > { %v1195_v43 = vsel %vm587_vm3, %v1192_v38, %v1194_v35  ;;  %v1270_v30 = vadd.f32 %v1193_v10, %v1029_v48  ;;  %v1435_v19 = vrot.slane %v1316_v45, 2  ;;  %v1620_v3 = vmul.f32 %v2546_v61, %v2685_v41  ;;  %v2551_v38 = vld [vmem:[#allocation2 + $0x178] sm:$0x3] }
 0x14d   : > { %v1271_v1 = vadd.f32 %v1195_v43, %v1030_v23  ;;  %v1434_v60 = vsel %vm829_vm4, %v1432_v54, %v1433_v47  ;;  %v1621_v59 = vmul.f32 %v2547_v49, %v2685_v41  ;;  %v1622_v55 = vmul.f32 %v2548_v44, %v2685_v41 }
 0x14e   : > { %v1436_v51 = vsel %vm829_vm4, %v1433_v47, %v1435_v19  ;;  %v1511_v12 = vadd.f32 %v1434_v60, %v1270_v30  ;;  %v1738_v39 = vrot.slane %v1620_v3, 1  ;;  %v1861_v2 = vmul.f32 %v2546_v61, %v3694_v46 }
 0x14f   : > { %v1512_v31 = vadd.f32 %v1436_v51, %v1271_v1  ;;  %v1739_v13 = vrot.slane %v1621_v59, 1  ;;  %v1741_v25 = vrot.slane %v1622_v55, 1  ;;  %v1862_v52 = vmul.f32 %v2547_v49, %v3694_v46  ;;  %v3835_v55 = vpop.f32.mrf.mxu0  ;;  %v3837_v51 = vpop.f32.mrf.mxu1 }
 0x150   : > { %v1576_v42 = vadd.f32 %v1544_v28, %v1511_v12  ;;  %v1863_v20 = vmul.f32 %v2548_v44, %v3694_v46  ;;  %v1979_v37 = vrot.slane %v1861_v2, 2  ;;  %v488_v57 = vmul.f32 %v2549_v4, %v2641_v7 }
 0x151   : > { %v1577_v56 = vadd.f32 %v1545_v14, %v1512_v31  ;;  %v1740_v9 = vsel %vm587_vm3, %v1738_v39, %v1739_v13  ;;  %v1742_v36 = vsel %vm587_vm3, %v1739_v13, %v1741_v25  ;;  %v1980_v0 = vrot.slane %v1862_v52, 2  ;;  %v3845_v31 = vpop.f32.mrf.mxu2  ;;  %v3847_v13 = vpop.f32.mrf.mxu3  ;;  %v452_v25 = vld [vmem:[#allocation2 + $0x198] sm:$0xff] }
 0x152   : > { %v1817_v24 = vadd.f32 %v1740_v9, %v1576_v42  ;;  %v1982_v16 = vrot.slane %v1863_v20, 2  ;;  %v489_v50 = vmul.f32 %v2550_v11, %v2641_v7  ;;  %v536_v27 = vmul.f32 %v2549_v4, %v2628_v5 }
 0x153   : > { %v1818_v58 = vadd.f32 %v1742_v36, %v1577_v56  ;;  %v1981_v48 = vsel %vm829_vm4, %v1979_v37, %v1980_v0  ;;  %v537_v53 = vmul.f32 %v2550_v11, %v2628_v5  ;;  %v538_v18 = vmul.f32 %v2551_v38, %v2628_v5 }
 0x154   : > { %v1983_v23 = vsel %vm829_vm4, %v1980_v0, %v1982_v16  ;;  %v2058_v35 = vadd.f32 %v1981_v48, %v1817_v24  ;;  %v663_v45 = vrot.slane %v536_v27, 1  ;;  %v778_v54 = vmul.f32 %v2549_v4, %v2630_v6 }
 0x155   : > { %v2059_v10 = vadd.f32 %v1983_v23, %v1818_v58  ;;  %v664_v47 = vrot.slane %v537_v53, 1  ;;  %v666_v61 = vrot.slane %v538_v18, 1  ;;  %v779_v7 = vmul.f32 %v2550_v11, %v2630_v6  ;;  %v454_v11 = vld [vmem:[#allocation2 + $0x1a8] sm:$0x3] }
 0x156   : > { %v2094_v28 = vmul.f32 %v3715_v17, %v2058_v35  ;;  %v780_v49 = vmul.f32 %v2551_v38, %v2630_v6  ;;  %v905_v14 = vrot.slane %v778_v54, 2  ;;  %v1005_v43 = vmul.f32 %v2665_v29, %v3608_v63 }
 0x157   : > { %v2095_v5 = vmul.f32 %v3715_v17, %v2059_v10  ;;  %v665_v30 = vsel %vm587_vm3, %v663_v45, %v664_v47  ;;  %v667_v19 = vsel %vm587_vm3, %v664_v47, %v666_v61  ;;  %v906_v3 = vrot.slane %v779_v7, 2  ;;  %v3869_v45 = vld [vmem:[%s4043_s5] ss:$0 sm:$0xff]  ;;  %v2224_v47 = vpop.f32.mrf.mxu0 }
 0x158   : > { %v2130_v1 = vadd.f32 %v3728_v26, %v2094_v28  ;;  %v730_v60 = vadd.f32 %v665_v30, %v488_v57  ;;  %v731_v59 = vadd.f32 %v667_v19, %v489_v50  ;;  %v908_v44 = vrot.slane %v780_v49, 2  ;;  %v453_v57 = vld [vmem:[#allocation2 + $0x1a0] sm:$0xff] }
 0x159   : > { %v2131_v6 = vadd.f32 %v3728_v26, %v2095_v5  ;;  %v907_v12 = vsel %vm829_vm4, %v905_v14, %v906_v3  ;;  %v1006_v39 = vmul.f32 %v2665_v29, %v3615_v22  ;;  %v1085_v2 = vmul.f32 %v2669_v32, %v3608_v63  ;;  %v3880_v14 = vld [vmem:[%s4044_s6] ss:$0 sm:$0xff]  ;;  %v2264_v19 = vpop.f32.mrf.mxu2 }
 0x15a   : > { %v909_v52 = vsel %vm829_vm4, %v906_v3, %v908_v44  ;;  %v972_v42 = vadd.f32 %v907_v12, %v730_v60  ;;  %v1086_v20 = vmul.f32 %v2669_v32, %v3615_v22  ;;  %v1087_v37 = vmul.f32 %v2669_v32, %v3622_v21 }
 0x15b   : > { %v2151_v4 = vpack.c.bf16 %v2131_v6, %v2130_v1  ;;  %v973_v29 = vadd.f32 %v909_v52, %v731_v59  ;;  %v1211_v56 = vrot.slane %v1085_v2, 1  ;;  %v1326_v9 = vmul.f32 %v2671_v33, %v3608_v63 }
 0x15c   : > { %v1037_v36 = vadd.f32 %v1005_v43, %v972_v42  ;;  %v1212_v0 = vrot.slane %v1086_v20, 1  ;;  %v1214_v24 = vrot.slane %v1087_v37, 1  ;;  %v1327_v16 = vmul.f32 %v2671_v33, %v3615_v22 }
 0x15d   : > { %2478 = vmatmul.msk.bf16.gmra.mxu2 %vm312_vm1, %v2151_v4  ;;  %v1038_v50 = vadd.f32 %v1006_v39, %v973_v29  ;;  %v1328_v32 = vmul.f32 %v2671_v33, %v3622_v21  ;;  %v1452_v27 = vrot.slane %v1326_v9, 2  ;;  %v1552_v58 = vmul.f32 %v2683_v40, %v452_v25  ;;  %v2284_v44 = vpop.f32.mrf.mxu3 }
 0x15e   : > { %v1213_v48 = vsel %vm587_vm3, %v1211_v56, %v1212_v0  ;;  %v1215_v63 = vsel %vm587_vm3, %v1212_v0, %v1214_v24  ;;  %v1453_v53 = vrot.slane %v1327_v16, 2  ;;  %v1553_v38 = vmul.f32 %v2683_v40, %v453_v57  ;;  %v2244_v40 = vpop.f32.mrf.mxu1 }
 0x15f   : > { %v1278_v18 = vadd.f32 %v1213_v48, %v1037_v36  ;;  %v1279_v23 = vadd.f32 %v1215_v63, %v1038_v50  ;;  %v1455_v22 = vrot.slane %v1328_v32, 2  ;;  %v1632_v35 = vmul.f32 %v2685_v41, %v452_v25  ;;  %v2226_v0 = vpop.f32.mrf.mxu0 }
 0x160   : > { %v1454_v33 = vsel %vm829_vm4, %v1452_v27, %v1453_v53  ;;  %v1633_v21 = vmul.f32 %v2685_v41, %v453_v57  ;;  %v1634_v54 = vmul.f32 %v2685_v41, %v454_v11  ;;  %v1873_v10 = vmul.f32 %v3694_v46, %v452_v25 }
 0x161   : > { %v1456_v61 = vsel %vm829_vm4, %v1453_v53, %v1455_v22  ;;  %v1519_v7 = vadd.f32 %v1454_v33, %v1278_v18  ;;  %v1758_v28 = vrot.slane %v1632_v35, 1  ;;  %v1874_v49 = vmul.f32 %v3694_v46, %v453_v57  ;;  %v2266_v18 = vpop.f32.mrf.mxu2 }
 0x162   : > { %v1520_v43 = vadd.f32 %v1456_v61, %v1279_v23  ;;  %v1759_v5 = vrot.slane %v1633_v21, 1  ;;  %v1761_v30 = vrot.slane %v1634_v54, 1  ;;  %v1875_v41 = vmul.f32 %v3694_v46, %v454_v11 }
 0x163   : > { %v1584_v3 = vadd.f32 %v1552_v58, %v1519_v7  ;;  %v1999_v1 = vrot.slane %v1873_v10, 2  ;;  %v2000_v60 = vrot.slane %v1874_v49, 2  ;;  %v2303_v59 = vmul.f32 %v3869_v45, %v3809_v62 }
 0x164   : > { %v1585_v6 = vadd.f32 %v1553_v38, %v1520_v43  ;;  %v1760_v12 = vsel %vm587_vm3, %v1758_v28, %v1759_v5  ;;  %v1762_v39 = vsel %vm587_vm3, %v1759_v5, %v1761_v30  ;;  %v2002_v2 = vrot.slane %v1875_v41, 2 }
 0x165   : > { %v1825_v46 = vadd.f32 %v1760_v12, %v1584_v3  ;;  %v2001_v25 = vsel %vm829_vm4, %v1999_v1, %v2000_v60  ;;  %v2339_v52 = vadd.f32 %v3880_v14, %v2303_v59  ;;  %v2311_v62 = vmul.f32 %v3869_v45, %v3811_v34  ;;  %v2286_v35 = vpop.f32.mrf.mxu3 }
 0x166   : > { %v1826_v42 = vadd.f32 %v1762_v39, %v1585_v6  ;;  %v2003_v20 = vsel %vm829_vm4, %v2000_v60, %v2002_v2  ;;  %v2304_v37 = vmul.f32 %v3869_v45, %v3835_v55  ;;  %v2319_v4 = vmul.f32 %v3869_v45, %v3815_v15  ;;  %v2246_v58 = vpop.f32.mrf.mxu1 }
 0x167   : > { %v2066_v57 = vadd.f32 %v2001_v25, %v1825_v46  ;;  %2371 = vst.msk [vmem:[%s3892_s15] sm:$0xff] %vm312_vm1, %v2339_v52  ;;  %v2347_v29 = vadd.f32 %v3880_v14, %v2311_v62  ;;  %v2327_v56 = vmul.f32 %v3869_v45, %v3817_v8  ;;  %v2312_v34 = vmul.f32 %v3869_v45, %v3837_v51 }
 0x168   : > { %v2067_v9 = vadd.f32 %v2003_v20, %v1826_v42  ;;  %v2340_v36 = vadd.f32 %v3880_v14, %v2304_v37  ;;  %v2355_v55 = vadd.f32 %v3880_v14, %v2319_v4  ;;  %v2305_v15 = vmul.f32 %v3869_v45, %v2224_v47 }
 0x169   : > { %v2102_v24 = vmul.f32 %v3715_v17, %v2066_v57  ;;  %2379 = vst.msk [vmem:[%s3892_s15 + $0x40] sm:$0xff] %vm312_vm1, %v2347_v29  ;;  %v2363_v16 = vadd.f32 %v3880_v14, %v2327_v56  ;;  %v2348_v8 = vadd.f32 %v3880_v14, %v2312_v34  ;;  %v2320_v51 = vmul.f32 %v3869_v45, %v3845_v31 }
 0x16a   : > { %v2103_v11 = vmul.f32 %v3715_v17, %v2067_v9  ;;  %2372 = vst.msk [vmem:[%s3892_s15 + $0x8] sm:$0xff] %vm312_vm1, %v2340_v36  ;;  %v2341_v50 = vadd.f32 %v3880_v14, %v2305_v15  ;;  %v2328_v32 = vmul.f32 %v3869_v45, %v3847_v13  ;;  %v2313_v27 = vmul.f32 %v3869_v45, %v2244_v40  ;;  %v2229_v47 = vpop.f32.mrf.mxu0 }
 0x16b   : > { %v2138_v48 = vadd.f32 %v3728_v26, %v2102_v24  ;;  %2387 = vst.msk [vmem:[%s3892_s15 + $0x80] sm:$0xff] %vm312_vm1, %v2355_v55  ;;  %v2356_v31 = vadd.f32 %v3880_v14, %v2320_v51  ;;  %v2306_v17 = vmul.f32 %v3869_v45, %v2226_v0  ;;  %v2321_v63 = vmul.f32 %v3869_v45, %v2264_v19 }
 0x16c   : > { %v2139_v53 = vadd.f32 %v3728_v26, %v2103_v11  ;;  %2395 = vst.msk [vmem:[%s3892_s15 + $0xc0] sm:$0xff] %vm312_vm1, %v2363_v16  ;;  %v2364_v13 = vadd.f32 %v3880_v14, %v2328_v32  ;;  %v2329_v38 = vmul.f32 %v3869_v45, %v2284_v44  ;;  %v2349_v23 = vadd.f32 %v3880_v14, %v2313_v27 }
 0x16d   : > { %2380 = vst.msk [vmem:[%s3892_s15 + $0x48] sm:$0xff] %vm312_vm1, %v2348_v8  ;;  %v2314_v22 = vmul.f32 %v3869_v45, %v2246_v58  ;;  %v2342_v26 = vadd.f32 %v3880_v14, %v2306_v17  ;;  %v2357_v21 = vadd.f32 %v3880_v14, %v2321_v63  ;;  %v2322_v54 = vmul.f32 %v3869_v45, %v2266_v18 }
 0x16e   : > { %v2155_v33 = vpack.c.bf16 %v2139_v53, %v2138_v48  ;;  %2373 = vst.msk [vmem:[%s3892_s15 + $0x10] sm:$0xff] %vm312_vm1, %v2341_v50  ;;  %v2365_v10 = vadd.f32 %v3880_v14, %v2329_v38  ;;  %v2330_v40 = vmul.f32 %v3869_v45, %v2286_v35  ;;  %v2307_v7 = vmul.f32 %v3869_v45, %v2229_v47 }
 0x16f   : > { %2388 = vst.msk [vmem:[%s3892_s15 + $0x88] sm:$0xff] %vm312_vm1, %v2356_v31  ;;  %v2350_v61 = vadd.f32 %v3880_v14, %v2314_v22  ;;  %v2358_v49 = vadd.f32 %v3880_v14, %v2322_v54 }
 0x170   : > { %2482 = vmatmul.msk.bf16.gmra.mxu3 %vm312_vm1, %v2155_v33  ;;  %2396 = vst.msk [vmem:[%s3892_s15 + $0xc8] sm:$0xff] %vm312_vm1, %v2364_v13  ;;  %v2343_v28 = vadd.f32 %v3880_v14, %v2307_v7  ;;  %v2366_v43 = vadd.f32 %v3880_v14, %v2330_v40 }
 0x171   : > { %2381 = vst.msk [vmem:[%s3892_s15 + $0x50] sm:$0xff] %vm312_vm1, %v2349_v23 }
 0x172   : > { %2374 = vst.msk [vmem:[%s3892_s15 + $0x18] sm:$0xff] %vm312_vm1, %v2342_v26  ;;  %v2231_v5 = vpop.f32.mrf.mxu0 }
 0x173   : > { %2389 = vst.msk [vmem:[%s3892_s15 + $0x90] sm:$0xff] %vm312_vm1, %v2357_v21  ;;  %v2308_v30 = vmul.f32 %v3869_v45, %v2231_v5 }
 0x174   : > { %2397 = vst.msk [vmem:[%s3892_s15 + $0xd0] sm:$0xff] %vm312_vm1, %v2365_v10 }
 0x175   : > { %2382 = vst.msk [vmem:[%s3892_s15 + $0x58] sm:$0xff] %vm312_vm1, %v2350_v61  ;;  %v2344_v41 = vadd.f32 %v3880_v14, %v2308_v30 }
 0x176   : > { %2375 = vst.msk [vmem:[%s3892_s15 + $0x20] sm:$0xff] %vm312_vm1, %v2343_v28 }
 0x177   : > { %2390 = vst.msk [vmem:[%s3892_s15 + $0x98] sm:$0xff] %vm312_vm1, %v2358_v49 }
 0x178   : > { %2398 = vst.msk [vmem:[%s3892_s15 + $0xd8] sm:$0xff] %vm312_vm1, %v2366_v43 }
 0x179   : > { %2376 = vst.msk [vmem:[%s3892_s15 + $0x28] sm:$0xff] %vm312_vm1, %v2344_v41 }
 0x17c   : > { %v2249_v19 = vpop.f32.mrf.mxu1 }
 0x17d   : > { %v2315_v3 = vmul.f32 %v3869_v45, %v2249_v19 }
 0x17f   : > { %v2351_v1 = vadd.f32 %v3880_v14, %v2315_v3 }
 0x181   : > { %2383 = vst.msk [vmem:[%s3892_s15 + $0x60] sm:$0xff] %vm312_vm1, %v2351_v1 }
 0x184   : > { %v2251_v60 = vpop.f32.mrf.mxu1 }
 0x185   : > { %v2316_v59 = vmul.f32 %v3869_v45, %v2251_v60 }
 0x187   : > { %v2352_v44 = vadd.f32 %v3880_v14, %v2316_v59 }
 0x189   : > { %2384 = vst.msk [vmem:[%s3892_s15 + $0x68] sm:$0xff] %vm312_vm1, %v2352_v44 }
 0x195   : > { %v2269_v6 = vpop.f32.mrf.mxu2 }
 0x196   : > { %v2323_v12 = vmul.f32 %v3869_v45, %v2269_v6 }
 0x198   : > { %v2359_v39 = vadd.f32 %v3880_v14, %v2323_v12 }
 0x19a   : > { %2391 = vst.msk [vmem:[%s3892_s15 + $0xa0] sm:$0xff] %vm312_vm1, %v2359_v39 }
 0x19d   : > { %v2271_v2 = vpop.f32.mrf.mxu2 }
 0x19e   : > { %v2324_v46 = vmul.f32 %v3869_v45, %v2271_v2 }
 0x1a0   : > { %v2360_v25 = vadd.f32 %v3880_v14, %v2324_v46 }
 0x1a2   : > { %2392 = vst.msk [vmem:[%s3892_s15 + $0xa8] sm:$0xff] %vm312_vm1, %v2360_v25 }
 0x1a8   : > { %v2289_v52 = vpop.f32.mrf.mxu3 }
 0x1a9   : > { %v2331_v62 = vmul.f32 %v3869_v45, %v2289_v52 }
 0x1ab   : > { %v2367_v42 = vadd.f32 %v3880_v14, %v2331_v62 }
 0x1ad   : > { %2399 = vst.msk [vmem:[%s3892_s15 + $0xe0] sm:$0xff] %vm312_vm1, %v2367_v42 }
 0x1b0   : > { %v2291_v20 = vpop.f32.mrf.mxu3 }
 0x1b1   : > { %v2332_v37 = vmul.f32 %v3869_v45, %v2291_v20 }
 0x1b3   : > { %v2368_v4 = vadd.f32 %v3880_v14, %v2332_v37 }
 0x1b5   : > { %v2234_v57 = vpop.f32.mrf.mxu0  ;;  %2400 = vst.msk [vmem:[%s3892_s15 + $0xe8] sm:$0xff] %vm312_vm1, %v2368_v4 }
 0x1b6   : > { %v2309_v29 = vmul.f32 %v3869_v45, %v2234_v57 }
 0x1b8   : > { %v2345_v56 = vadd.f32 %v3880_v14, %v2309_v29 }
 0x1ba   : > { %2377 = vst.msk [vmem:[%s3892_s15 + $0x30] sm:$0xff] %vm312_vm1, %v2345_v56 }
 0x1bd   : > { %v2236_v34 = vpop.f32.mrf.mxu0 }
 0x1be   : > { %v2310_v9 = vmul.f32 %v3869_v45, %v2236_v34 }
 0x1c0   : > { %v2346_v36 = vadd.f32 %v3880_v14, %v2310_v9 }
 0x1c2   : > { %2378 = vst.msk [vmem:[%s3892_s15 + $0x38] sm:$0xff] %vm312_vm1, %v2346_v36 }
 0x1c7   : > { %v2254_v55 = vpop.f32.mrf.mxu1 }
 0x1c8   : > { %v2317_v15 = vmul.f32 %v3869_v45, %v2254_v55 }
 0x1ca   : > { %v2353_v0 = vadd.f32 %v3880_v14, %v2317_v15 }
 0x1cc   : > { %2385 = vst.msk [vmem:[%s3892_s15 + $0x70] sm:$0xff] %vm312_vm1, %v2353_v0 }
 0x1cf   : > { %v2256_v24 = vpop.f32.mrf.mxu1 }
 0x1d0   : > { %v2318_v16 = vmul.f32 %v3869_v45, %v2256_v24 }
 0x1d2   : > { %v2354_v8 = vadd.f32 %v3880_v14, %v2318_v16 }
 0x1d4   : > { %2386 = vst.msk [vmem:[%s3892_s15 + $0x78] sm:$0xff] %vm312_vm1, %v2354_v8 }
 0x1e0   : > { %v2274_v51 = vpop.f32.mrf.mxu2 }
 0x1e1   : > { %v2325_v11 = vmul.f32 %v3869_v45, %v2274_v51 }
 0x1e3   : > { %v2361_v50 = vadd.f32 %v3880_v14, %v2325_v11 }
 0x1e5   : > { %2393 = vst.msk [vmem:[%s3892_s15 + $0xb0] sm:$0xff] %vm312_vm1, %v2361_v50 }
 0x1e8   : > { %v2276_v32 = vpop.f32.mrf.mxu2 }
 0x1e9   : > { %v2326_v27 = vmul.f32 %v3869_v45, %v2276_v32 }
 0x1eb   : > { %v2362_v58 = vadd.f32 %v3880_v14, %v2326_v27 }
 0x1ed   : > { %2394 = vst.msk [vmem:[%s3892_s15 + $0xb8] sm:$0xff] %vm312_vm1, %v2362_v58 }
 0x1f3   : > { %v2294_v48 = vpop.f32.mrf.mxu3 }
 0x1f4   : > { %v2333_v31 = vmul.f32 %v3869_v45, %v2294_v48 }
 0x1f6   : > { %v2369_v17 = vadd.f32 %v3880_v14, %v2333_v31 }
 0x1f8   : > { %2401 = vst.msk [vmem:[%s3892_s15 + $0xf0] sm:$0xff] %vm312_vm1, %v2369_v17 }
 0x1fb   : > { %v2296_v63 = vpop.f32.mrf.mxu3 }
 0x1fc   : > { %v2334_v53 = vmul.f32 %v3869_v45, %v2296_v63 }
 0x1fe   : > { %v2370_v13 = vadd.f32 %v3880_v14, %v2334_v53 }
 0x200   : > { %2402 = vst.msk [vmem:[%s3892_s15 + $0xf8] sm:$0xff] %vm312_vm1, %v2370_v13 }
 0x201 PF: > { %s17_s24 = sadd.s32 1, %s2558_s24  }
 0x202   : > { %p14_p4 = scmp.ge.s32.totalorder %s17_s24, 4  }
 0x204   :  { %16 = sbr.rel (!%p14_p4) target bundleno = 1 (0x1), region = 79 }

</bundles_post_ra>
